<compile_context>
chip_gen: v7x
topology: tpu7x:2x2x1
jax: 0.10.0
libtpu: 0.0.40
codegen_flags: <defaults>
</compile_context>

<pallas_src>
import functools

import jax
import jax.numpy as jnp
from jax.experimental import pallas as pl
from jax.experimental.pallas import tpu as pltpu

# Keep both the XLA reference and the in-kernel MXU matmuls in full f32 so the
# fold-into-weights refactor stays numerically tight against the module's math.
jax.config.update("jax_default_matmul_precision", "highest")


def _round_up(x, m):
    return ((x + m - 1) // m) * m


def _cdiv(a, b):
    return (a + b - 1) // b


def _vmem_capacity_bytes():
    """Physical VMEM of the attached TPU generation (fallback: v7x's 64 MiB)."""
    try:
        cap = getattr(pltpu.get_tpu_info(), "vmem_capacity_bytes", None)
        if cap:
            return int(cap)
    except Exception:
        pass
    return 64 * 1024 * 1024


def _choose_batch_tile(B, nd, itemsize):
    """Balanced, padding-aware batch tile (multiple of 8) sized against VMEM."""
    cap = _vmem_capacity_bytes()
    budget = min(cap // 2, 32 * 1024 * 1024)
    # Per batch row: 2 graphs x 2 pipeline buffers + ~6 rows of in-kernel
    # temporaries (x / rolled / running max per graph) + padded output buffers.
    per_row = (2 * 2 + 6) * nd * itemsize + 2 * 128 * 4
    bt_max = max(8, min(1024, (budget // per_row) // 8 * 8))
    # >= 2 balanced grid steps for big batches (v7x megacore); minimal padding
    # (e.g. B=300 -> two tiles of 152 instead of one 256 + one mostly-padding 256).
    min_steps = 2 if B > 8 else 1
    steps = max(_cdiv(B, bt_max), min_steps)
    bt = min(bt_max, _round_up(_cdiv(B, steps), 8))
    return bt, cap


def _graph_sim_kernel(g1_ref, g2_ref,            # VMEM (bt, N*D), streamed
                      w1a_ref, w1b_ref,          # VMEM (N*D, H), resident
                      b1_ref,                    # VMEM (1, H)
                      w2_ref, b2_ref,            # VMEM (H, 2), (1, 2)
                      out_ref,                   # VMEM (bt, 2)
                      *, chunk_k, feat_d):
    x1 = g1_ref[...]
    x2 = g2_ref[...]
    m1 = x1
    m2 = x2
    # Chunked max-pool over the K node rows of each chunk, entirely in lanes:
    # roll(x, +k*D) brings node row (k'-k) under node row k', so after K-1 steps the
    # lanes of the last node row of each chunk hold the chunk max.  Other lanes hold
    # partial / cross-chunk maxes and are multiplied by zero rows of w1a / w1b.
    for k in range(1, chunk_k):
        s = k * feat_d
        m1 = jnp.maximum(m1, pltpu.roll(x1, shift=s, axis=1))
        m2 = jnp.maximum(m2, pltpu.roll(x2, shift=s, axis=1))
    # Gate + node_choose_w + linear_1 folded into two MXU matmuls.
    h = (jnp.dot(m1, w1a_ref[...], precision=jax.lax.Precision.HIGHEST,
                 preferred_element_type=jnp.float32)
         + jnp.dot(m2, w1b_ref[...], precision=jax.lax.Precision.HIGHEST,
                   preferred_element_type=jnp.float32)
         + b1_ref[...])
    h = jnp.maximum(h, 0.0)
    o = jnp.dot(h, w2_ref[...], precision=jax.lax.Precision.HIGHEST,
                preferred_element_type=jnp.float32) + b2_ref[...]
    out_ref[...] = jnp.maximum(o, 0.0).astype(out_ref.dtype)


@jax.jit
def graph_similarity_no_gcn(g1, g2, door, ncw, w1, b1, w2, b2):
    B, N, D = g1.shape
    P = door.shape[-1]
    assert door.shape == ncw.shape
    # PyTorch MaxPool2d((N // P, 1)) silently floors for non-divisible N; we require
    # divisibility (the module's intended configuration).
    assert N % P == 0, "max_node_num must be divisible by pool_step"
    K = N // P
    ND = N * D
    H = w1.shape[1]
    f32 = jnp.float32

    # Fold door / node_choose_w into linear_1's weight.  Only the anchor rows
    # (last node row of each chunk) are non-zero: they pick out the chunk max that
    # the in-kernel roll/max places there and apply the gate + chunk weight.
    coef_a = (ncw * door).reshape(P).astype(f32)           # door_p * ncw_p
    coef_b = (ncw * (1.0 - door)).reshape(P).astype(f32)   # (1 - door_p) * ncw_p
    w1f = w1.astype(f32)
    w1a = jnp.zeros((P, K, D, H), f32).at[:, K - 1].set(
        coef_a[:, None, None] * w1f[None]).reshape(ND, H)
    w1b = jnp.zeros((P, K, D, H), f32).at[:, K - 1].set(
        coef_b[:, None, None] * w1f[None]).reshape(ND, H)

    # Lane-dense streaming layout (metadata-only reshape).
    # Note: streaming as bf16 would halve HBM traffic (~2x on this mem-bound op)
    # but changes precision; kept f32 to match the module exactly.
    g1r = g1.astype(f32).reshape(B, ND)
    g2r = g2.astype(f32).reshape(B, ND)

    bt, vmem_cap = _choose_batch_tile(B, ND, 4)
    Bp = _round_up(B, bt)
    if Bp != B:
        g1r = jnp.pad(g1r, ((0, Bp - B), (0, 0)))
        g2r = jnp.pad(g2r, ((0, Bp - B), (0, 0)))

    grid = (Bp // bt,)
    g_spec = pl.BlockSpec((bt, ND), lambda b: (b, 0))

    # Generation-aware VMEM limit: double-buffered graph blocks + in-kernel
    # temporaries + resident weights + padded output buffers + headroom.
    graph_block = bt * ND * 4
    w_bytes = 2 * (2 * ND * _round_up(H, 128) + 8 * _round_up(H, 128)
                   + _round_up(H, 8) * 128 + 8 * 128) * 4
    needed = 2 * 2 * graph_block + 6 * graph_block + w_bytes + 2 * bt * 128 * 4
    vmem_limit = int(min(vmem_cap, max(needed + (4 << 20), 16 << 20)))

    cost = pl.CostEstimate(
        flops=Bp * (2 * 2 * ND * H + 2 * H * 2 + 2 * (K - 1) * ND),
        transcendentals=0,
        bytes_accessed=(2 * Bp * ND + Bp * 2 + 2 * ND * H + 2 * H + H * 2 + 2) * 4,
    )

    out = pl.pallas_call(
        functools.partial(_graph_sim_kernel, chunk_k=K, feat_d=D),
        out_shape=jax.ShapeDtypeStruct((Bp, 2), f32),
        grid=grid,
        in_specs=[
            g_spec,                                     # graph 1 (streamed)
            g_spec,                                     # graph 2 (streamed)
            pl.BlockSpec((ND, H), lambda b: (0, 0)),    # W1a (resident)
            pl.BlockSpec((ND, H), lambda b: (0, 0)),    # W1b (resident)
            pl.BlockSpec((1, H), lambda b: (0, 0)),     # b1
            pl.BlockSpec((H, 2), lambda b: (0, 0)),     # W2
            pl.BlockSpec((1, 2), lambda b: (0, 0)),     # b2
        ],
        out_specs=pl.BlockSpec((bt, 2), lambda b: (b, 0)),
        compiler_params=pltpu.CompilerParams(
            dimension_semantics=("parallel",),
            vmem_limit_bytes=vmem_limit,
        ),
        cost_estimate=cost,
    )(g1r, g2r, w1a, w1b, b1.astype(f32), w2.astype(f32), b2.astype(f32))
    return out[:B]


def _reference(g1, g2, door, ncw, w1, b1, w2, b2):
    """Pure-JAX reference matching the PyTorch forward semantics."""
    B, N, D = g1.shape
    P = door.shape[-1]
    K = N // P
    p1 = jnp.max(g1.reshape(B, P, K, D), axis=2)            # MaxPool2d((K, 1))
    p2 = jnp.max(g2.reshape(B, P, K, D), axis=2)
    d = door[0][None, :, None]                               # (1, P, 1)
    cat = d * p1 + (1.0 - d) * p2                            # (B, P, D)
    cat = jnp.einsum("p,bpd->bd", ncw[0], cat)               # matmul + squeeze(1)
    h = jax.nn.relu(cat @ w1 + b1[0])
    return jax.nn.relu(h @ w2 + b2[0])
    # nn.Dropout in the module is never applied in forward(), so it is omitted.


if __name__ == "__main__":
    # Small, module-consistent shapes.
    B = 2              # batch
    max_node_num = 16  # nodes per graph (N)
    pool_step = 4      # P chunks -> pool kernel K = max_node_num // pool_step = 4
    input_dim = 32
    linear_hidden_dim = 32

    key = jax.random.PRNGKey(0)
    k = jax.random.split(key, 10)

    # Inputs (gcn_info_1 / gcn_info_2 == graphs_x[0] in the PyTorch module).
    g1 = jax.random.normal(k[0], (B, max_node_num, input_dim), jnp.float32)
    g2 = jax.random.normal(k[1], (B, max_node_num, input_dim), jnp.float32)

    # Parameters, deterministically initialized (PyTorch-style fan-in scaling).
    door = jax.random.normal(k[2], (1, pool_step), jnp.float32) * jnp.sqrt(2.0 / pool_step)
    ncw = jax.random.normal(k[3], (1, pool_step), jnp.float32) * jnp.sqrt(2.0 / pool_step)
    bnd1 = 1.0 / jnp.sqrt(input_dim)
    w1 = jax.random.uniform(k[4], (input_dim, linear_hidden_dim), jnp.float32, -bnd1, bnd1)
    b1 = jax.random.uniform(k[5], (1, linear_hidden_dim), jnp.float32, -bnd1, bnd1)
    bnd2 = 1.0 / jnp.sqrt(linear_hidden_dim)
    w2 = jax.random.uniform(k[6], (linear_hidden_dim, 2), jnp.float32, -bnd2, bnd2)
    b2 = jax.random.uniform(k[7], (1, 2), jnp.float32, -bnd2, bnd2)

    out = jax.block_until_ready(graph_similarity_no_gcn(g1, g2, door, ncw, w1, b1, w2, b2))
    ref = _reference(g1, g2, door, ncw, w1, b1, w2, b2)
    assert out.shape == (B, 2), out.shape
    assert jnp.allclose(out, ref, atol=1e-4, rtol=1e-4), (out, ref)

    # Larger, non-multiple batch exercises the balanced 2-step grid / padding path.
    B2 = 300
    g1b = jax.random.normal(k[8], (B2, max_node_num, input_dim), jnp.float32)
    g2b = jax.random.normal(k[9], (B2, max_node_num, input_dim), jnp.float32)
    out2 = jax.block_until_ready(graph_similarity_no_gcn(g1b, g2b, door, ncw, w1, b1, w2, b2))
    ref2 = _reference(g1b, g2b, door, ncw, w1, b1, w2, b2)
    assert out2.shape == (B2, 2), out2.shape
    assert jnp.allclose(out2, ref2, atol=1e-4, rtol=1e-4)

    print("KERNEL_OK")
</pallas_src>

<mosaic_0001>
module attributes {stable_mosaic.version = 11 : i64} {
  func.func @_graph_sim_kernel(%arg0: i32, %arg1: memref<8x512xf32, #tpu.memory_space<vmem>>, %arg2: memref<8x512xf32, #tpu.memory_space<vmem>>, %arg3: memref<512x32xf32, #tpu.memory_space<vmem>>, %arg4: memref<512x32xf32, #tpu.memory_space<vmem>>, %arg5: memref<1x32xf32, #tpu.memory_space<vmem>>, %arg6: memref<32x2xf32, #tpu.memory_space<vmem>>, %arg7: memref<1x2xf32, #tpu.memory_space<vmem>>, %arg8: memref<8x2xf32, #tpu.memory_space<vmem>>) attributes {dimension_semantics = [#tpu.dimension_semantics<parallel>], iteration_bounds = array<i64: 1>, scalar_prefetch = 0 : i64, scratch_operands = 0 : i64, tpu.core_type = #tpu.core_type<tc>, window_params = [{transform_indices = @transform_0, window_bounds = array<i64: 8, 512>}, {transform_indices = @transform_1, window_bounds = array<i64: 8, 512>}, {pipeline_mode = #tpu.pipeline_mode<synchronous>, transform_indices = @transform_2, window_bounds = array<i64: 512, 32>}, {pipeline_mode = #tpu.pipeline_mode<synchronous>, transform_indices = @transform_3, window_bounds = array<i64: 512, 32>}, {pipeline_mode = #tpu.pipeline_mode<synchronous>, transform_indices = @transform_4, window_bounds = array<i64: 1, 32>}, {pipeline_mode = #tpu.pipeline_mode<synchronous>, transform_indices = @transform_5, window_bounds = array<i64: 32, 2>}, {pipeline_mode = #tpu.pipeline_mode<synchronous>, transform_indices = @transform_6, window_bounds = array<i64: 1, 2>}, {transform_indices = @transform_7, window_bounds = array<i64: 8, 2>}]} {
    %c0 = arith.constant 0 : index
    %c0_0 = arith.constant 0 : index
    %0 = vector.load %arg1[%c0, %c0_0] : memref<8x512xf32, #tpu.memory_space<vmem>>, vector<8x512xf32>
    %c0_1 = arith.constant 0 : index
    %c0_2 = arith.constant 0 : index
    %1 = vector.load %arg2[%c0_1, %c0_2] : memref<8x512xf32, #tpu.memory_space<vmem>>, vector<8x512xf32>
    %c32_i32 = arith.constant 32 : i32
    %2 = tpu.dynamic_rotate %0 by %c32_i32 dim 1 : vector<8x512xf32>, i32 -> vector<8x512xf32>
    %3 = arith.maximumf %0, %2 : vector<8x512xf32>
    %c32_i32_3 = arith.constant 32 : i32
    %4 = tpu.dynamic_rotate %1 by %c32_i32_3 dim 1 : vector<8x512xf32>, i32 -> vector<8x512xf32>
    %5 = arith.maximumf %1, %4 : vector<8x512xf32>
    %c64_i32 = arith.constant 64 : i32
    %6 = tpu.dynamic_rotate %0 by %c64_i32 dim 1 : vector<8x512xf32>, i32 -> vector<8x512xf32>
    %7 = arith.maximumf %3, %6 : vector<8x512xf32>
    %c64_i32_4 = arith.constant 64 : i32
    %8 = tpu.dynamic_rotate %1 by %c64_i32_4 dim 1 : vector<8x512xf32>, i32 -> vector<8x512xf32>
    %9 = arith.maximumf %5, %8 : vector<8x512xf32>
    %c96_i32 = arith.constant 96 : i32
    %10 = tpu.dynamic_rotate %0 by %c96_i32 dim 1 : vector<8x512xf32>, i32 -> vector<8x512xf32>
    %11 = arith.maximumf %7, %10 : vector<8x512xf32>
    %c96_i32_5 = arith.constant 96 : i32
    %12 = tpu.dynamic_rotate %1 by %c96_i32_5 dim 1 : vector<8x512xf32>, i32 -> vector<8x512xf32>
    %13 = arith.maximumf %9, %12 : vector<8x512xf32>
    %c0_6 = arith.constant 0 : index
    %c0_7 = arith.constant 0 : index
    %14 = vector.load %arg3[%c0_6, %c0_7] : memref<512x32xf32, #tpu.memory_space<vmem>>, vector<512x32xf32>
    %cst = arith.constant dense<0.000000e+00> : vector<8x32xf32>
    %15 = tpu.matmul %11, %14, %cst {dimension_numbers = #tpu.dot_dimension_numbers<[1], [0], [0], [1], [0, 0, 1, 1], [], []>, precision = #tpu.contract_precision<fp32>} : vector<8x512xf32>, vector<512x32xf32>, vector<8x32xf32> -> vector<8x32xf32>
    %c0_8 = arith.constant 0 : index
    %c0_9 = arith.constant 0 : index
    %16 = vector.load %arg4[%c0_8, %c0_9] : memref<512x32xf32, #tpu.memory_space<vmem>>, vector<512x32xf32>
    %cst_10 = arith.constant dense<0.000000e+00> : vector<8x32xf32>
    %17 = tpu.matmul %13, %16, %cst_10 {dimension_numbers = #tpu.dot_dimension_numbers<[1], [0], [0], [1], [0, 0, 1, 1], [], []>, precision = #tpu.contract_precision<fp32>} : vector<8x512xf32>, vector<512x32xf32>, vector<8x32xf32> -> vector<8x32xf32>
    %18 = arith.addf %15, %17 : vector<8x32xf32>
    %c0_11 = arith.constant 0 : index
    %c0_12 = arith.constant 0 : index
    %19 = vector.load %arg5[%c0_11, %c0_12] : memref<1x32xf32, #tpu.memory_space<vmem>>, vector<1x32xf32>
    %20 = vector.broadcast %19 : vector<1x32xf32> to vector<8x32xf32>
    %21 = arith.addf %18, %20 : vector<8x32xf32>
    %cst_13 = arith.constant 0.000000e+00 : f32
    %22 = vector.broadcast %cst_13 : f32 to vector<8x32xf32>
    %23 = arith.maximumf %21, %22 : vector<8x32xf32>
    %c0_14 = arith.constant 0 : index
    %c0_15 = arith.constant 0 : index
    %24 = vector.load %arg6[%c0_14, %c0_15] : memref<32x2xf32, #tpu.memory_space<vmem>>, vector<32x2xf32>
    %cst_16 = arith.constant dense<0.000000e+00> : vector<8x2xf32>
    %25 = tpu.matmul %23, %24, %cst_16 {dimension_numbers = #tpu.dot_dimension_numbers<[1], [0], [0], [1], [0, 0, 1, 1], [], []>, precision = #tpu.contract_precision<fp32>} : vector<8x32xf32>, vector<32x2xf32>, vector<8x2xf32> -> vector<8x2xf32>
    %c0_17 = arith.constant 0 : index
    %c0_18 = arith.constant 0 : index
    %26 = vector.load %arg7[%c0_17, %c0_18] : memref<1x2xf32, #tpu.memory_space<vmem>>, vector<1x2xf32>
    %27 = vector.broadcast %26 : vector<1x2xf32> to vector<8x2xf32>
    %28 = arith.addf %25, %27 : vector<8x2xf32>
    %cst_19 = arith.constant 0.000000e+00 : f32
    %29 = vector.broadcast %cst_19 : f32 to vector<8x2xf32>
    %30 = arith.maximumf %28, %29 : vector<8x2xf32>
    %c0_20 = arith.constant 0 : index
    %c0_21 = arith.constant 0 : index
    %31 = vector.load %arg8[%c0_20, %c0_21] : memref<8x2xf32, #tpu.memory_space<vmem>>, vector<8x2xf32>
    tpu.vector_store %arg8[%c0_20, %c0_21], %30 {strides = array<i32>} : memref<8x2xf32, #tpu.memory_space<vmem>>, vector<8x2xf32>,
    return
  }
  func.func @transform_0(%arg0: i32) -> (i32, i32) {
    %c0_i32 = arith.constant 0 : i32
    %c0_i32_0 = arith.constant 0 : i32
    return %arg0, %c0_i32 : i32, i32
  }
  func.func @transform_1(%arg0: i32) -> (i32, i32) {
    %c0_i32 = arith.constant 0 : i32
    %c0_i32_0 = arith.constant 0 : i32
    return %arg0, %c0_i32 : i32, i32
  }
  func.func @transform_2(%arg0: i32) -> (i32, i32) {
    %c0_i32 = arith.constant 0 : i32
    %c0_i32_0 = arith.constant 0 : i32
    %c0_i32_1 = arith.constant 0 : i32
    return %c0_i32, %c0_i32_0 : i32, i32
  }
  func.func @transform_3(%arg0: i32) -> (i32, i32) {
    %c0_i32 = arith.constant 0 : i32
    %c0_i32_0 = arith.constant 0 : i32
    %c0_i32_1 = arith.constant 0 : i32
    return %c0_i32, %c0_i32_0 : i32, i32
  }
  func.func @transform_4(%arg0: i32) -> (i32, i32) {
    %c0_i32 = arith.constant 0 : i32
    %c0_i32_0 = arith.constant 0 : i32
    %c0_i32_1 = arith.constant 0 : i32
    return %c0_i32, %c0_i32_0 : i32, i32
  }
  func.func @transform_5(%arg0: i32) -> (i32, i32) {
    %c0_i32 = arith.constant 0 : i32
    %c0_i32_0 = arith.constant 0 : i32
    %c0_i32_1 = arith.constant 0 : i32
    return %c0_i32, %c0_i32_0 : i32, i32
  }
  func.func @transform_6(%arg0: i32) -> (i32, i32) {
    %c0_i32 = arith.constant 0 : i32
    %c0_i32_0 = arith.constant 0 : i32
    %c0_i32_1 = arith.constant 0 : i32
    return %c0_i32, %c0_i32_0 : i32, i32
  }
  func.func @transform_7(%arg0: i32) -> (i32, i32) {
    %c0_i32 = arith.constant 0 : i32
    %c0_i32_0 = arith.constant 0 : i32
    return %arg0, %c0_i32 : i32, i32
  }
}

</mosaic_0001>

<bundles_post_ra>
// kernel: graph_similarity_no_gcn.1
= control target key start
LH: loop header
LB: loop body
LE: loop exit
PB: predicated region body
PF: predicated region fallthrough
CT: control target
= control target key end

     0   :  { %s5987_s28 = smov 32   ;;  %s5988_s26 = smov 64   ;;  %vm5991_vm3 = vmmov 0   ;;  %vm3731_vm4 = vcmask 261120   ;;  %vm4221_vm5 = vcmask 15360   ;;  %s8662_s1 = inlined_call_operand.vmem [shape: f32[8,512], index: 1, kind: input, shape index: {}]   ;;  %s8663_s3 = inlined_call_operand.vmem [shape: f32[512,32], index: 3, kind: input, shape index: {}]   ;;  %s8664_s0 = inlined_call_operand.vmem [shape: f32[8,512], index: 0, kind: input, shape index: {}]   ;;  %s8665_s2 = inlined_call_operand.vmem [shape: f32[512,32], index: 2, kind: input, shape index: {}]   ;;  %s8666_s5 = inlined_call_operand.vmem [shape: f32[32,2], index: 5, kind: input, shape index: {}]   ;;  %s8667_s4 = inlined_call_operand.vmem [shape: f32[1,32], index: 4, kind: input, shape index: {}]   ;;  %s8668_s6 = inlined_call_operand.vmem [shape: f32[1,2], index: 6, kind: input, shape index: {}]   ;;  %s8669_s7 = inlined_call_operand.vmem [shape: f32[8,2], index: 7, kind: output, shape index: {}]  }
   0x1   :  { %v6036_v0 = vld [vmem:[%s8662_s1 + $0x18] sm:$0xff]  ;;  %v6041_v1 = vld [vmem:[%s8662_s1] sm:$0xff]  ;;  %v6050_v2 = vld [vmem:[%s8662_s1 + $0x8] sm:$0xff]  ;;  %s5989_s29 = smov 96  }
   0x2   :  { %59 = vrot.lane.b32.xlu1 %v6036_v0, %s5987_s28  ;;  %53 = vrot.lane.b32.xlu0 %v6041_v1, %s5987_s28  ;;  %v215_v3 = vld [vmem:[%s8663_s3 + $0x80] sm:$0xff]  ;;  %v216_v4 = vld [vmem:[%s8663_s3 + $0x88] sm:$0xff] }
   0x3   :  { %v312_v5 = vand.u32 4294901760, %v215_v3  ;;  %v199_v6 = vld [vmem:[%s8663_s3] sm:$0xff]  ;;  %v200_v7 = vld [vmem:[%s8663_s3 + $0x8] sm:$0xff]  ;;  %v315_v8 = vand.u32 4294901760, %v216_v4  ;;  %v217_v11 = vld [vmem:[%s8663_s3 + $0x90] sm:$0xff] }
   0x4   :  { %v264_v9 = vand.u32 4294901760, %v199_v6  ;;  %v267_v10 = vand.u32 4294901760, %v200_v7  ;;  %v218_v12 = vld [vmem:[%s8663_s3 + $0x98] sm:$0xff]  ;;  %v201_v13 = vld [vmem:[%s8663_s3 + $0x10] sm:$0xff]  ;;  %v318_v15 = vand.u32 4294901760, %v217_v11  ;;  %v219_v19 = vld [vmem:[%s8663_s3 + $0xa0] sm:$0xff] }
   0x5   :  { %v6073_v14 = vsub.f32 %v215_v3, %v312_v5  ;;  %v321_v16 = vand.u32 4294901760, %v218_v12  ;;  %v202_v17 = vld [vmem:[%s8663_s3 + $0x18] sm:$0xff]  ;;  %v270_v18 = vand.u32 4294901760, %v201_v13  ;;  %v6085_v20 = vsub.f32 %v216_v4, %v315_v8  ;;  %v220_v24 = vld [vmem:[%s8663_s3 + $0xa8] sm:$0xff]  ;;  %v203_v25 = vld [vmem:[%s8663_s3 + $0x20] sm:$0xff] }
   0x6   :  { %86 = vrot.lane.b32.xlu1 %v6041_v1, %s5988_s26  ;;  %55 = vrot.lane.b32.xlu0 %v6050_v2, %s5987_s28  ;;  %v6087_v21 = vsub.f32 %v199_v6, %v264_v9  ;;  %v6089_v22 = vsub.f32 %v200_v7, %v267_v10  ;;  %v273_v23 = vand.u32 4294901760, %v202_v17  ;;  %v6097_v26 = vsub.f32 %v217_v11, %v318_v15  ;;  %v204_v30 = vld [vmem:[%s8663_s3 + $0x28] sm:$0xff]  ;;  %v221_v35 = vld [vmem:[%s8663_s3 + $0xb0] sm:$0xff] }
   0x7   :  { %v6099_v27 = vsub.f32 %v218_v12, %v321_v16  ;;  %v6101_v28 = vsub.f32 %v201_v13, %v270_v18  ;;  %v6103_v29 = vpack.c.bf16 %v315_v8, %v312_v5  ;;  %v5229_v31 = vpack.c.bf16 %v6085_v20, %v6073_v14  ;;  %v222_v40 = vld [vmem:[%s8663_s3 + $0xb8] sm:$0xff]  ;;  %v6128_v41 = vld [vmem:[%s8663_s3 + $0x30] sm:$0xff]  ;;  %v6151_v50 = vld [vmem:[%s8663_s3 + $0xc0] sm:$0xff] }
   0x8   :  { %v5231_v32 = vpack.c.bf16 %v6089_v22, %v6087_v21  ;;  %v6112_v33 = vsub.f32 %v202_v17, %v273_v23  ;;  %v6114_v34 = vpack.c.bf16 %v267_v10, %v264_v9  ;;  %v324_v37 = vand.u32 4294901760, %v219_v19  ;;  %v206_v45 = vld [vmem:[%s8663_s3 + $0x38] sm:$0xff]  ;;  %v224_v55 = vld [vmem:[%s8663_s3 + $0xc8] sm:$0xff]  ;;  %v207_v56 = vld [vmem:[%s8663_s3 + $0x40] sm:$0xff] }
   0x9   :  { %8896 = vst [vmem:[#allocation2_spill] sm:$0xff] %v6103_v29  ;;  %v5233_v36 = vpack.c.bf16 %v6099_v27, %v6097_v26  ;;  %5166 = vmatprep.subr.bf16.mxu1 %v6103_v29  ;;  %v327_v38 = vand.u32 4294901760, %v220_v24  ;;  %v276_v39 = vand.u32 4294901760, %v203_v25  ;;  %v279_v43 = vand.u32 4294901760, %v204_v30  ;;  %5230 = vmatprep.subr.bf16.mxu0 %v5229_v31  ;;  %v208_v61 = vld [vmem:[%s8663_s3 + $0x48] sm:$0xff]  ;;  %v6187_v4 = vld [vmem:[%s8662_s1 + $0x10] sm:$0xff] }
   0xa   :  { %8897 = vst [vmem:[#allocation3_spill] sm:$0xff] %v6114_v34  ;;  %92 = vrot.lane.b32.xlu1 %v6036_v0, %s5988_s26  ;;  %88 = vrot.lane.b32.xlu0 %v6050_v2, %s5988_s26  ;;  %v5235_v42 = vpack.c.bf16 %v6112_v33, %v6101_v28  ;;  %v6136_v44 = vpack.c.bf16 %v321_v16, %v318_v15  ;;  %v330_v49 = vand.u32 4294901760, %v221_v35  ;;  %v333_v53 = vand.u32 4294901760, %v222_v40  ;;  %v225_v9 = vld [vmem:[%s8663_s3 + $0xd0] sm:$0xff]  ;;  %v226_v10 = vld [vmem:[%s8663_s3 + $0xd8] sm:$0xff] }
   0xb   :  { %5168 = vmatpush3.bf16.msra.mxu1 %v6114_v34  ;;  %v6142_v46 = vsub.f32 %v219_v19, %v324_v37  ;;  %v6144_v47 = vsub.f32 %v220_v24, %v327_v38  ;;  %v6146_v48 = vsub.f32 %v203_v25, %v276_v39  ;;  %5232 = vmatpush3.bf16.msra.mxu0 %v5231_v32  ;;  %v282_v54 = vand.u32 4294901760, %v6128_v41  ;;  %v209_v15 = vld [vmem:[%s8663_s3 + $0x50] sm:$0xff]  ;;  %v210_v16 = vld [vmem:[%s8663_s3 + $0x58] sm:$0xff]  ;;  %v227_v24 = vld [vmem:[%s8663_s3 + $0xe0] sm:$0xff] }
   0xc   :  { %8898 = vst [vmem:[#allocation4_spill] sm:$0xff] %v6136_v44  ;;  %v6153_v51 = vsub.f32 %v204_v30, %v279_v43  ;;  %5170 = vmatprep.subr.bf16.mxu1 %v6136_v44  ;;  %v6156_v52 = vpack.c.bf16 %v273_v23, %v270_v18  ;;  %5234 = vmatprep.subr.bf16.mxu0 %v5233_v36  ;;  %v285_v59 = vand.u32 4294901760, %v206_v45  ;;  %v336_v3 = vand.u32 4294901760, %v6151_v50 }
   0xd   :  { %v5237_v57 = vpack.c.bf16 %v6144_v47, %v6142_v46  ;;  %v6167_v58 = vsub.f32 %v221_v35, %v330_v49  ;;  %v6169_v60 = vpack.c.bf16 %v327_v38, %v324_v37  ;;  %v6178_v62 = vsub.f32 %v222_v40, %v333_v53  ;;  %v211_v40 = vld [vmem:[%s8663_s3 + $0x60] sm:$0xff] }
   0xe   :  { %8899 = vst [vmem:[#allocation5_spill] sm:$0xff] %v6156_v52  ;;  %121 = vrot.lane.b32.xlu1 %v6050_v2, %s5989_s29  ;;  %119 = vrot.lane.b32.xlu0 %v6041_v1, %s5989_s29  ;;  %v6181_v63 = vsub.f32 %v6128_v41, %v282_v54  ;;  %v6190_v5 = vsub.f32 %v206_v45, %v285_v59  ;;  %v339_v7 = vand.u32 4294901760, %v224_v55  ;;  %v288_v8 = vand.u32 4294901760, %v207_v56 }
   0xf   :  { %8900 = vst [vmem:[#allocation6_spill] sm:$0xff] %v6169_v60  ;;  %5172 = vmatpush3.bf16.msra.mxu1 %v6156_v52  ;;  %v6192_v6 = vpack.c.bf16 %v279_v43, %v276_v39  ;;  %5236 = vmatpush3.bf16.msra.mxu0 %v5235_v42  ;;  %v5239_v11 = vpack.c.bf16 %v6153_v51, %v6146_v48  ;;  %v291_v13 = vand.u32 4294901760, %v208_v61  ;;  %v342_v31 = vand.u32 4294901760, %v225_v9  ;;  %v228_v39 = vld [vmem:[%s8663_s3 + $0xe8] sm:$0xff] }
  0x10   :  { %5174 = vmatprep.subr.bf16.mxu1 %v6169_v60  ;;  %v6204_v12 = vsub.f32 %v6151_v50, %v336_v3  ;;  %5238 = vmatprep.subr.bf16.mxu0 %v5237_v57  ;;  %v5241_v17 = vpack.c.bf16 %v6178_v62, %v6167_v58  ;;  %v6214_v18 = vsub.f32 %v224_v55, %v339_v7  ;;  %v345_v32 = vand.u32 4294901760, %v226_v10  ;;  %v230_v57 = vld [vmem:[%s8663_s3 + $0xf8] sm:$0xff] }
  0x11   :  { %8901 = vst [vmem:[#allocation7_spill] sm:$0xff] %v6192_v6  ;;  %v6216_v19 = vsub.f32 %v207_v56, %v288_v8  ;;  %v6218_v23 = vpack.c.bf16 %v333_v53, %v330_v49  ;;  %v5243_v25 = vpack.c.bf16 %v6190_v5, %v6181_v63  ;;  %v6229_v30 = vsub.f32 %v208_v61, %v291_v13  ;;  %v212_v49 = vld [vmem:[%s8663_s3 + $0x68] sm:$0xff]  ;;  %v229_v56 = vld [vmem:[%s8663_s3 + $0xf0] sm:$0xff] }
  0x12   :  { %57 = vrot.lane.b32.xlu1 %v6187_v4, %s5987_s28  ;;  %125 = vrot.lane.b32.xlu0 %v6036_v0, %s5989_s29  ;;  %v5245_v35 = vpack.c.bf16 %v6214_v18, %v6204_v12  ;;  %v6234_v36 = vpack.c.bf16 %v285_v59, %v282_v54  ;;  %v294_v37 = vand.u32 4294901760, %v209_v15  ;;  %v297_v38 = vand.u32 4294901760, %v210_v16 }
  0x13   :  { %8902 = vst [vmem:[#allocation8_spill] sm:$0xff] %v6218_v23  ;;  %5176 = vmatpush3.bf16.msra.mxu1 %v6192_v6  ;;  %5240 = vmatpush3.bf16.msra.mxu0 %v5239_v11  ;;  %v5247_v41 = vpack.c.bf16 %v6229_v30, %v6216_v19  ;;  %v6245_v42 = vsub.f32 %v225_v9, %v342_v31  ;;  %v348_v45 = vand.u32 4294901760, %v227_v24  ;;  %v351_v61 = vand.u32 4294901760, %v228_v39  ;;  %v214_v9 = vld [vmem:[%s8663_s3 + $0x78] sm:$0xff] }
  0x14   :  { %8903 = vst [vmem:[#allocation9_spill] sm:$0xff] %v6234_v36  ;;  %5178 = vmatprep.subr.bf16.mxu1 %v6218_v23  ;;  %v6247_v43 = vsub.f32 %v226_v10, %v345_v32  ;;  %5242 = vmatprep.subr.bf16.mxu0 %v5241_v17  ;;  %v6252_v50 = vsub.f32 %v209_v15, %v294_v37  ;;  %v303_v11 = vand.u32 4294901760, %v212_v49  ;;  %v357_v23 = vand.u32 4294901760, %v230_v57 }
  0x15   :  { %v6254_v53 = vsub.f32 %v210_v16, %v297_v38  ;;  %v6256_v54 = vpack.c.bf16 %v339_v7, %v336_v3  ;;  %v6258_v55 = vpack.c.bf16 %v291_v13, %v288_v8  ;;  %v6272_v3 = vsub.f32 %v227_v24, %v348_v45  ;;  %v213_v8 = vld [vmem:[%s8663_s3 + $0x70] sm:$0xff] }
  0x16   :  { %123 = vrot.lane.b32.xlu1 %v6187_v4, %s5989_s29  ;;  %90 = vrot.lane.b32.xlu0 %v6187_v4, %s5988_s26  ;;  %v5249_v59 = vpack.c.bf16 %v6247_v43, %v6245_v42  ;;  %v300_v7 = vand.u32 4294901760, %v211_v40  ;;  %v6283_v13 = vpack.c.bf16 %v345_v32, %v342_v31  ;;  %v6285_v15 = vpack.c.bf16 %v297_v38, %v294_v37 }
  0x17   :  { %8904 = vst [vmem:[#allocation10_spill] sm:$0xff] %v6256_v54  ;;  %8905 = vst [vmem:[#allocation11_spill] sm:$0xff] %v6258_v55  ;;  %5180 = vmatpush3.bf16.msra.mxu1 %v6234_v36  ;;  %v5251_v10 = vpack.c.bf16 %v6254_v53, %v6252_v50  ;;  %5244 = vmatpush3.bf16.msra.mxu0 %v5243_v25  ;;  %v6288_v16 = vsub.f32 %v228_v39, %v351_v61  ;;  %v354_v24 = vand.u32 4294901760, %v229_v56 }
  0x18   :  { %8906 = vst [vmem:[#allocation12_spill] sm:$0xff] %v6283_v13  ;;  %8907 = vst [vmem:[#allocation13_spill] sm:$0xff] %v6285_v15  ;;  %5182 = vmatprep.subr.bf16.mxu1 %v6256_v54  ;;  %v6290_v17 = vsub.f32 %v211_v40, %v300_v7  ;;  %5246 = vmatprep.subr.bf16.mxu0 %v5245_v35  ;;  %v6292_v6 = vsub.f32 %v212_v49, %v303_v11  ;;  %v306_v36 = vand.u32 4294901760, %v213_v8 }
  0x19   :  { %v309_v60 = vand.u32 4294901760, %v214_v9  ;;  %v6294_v52 = vpack.c.bf16 %v351_v61, %v348_v45  ;;  %v5253_v31 = vpack.c.bf16 %v6288_v16, %v6272_v3  ;;  %v6298_v32 = vsub.f32 %v229_v56, %v354_v24  ;;  %v6321_v61 = vld [vmem:[%s8664_s0] sm:$0xff] }
  0x1a   :  { %v6300_v25 = vsub.f32 %v230_v57, %v357_v23  ;;  %v6302_v37 = vpack.c.bf16 %v303_v11, %v300_v7  ;;  %v5255_v35 = vpack.c.bf16 %v6292_v6, %v6290_v17  ;;  %v6307_v38 = vsub.f32 %v213_v8, %v306_v36  ;;  %34 = vrot.lane.b32.xlu0 %v6321_v61, %s5987_s28 }
  0x1b   :  { %8908 = vst [vmem:[#allocation14_spill] sm:$0xff] %v6294_v52  ;;  %5184 = vmatpush3.bf16.msra.mxu1 %v6258_v55  ;;  %v6309_v39 = vsub.f32 %v214_v9, %v309_v60  ;;  %v490_v40 = vand.u32 4294901760, %v6073_v14  ;;  %5248 = vmatpush3.bf16.msra.mxu0 %v5247_v41  ;;  %v497_v49 = vand.u32 4294901760, %v6085_v20  ;;  %v378_v56 = vand.u32 4294901760, %v6087_v21 }
  0x1c   :  { %8909 = vst [vmem:[#allocation15_spill] sm:$0xff] %v6302_v37  ;;  %5186 = vmatprep.subr.bf16.mxu1 %v6283_v13  ;;  %v5257_v45 = vpack.c.bf16 %v6300_v25, %v6298_v32  ;;  %v385_v57 = vand.u32 4294901760, %v6089_v22  ;;  %5250 = vmatprep.subr.bf16.mxu0 %v5249_v59  ;;  %v6325_v7 = vpack.c.bf16 %v357_v23, %v354_v24  ;;  %v504_v9 = vand.u32 4294901760, %v6097_v26  ;;  %v6344_v24 = vld [vmem:[%s8664_s0 + $0x8] sm:$0xff] }
  0x1d   :  { %v5259_v41 = vpack.c.bf16 %v6309_v39, %v6307_v38  ;;  %v6327_v8 = vpack.c.bf16 %v309_v60, %v306_v36  ;;  %v5293_v11 = vpack.c.bf16 %v497_v49, %v490_v40  ;;  %v511_v55 = vand.u32 4294901760, %v6099_v27  ;;  %8910 = vst [vmem:[#allocation16_spill] sm:$0xff] %v6344_v24  ;;  %36 = vrot.lane.b32.xlu1 %v6344_v24, %s5987_s28 }
  0x1e   :  { %v6332_v13 = vpack.c.bf16 %v385_v57, %v378_v56  ;;  %v392_v54 = vand.u32 4294901760, %v6101_v28  ;;  %v399_v59 = vand.u32 4294901760, %v6112_v33  ;;  %v491_v23 = vsub.f32 %v6073_v14, %v490_v40 }
  0x1f   :  { %5188 = vmatpush3.bf16.msra.mxu1 %v6285_v15  ;;  %v498_v60 = vsub.f32 %v6085_v20, %v497_v49  ;;  %v379_v36 = vsub.f32 %v6087_v21, %v378_v56  ;;  %5252 = vmatpush3.bf16.msra.mxu0 %v5251_v10  ;;  %v6347_v44 = vpack.c.bf16 %v511_v55, %v504_v9  ;;  %v518_v34 = vand.u32 4294901760, %v6142_v46  ;;  %v6355_v20 = vld [vmem:[%s8664_s0 + $0x18] sm:$0xff] }
  0x20   :  { %5190 = vmatprep.subr.bf16.mxu1 %v6294_v52  ;;  %v386_v15 = vsub.f32 %v6089_v22, %v385_v57  ;;  %v525_v14 = vand.u32 4294901760, %v6144_v47  ;;  %5254 = vmatprep.subr.bf16.mxu0 %v5253_v31  ;;  %v6357_v21 = vpack.c.bf16 %v399_v59, %v392_v54  ;;  %v492_v40 = vand.u32 4294901760, %v491_v23 }
  0x21   :  { %v499_v10 = vand.u32 4294901760, %v498_v60  ;;  %v380_v49 = vand.u32 4294901760, %v379_v36  ;;  %v406_v57 = vand.u32 4294901760, %v6146_v48  ;;  %v413_v52 = vand.u32 4294901760, %v6153_v51  ;;  %40 = vrot.lane.b32.xlu0 %v6355_v20, %s5987_s28  ;;  %69 = vrot.lane.b32.xlu1 %v6321_v61, %s5988_s26 }
  0x22   :  { %8911 = vst [vmem:[#allocation17_spill] sm:$0xff] %v6357_v21  ;;  %v387_v56 = vand.u32 4294901760, %v386_v15  ;;  %v6361_v22 = vpack.c.bf16 %v525_v14, %v518_v34  ;;  %v505_v23 = vsub.f32 %v6097_v26, %v504_v9  ;;  %v512_v60 = vsub.f32 %v6099_v27, %v511_v55 }
  0x23   :  { %5192 = vmatpush3.bf16.msra.mxu1 %v6302_v37  ;;  %v5197_v31 = vpack.c.bf16 %v499_v10, %v492_v40  ;;  %v393_v36 = vsub.f32 %v6101_v28, %v392_v54  ;;  %5256 = vmatpush3.bf16.msra.mxu0 %v5255_v35  ;;  %v6374_v29 = vpack.c.bf16 %v413_v52, %v406_v57  ;;  %v532_v21 = vand.u32 4294901760, %v6167_v58 }
  0x24   :  { %8912 = vst [vmem:[#allocation18_spill] sm:$0xff] %v6361_v22  ;;  %5194 = vmatprep.subr.bf16.mxu1 %v6325_v7  ;;  %v6372_v15 = vpack.c.bf16 %v387_v56, %v380_v49  ;;  %v400_v22 = vsub.f32 %v6112_v33, %v399_v59  ;;  %5258 = vmatprep.subr.bf16.mxu0 %v5257_v45  ;;  %v506_v37 = vand.u32 4294901760, %v505_v23  ;;  %v513_v40 = vand.u32 4294901760, %v512_v60 }
  0x25   :  { %v394_v10 = vand.u32 4294901760, %v393_v36  ;;  %v539_v26 = vand.u32 4294901760, %v6178_v62  ;;  %v420_v28 = vand.u32 4294901760, %v6181_v63  ;;  %v427_v54 = vand.u32 4294901760, %v6190_v5  ;;  %71 = vrot.lane.b32.xlu0 %v6344_v24, %s5988_s26  ;;  %75 = vrot.lane.b32.xlu1 %v6355_v20, %s5988_s26 }
  0x26   :  { %v401_v27 = vand.u32 4294901760, %v400_v22  ;;  %v519_v55 = vsub.f32 %v6142_v46, %v518_v34  ;;  %v6387_v33 = vpack.c.bf16 %v513_v40, %v506_v37  ;;  %v526_v45 = vsub.f32 %v6144_v47, %v525_v14 }
  0x27   :  { %5196 = vmatpush3.bf16.msra.mxu1 %v6327_v8  ;;  %v6389_v35 = vpack.c.bf16 %v539_v26, %v532_v21  ;;  %v407_v9 = vsub.f32 %v6146_v48, %v406_v57  ;;  %5260 = vmatpush3.bf16.msra.mxu0 %v5259_v41  ;;  %v6395_v49 = vpack.c.bf16 %v427_v54, %v420_v28  ;;  %v546_v37 = vand.u32 4294901760, %v6204_v12 }
  0x28   :  { %5198 = vmatprep.subr.bf16.mxu1 %v5197_v31  ;;  %v6393_v59 = vpack.c.bf16 %v401_v27, %v394_v10  ;;  %v520_v34 = vand.u32 4294901760, %v519_v55  ;;  %v414_v46 = vsub.f32 %v6153_v51, %v413_v52  ;;  %5294 = vmatprep.subr.bf16.mxu0 %v5293_v11  ;;  %v527_v56 = vand.u32 4294901760, %v526_v45 }
  0x29   :  { %v408_v22 = vand.u32 4294901760, %v407_v9  ;;  %v553_v23 = vand.u32 4294901760, %v6214_v18  ;;  %v434_v48 = vand.u32 4294901760, %v6216_v19  ;;  %v441_v41 = vand.u32 4294901760, %v6229_v30  ;;  %102 = vrot.lane.b32.xlu0 %v6321_v61, %s5989_s29  ;;  %104 = vrot.lane.b32.xlu1 %v6344_v24, %s5989_s29 }
  0x2a   :  { %v415_v47 = vand.u32 4294901760, %v414_v46  ;;  %v533_v14 = vsub.f32 %v6167_v58, %v532_v21  ;;  %v6407_v51 = vpack.c.bf16 %v527_v56, %v520_v34  ;;  %v540_v11 = vsub.f32 %v6178_v62, %v539_v26 }
  0x2b   :  { %v6409_v52 = vpack.c.bf16 %v553_v23, %v546_v37  ;;  %v421_v57 = vsub.f32 %v6181_v63, %v420_v28  ;;  %v6415_v60 = vpack.c.bf16 %v441_v41, %v434_v48  ;;  %v428_v40 = vsub.f32 %v6190_v5, %v427_v54 }
  0x2c   :  { %v6413_v31 = vpack.c.bf16 %v415_v47, %v408_v22  ;;  %v534_v36 = vand.u32 4294901760, %v533_v14  ;;  %v541_v10 = vand.u32 4294901760, %v540_v11  ;;  %v560_v21 = vand.u32 4294901760, %v6245_v42 }
  0x2d   :  { %v422_v58 = vand.u32 4294901760, %v421_v57  ;;  %v567_v61 = vand.u32 4294901760, %v6247_v43  ;;  %v429_v27 = vand.u32 4294901760, %v428_v40  ;;  %v448_v62 = vand.u32 4294901760, %v6252_v50  ;;  %108 = vrot.lane.b32.xlu0 %v6355_v20, %s5989_s29 }
  0x2e   :  { %v455_v63 = vand.u32 4294901760, %v6254_v53  ;;  %v547_v26 = vsub.f32 %v6204_v12, %v546_v37  ;;  %v6427_v5 = vpack.c.bf16 %v541_v10, %v534_v36  ;;  %v554_v54 = vsub.f32 %v6214_v18, %v553_v23 }
  0x2f   :  { %v6429_v28 = vpack.c.bf16 %v567_v61, %v560_v21  ;;  %v435_v55 = vsub.f32 %v6216_v19, %v434_v48  ;;  %v6433_v45 = vpack.c.bf16 %v429_v27, %v422_v58  ;;  %v442_v46 = vsub.f32 %v6229_v30, %v441_v41 }
  0x30   :  { %v6435_v9 = vpack.c.bf16 %v455_v63, %v448_v62  ;;  %v548_v34 = vand.u32 4294901760, %v547_v26  ;;  %v555_v56 = vand.u32 4294901760, %v554_v54  ;;  %v574_v22 = vand.u32 4294901760, %v6272_v3 }
  0x31   :  { %v436_v12 = vand.u32 4294901760, %v435_v55  ;;  %v581_v37 = vand.u32 4294901760, %v6288_v16  ;;  %v443_v47 = vand.u32 4294901760, %v442_v46  ;;  %v462_v14 = vand.u32 4294901760, %v6290_v17 }
  0x32   :  { %v469_v18 = vand.u32 4294901760, %v6292_v6  ;;  %v561_v19 = vsub.f32 %v6245_v42, %v560_v21  ;;  %v6443_v23 = vpack.c.bf16 %v555_v56, %v548_v34  ;;  %v568_v11 = vsub.f32 %v6247_v43, %v567_v61 }
  0x33   :  { %v6445_v48 = vpack.c.bf16 %v581_v37, %v574_v22  ;;  %v449_v30 = vsub.f32 %v6252_v50, %v448_v62  ;;  %v6449_v41 = vpack.c.bf16 %v443_v47, %v436_v12  ;;  %v456_v40 = vsub.f32 %v6254_v53, %v455_v63 }
  0x34   :  { %v6451_v57 = vpack.c.bf16 %v469_v18, %v462_v14  ;;  %v562_v36 = vand.u32 4294901760, %v561_v19  ;;  %v569_v10 = vand.u32 4294901760, %v568_v11  ;;  %v588_v27 = vand.u32 4294901760, %v6298_v32 }
  0x35   :  { %v450_v58 = vand.u32 4294901760, %v449_v30  ;;  %v595_v42 = vand.u32 4294901760, %v6300_v25  ;;  %v457_v21 = vand.u32 4294901760, %v456_v40  ;;  %v476_v26 = vand.u32 4294901760, %v6307_v38 }
  0x36   :  { %v483_v43 = vand.u32 4294901760, %v6309_v39  ;;  %v575_v50 = vsub.f32 %v6272_v3, %v574_v22  ;;  %v6459_v61 = vpack.c.bf16 %v569_v10, %v562_v36  ;;  %v582_v54 = vsub.f32 %v6288_v16, %v581_v37 }
  0x37   :  { %v6461_v62 = vpack.c.bf16 %v595_v42, %v588_v27  ;;  %v463_v53 = vsub.f32 %v6290_v17, %v462_v14  ;;  %v6465_v63 = vpack.c.bf16 %v457_v21, %v450_v58  ;;  %v470_v46 = vsub.f32 %v6292_v6, %v469_v18 }
  0x38   :  { %v6467_v55 = vpack.c.bf16 %v483_v43, %v476_v26  ;;  %v576_v34 = vand.u32 4294901760, %v575_v50  ;;  %v583_v56 = vand.u32 4294901760, %v582_v54  ;;  %v589_v3 = vsub.f32 %v6298_v32, %v588_v27  ;;  %v6485_v32 = vld [vmem:[%s8664_s0 + $0x10] sm:$0xff] }
  0x39   :  { %v464_v12 = vand.u32 4294901760, %v463_v53  ;;  %v471_v47 = vand.u32 4294901760, %v470_v46  ;;  %v596_v16 = vsub.f32 %v6300_v25, %v595_v42  ;;  %v477_v17 = vsub.f32 %v6307_v38, %v476_v26  ;;  %38 = vrot.lane.b32.xlu1 %v6485_v32, %s5987_s28  ;;  %73 = vrot.lane.b32.xlu0 %v6485_v32, %s5988_s26 }
  0x3a   :  { %v6471_v22 = vpack.c.bf16 %v583_v56, %v576_v34  ;;  %v590_v11 = vand.u32 4294901760, %v589_v3  ;;  %v484_v37 = vsub.f32 %v6309_v39, %v483_v43  ;;  %v42_v25 = vlaneseq }
  0x3b   :  { %v6473_v19 = vpack.c.bf16 %v471_v47, %v464_v12  ;;  %v597_v14 = vand.u32 4294901760, %v596_v16  ;;  %v478_v30 = vand.u32 4294901760, %v477_v17 }
  0x3c   :  { %v485_v36 = vand.u32 4294901760, %v484_v37  ;;  %v6493_v40 = vand.u32 127, %v42_v25 }
  0x3d   :  { %v6478_v6 = vpack.c.bf16 %v597_v14, %v590_v11  ;;  %106 = vrot.lane.b32.xlu1 %v6485_v32, %s5989_s29 }
  0x3e   :  { %v6480_v18 = vpack.c.bf16 %v485_v36, %v478_v30  ;;  %vm44_vm0 = vcmp.lt.s32.totalorder %v6493_v40, 32  ;;  %vm77_vm1 = vcmp.lt.s32.totalorder %v6493_v40, 64  ;;  %vm110_vm2 = vcmp.lt.s32.totalorder %v6493_v40, 96  ;;  %v7456_v40 = vld [vmem:[%s8665_s2 + $0x48] sm:$0xff] }
  0x74   :  { %v60_v38 = vpop.permute.xlu1 %59  ;;  %v54_v39 = vpop.permute.xlu0 %53 }
  0x75   :  { %v64_v50 = vsel %vm44_vm0, %v60_v38, %v54_v39 }
  0x76   :  { %v65_v12 = vmax.f32 %v6041_v1, %v64_v50 }
  0x78   :  { %v87_v10 = vpop.permute.xlu1 %86  ;;  %v56_v58 = vpop.permute.xlu0 %55 }
  0x79   :  { %v63_v27 = vsel %vm44_vm0, %v54_v39, %v56_v58 }
  0x7a   :  { %v66_v43 = vmax.f32 %v6050_v2, %v63_v27 }
  0x7c   :  { %v93_v42 = vpop.permute.xlu1 %92  ;;  %v89_v21 = vpop.permute.xlu0 %88 }
  0x7d   :  { %v96_v26 = vsel %vm77_vm1, %v87_v10, %v89_v21  ;;  %v97_v46 = vsel %vm77_vm1, %v93_v42, %v87_v10 }
  0x7e   :  { %v99_v54 = vmax.f32 %v66_v43, %v96_v26  ;;  %v98_v2 = vmax.f32 %v65_v12, %v97_v46 }
  0x80   :  { %v6505_v53 = vpop.permute.xlu1 %121  ;;  %v120_v34 = vpop.permute.xlu0 %119 }
  0x81   :  { %v129_v56 = vsel %vm110_vm2, %v120_v34, %v6505_v53 }
  0x82   :  { %v132_v47 = vmax.f32 %v99_v54, %v129_v56  ;;  %v8914_v56 = vld [vmem:[#allocation17_spill] sm:$0xff] }
  0x84   :  { %v6513_v3 = vand.u32 4294901760, %v132_v47  ;;  %v58_v11 = vpop.permute.xlu1 %57  ;;  %v126_v16 = vpop.permute.xlu0 %125 }
  0x85   :  { %v62_v17 = vsel %vm44_vm0, %v56_v58, %v58_v11  ;;  %v130_v37 = vsel %vm110_vm2, %v126_v16, %v120_v34 }
  0x86   :  { %v131_v14 = vmax.f32 %v98_v2, %v130_v37  ;;  %v6520_v30 = vsub.f32 %v132_v47, %v6513_v3  ;;  %v67_v36 = vmax.f32 %v6187_v4, %v62_v17  ;;  %v6677_v17 = vld [vmem:[%s8663_s3 + $0x128] sm:$0xff] }
  0x88   :  { %v6523_v25 = vand.u32 4294901760, %v131_v14  ;;  %737 = vmatprep.mubr.f32.mxu0 %v6520_v30  ;;  %v91_v1 = vpop.permute.xlu0 %90  ;;  %v361_v39 = vand.u32 4294901760, %v6520_v30  ;;  %v6552_v12 = vpop.permute.xlu1 %123 }
  0x89   :  { %v95_v10 = vsel %vm77_vm1, %v89_v21, %v91_v1  ;;  %v61_v21 = vsel %vm44_vm0, %v58_v11, %v60_v38  ;;  %v94_v54 = vsel %vm77_vm1, %v91_v1, %v93_v42  ;;  %v6648_v42 = vld [vmem:[%s8663_s3 + $0x1a8] sm:$0xff] }
  0x8a   :  { %8913 = vst [vmem:[#allocation19_spill] sm:$0xff] %v6523_v25  ;;  %v6529_v58 = vmax.f32 %v67_v36, %v95_v10  ;;  %v6532_v27 = vsub.f32 %v131_v14, %v6523_v25  ;;  %v362_v26 = vsub.f32 %v6520_v30, %v361_v39  ;;  %v68_v46 = vmax.f32 %v6036_v0, %v61_v21  ;;  %v6683_v14 = vld [vmem:[%s8663_s3 + $0x1b0] sm:$0xff]  ;;  %v6688_v36 = vld [vmem:[%s8663_s3 + $0x1b8] sm:$0xff] }
  0x8b   :  { %v127_v0 = vsel %vm110_vm2, %v6552_v12, %v126_v16  ;;  %v6672_v16 = vld [vmem:[%s8663_s3 + $0x120] sm:$0xff]  ;;  %v8702_v10 = vand.u32 4294901760, %v6677_v17  ;;  %v6713_v21 = vld [vmem:[%s8663_s3 + $0x130] sm:$0xff] }
  0x8c   :  { %740 = vmatmul.mubr.f32.vlgmr.msra.gmra.mrb[0].mxu0 %v6532_v27  ;;  %v363_v4 = vand.u32 4294901760, %v362_v26  ;;  %v8699_v43 = vand.u32 4294901760, %v6532_v27  ;;  %v101_v38 = vmax.f32 %v68_v46, %v94_v54  ;;  %v8703_v1 = vand.u32 4294901760, %v6672_v16  ;;  %v6724_v54 = vld [vmem:[%s8663_s3 + $0x1c0] sm:$0xff] }
  0x8d   :  { %5296 = vmatpush3.bf16.msra.mxu0 %v6332_v13  ;;  %1014 = vmatprep.mubr.f32.mxu0 %v6513_v3  ;;  %v8915_v13 = vld [vmem:[#allocation18_spill] sm:$0xff]  ;;  %v8701_v26 = vand.u32 4294901760, %v6683_v14 }
  0x8e   :  { %364 = vmatprep.mubr.f32.mxu1 %v363_v4  ;;  %5298 = vmatprep.subr.bf16.mxu0 %v6347_v44  ;;  %v368_v50 = vsub.f32 %v6532_v27, %v8699_v43  ;;  %v134_v44 = vmax.f32 %v101_v38, %v127_v0  ;;  %v8700_v4 = vand.u32 4294901760, %v6688_v36  ;;  %v8923_v46 = vld [vmem:[#allocation2_spill] sm:$0xff]  ;;  %v8708_v0 = vand.u32 4294901760, %v6724_v54  ;;  %v6767_v43 = vld [vmem:[%s8663_s3 + $0x1d0] sm:$0xff] }
  0x90   :  { %v369_v34 = vand.u32 4294901760, %v368_v50  ;;  %v6718_v50 = vld [vmem:[%s8663_s3 + $0x138] sm:$0xff]  ;;  %v6747_v38 = vpack.c.bf16 %v8700_v4, %v8701_v26  ;;  %v8927_v26 = vld [vmem:[#allocation4_spill] sm:$0xff] }
  0x91   :  { %5300 = vmatpush3.bf16.msra.mxu0 %v8914_v56  ;;  %v6737_v56 = vpack.c.bf16 %v8702_v10, %v8703_v1  ;;  %v6772_v4 = vld [vmem:[%s8663_s3 + $0x1d8] sm:$0xff]  ;;  %v128_v10 = vsel %vm110_vm2, %v6505_v53, %v6552_v12  ;;  %v8721_v12 = vand.u32 4294901760, %v6767_v43 }
  0x92   :  { %370 = vmatmul.mubr.f32.vlgmr.msra.gmra.mrb[0].mxu1 %v369_v34  ;;  %5302 = vmatprep.subr.bf16.mxu0 %v8915_v13  ;;  %v6729_v34 = vld [vmem:[%s8663_s3 + $0x1c8] sm:$0xff]  ;;  %v8706_v13 = vand.u32 4294901760, %v6718_v50  ;;  %8925 = vst [vmem:[#allocation25_spill] sm:$0xff] %v6747_v38 }
  0x93   :  { %5200 = vmatpush3.bf16.msra.mxu1 %v6372_v15  ;;  %600 = vmatprep.mubr.f32.mxu1 %v6513_v3  ;;  %v6566_v15 = vand.u32 4294901760, %v134_v44  ;;  %8924 = vst [vmem:[#allocation2_spill] sm:$0xff] %v6737_v56 }
  0x94   :  { %5202 = vmatprep.subr.bf16.mxu1 %v6387_v33  ;;  %v6579_v33 = vld [vmem:[%s8663_s3 + $0x180] sm:$0xff] }
  0x95   :  { %5304 = vmatpush3.bf16.msra.mxu0 %v6374_v29  ;;  %8916 = vst [vmem:[#allocation17_spill] sm:$0xff] %v6566_v15  ;;  %v6573_v29 = vsub.f32 %v134_v44, %v6566_v15  ;;  %v8707_v44 = vand.u32 4294901760, %v6729_v34 }
  0x96   :  { %5306 = vmatprep.subr.bf16.mxu0 %v6389_v35  ;;  %v6584_v35 = vld [vmem:[%s8663_s3 + $0x188] sm:$0xff] }
  0x97   :  { %5204 = vmatpush3.bf16.msra.mxu1 %v6393_v59  ;;  %8917 = vst [vmem:[#allocation18_spill] sm:$0xff] %v6573_v29  ;;  %v8717_v59 = vand.u32 4294901760, %v6579_v33  ;;  %v6794_v53 = vpack.c.bf16 %v8707_v44, %v8708_v0  ;;  %v6812_v44 = vld [vmem:[%s8663_s3 + $0x1e0] sm:$0xff]  ;;  %v6817_v0 = vld [vmem:[%s8663_s3 + $0x1e8] sm:$0xff]  ;;  %v8950_v24 = vand.u32 4294901760, %v6584_v35 }
  0x98   :  { %5206 = vmatprep.subr.bf16.mxu1 %v6407_v51  ;;  %v6594_v51 = vld [vmem:[%s8663_s3 + $0x100] sm:$0xff] }
  0x99   :  { %5308 = vmatpush3.bf16.msra.mxu0 %v6395_v49  ;;  %v8716_v49 = vand.u32 4294901760, %v6584_v35  ;;  %8929 = vst [vmem:[#allocation4_spill] sm:$0xff] %v6794_v53  ;;  %v6918_v15 = vsub.f32 %v6584_v35, %v8950_v24  ;;  %v8958_v24 = vand.u32 4294901760, %v6594_v51 }
  0x9a   :  { %5310 = vmatprep.subr.bf16.mxu0 %v6409_v52  ;;  %v6599_v52 = vld [vmem:[%s8663_s3 + $0x108] sm:$0xff] }
  0x9b   :  { %5208 = vmatpush3.bf16.msra.mxu1 %v6413_v31  ;;  %v8698_v31 = vand.u32 4294901760, %v6573_v29  ;;  %v6937_v35 = vsub.f32 %v6594_v51, %v8958_v24 }
  0x9c   :  { %5210 = vmatprep.subr.bf16.mxu1 %v6427_v5  ;;  %v6611_v5 = vld [vmem:[%s8663_s3 + $0x198] sm:$0xff] }
  0x9d   :  { %5312 = vmatpush3.bf16.msra.mxu0 %v6415_v60  ;;  %v6606_v60 = vld [vmem:[%s8663_s3 + $0x190] sm:$0xff] }
  0x9e   :  { %5314 = vmatprep.subr.bf16.mxu0 %v6429_v28  ;;  %v8715_v28 = vand.u32 4294901760, %v6594_v51  ;;  %v8964_v51 = vand.u32 4294901760, %v6611_v5 }
  0x9f   :  { %5212 = vmatpush3.bf16.msra.mxu1 %v6433_v45  ;;  %v8714_v45 = vand.u32 4294901760, %v6599_v52 }
  0xa0   :  { %5214 = vmatprep.subr.bf16.mxu1 %v6443_v23  ;;  %v8713_v23 = vand.u32 4294901760, %v6606_v60  ;;  %v6959_v24 = vsub.f32 %v6611_v5, %v8964_v51 }
  0xa1   :  { %5316 = vmatpush3.bf16.msra.mxu0 %v6435_v9  ;;  %v6622_v9 = vpack.c.bf16 %v8716_v49, %v8717_v59  ;;  %v8937_v59 = vld [vmem:[#allocation8_spill] sm:$0xff]  ;;  %v6864_v49 = vpop.permute.xlu1 %36 }
  0xa2   :  { %5318 = vmatprep.subr.bf16.mxu0 %v6445_v48  ;;  %v8712_v48 = vand.u32 4294901760, %v6611_v5 }
  0xa3   :  { %5216 = vmatpush3.bf16.msra.mxu1 %v6449_v41  ;;  %8918 = vst [vmem:[#allocation20_spill] sm:$0xff] %v6622_v9  ;;  %v6629_v41 = vld [vmem:[%s8663_s3 + $0x110] sm:$0xff] }
  0xa4   :  { %5218 = vmatprep.subr.bf16.mxu1 %v6459_v61  ;;  %v1224_v61 = vsub.f32 %v6573_v29, %v8698_v31  ;;  %v8711_v47 = vand.u32 4294901760, %v6629_v41  ;;  %v6665_v11 = vpack.c.bf16 %v8712_v48, %v8713_v23  ;;  %v8926_v31 = vld [vmem:[#allocation3_spill] sm:$0xff] }
  0xa5   :  { %5320 = vmatpush3.bf16.msra.mxu0 %v6451_v57  ;;  %v6634_v57 = vld [vmem:[%s8663_s3 + $0x118] sm:$0xff]  ;;  %v8936_v23 = vld [vmem:[#allocation7_spill] sm:$0xff] }
  0xa6   :  { %5322 = vmatprep.subr.bf16.mxu0 %v6461_v62  ;;  %v6643_v62 = vld [vmem:[%s8663_s3 + $0x1a0] sm:$0xff]  ;;  %v8710_v2 = vand.u32 4294901760, %v6634_v57  ;;  %8920 = vst [vmem:[#allocation22_spill] sm:$0xff] %v6665_v11  ;;  %v1225_v37 = vand.u32 4294901760, %v1224_v61  ;;  %v8970_v51 = vand.u32 4294901760, %v6634_v57 }
  0xa7   :  { %5220 = vmatpush3.bf16.msra.mxu1 %v6465_v63  ;;  %v6656_v63 = vpack.c.bf16 %v8714_v45, %v8715_v28  ;;  %v6754_v61 = vld [vmem:[%s8663_s3 + $0x140] sm:$0xff] }
  0xa8   :  { %5222 = vmatprep.subr.bf16.mxu1 %v6471_v22  ;;  %v8704_v22 = vand.u32 4294901760, %v6648_v42 }
  0xa9   :  { %5324 = vmatpush3.bf16.msra.mxu0 %v6467_v55  ;;  %8919 = vst [vmem:[#allocation21_spill] sm:$0xff] %v6656_v63  ;;  %v8705_v55 = vand.u32 4294901760, %v6643_v62 }
  0xaa   :  { %5358 = vmatprep.subr.bf16.mxu0 %v6622_v9 }
  0xab   :  { %5224 = vmatpush3.bf16.msra.mxu1 %v6473_v19  ;;  %v6697_v19 = vpack.c.bf16 %v8710_v2, %v8711_v47  ;;  %v8932_v2 = vld [vmem:[#allocation6_spill] sm:$0xff] }
  0xac   :  { %1016 = vmatmul.mubr.f32.vlgmr.msra.gmra.mrb[2].mxu0 %v6523_v25  ;;  %5226 = vmatprep.subr.bf16.mxu1 %v6478_v6  ;;  %v6706_v6 = vpack.c.bf16 %v8704_v22, %v8705_v55  ;;  %v133_v22 = vmax.f32 %v6529_v58, %v128_v10  ;;  %v8720_v55 = vand.u32 4294901760, %v6772_v4  ;;  %v6806_v58 = vld [vmem:[%s8663_s3 + $0x158] sm:$0xff] }
  0xad   :  { %5360 = vmatpush3.bf16.msra.mxu0 %v6656_v63  ;;  %1226 = vmatprep.mubr.f32.mxu0 %v1225_v37  ;;  %8921 = vst [vmem:[#allocation23_spill] sm:$0xff] %v6697_v19  ;;  %v6759_v37 = vld [vmem:[%s8663_s3 + $0x148] sm:$0xff]  ;;  %v8930_v10 = vld [vmem:[#allocation5_spill] sm:$0xff] }
  0xae   :  { %5362 = vmatprep.subr.bf16.mxu0 %v6665_v11  ;;  %8922 = vst [vmem:[#allocation24_spill] sm:$0xff] %v6706_v6  ;;  %v8718_v1 = vand.u32 4294901760, %v6759_v37  ;;  %v6831_v45 = vand.u32 4294901760, %v133_v22  ;;  %v6838_v28 = vpack.c.bf16 %v8720_v55, %v8721_v12  ;;  %v6856_v55 = vld [vmem:[%s8663_s3 + $0x1f0] sm:$0xff]  ;;  %v6861_v12 = vld [vmem:[%s8663_s3 + $0x1f8] sm:$0xff]  ;;  %v8941_v11 = vand.u32 4294901760, %v6812_v44 }
  0xaf   :  { %5228 = vmatpush3.bf16.msra.mxu1 %v6480_v18  ;;  %v8709_v18 = vand.u32 4294901760, %v6713_v21 }
  0xb0   :  { %5262 = vmatprep.subr.bf16.mxu1 %v8923_v46  ;;  %8934 = vst [vmem:[#allocation26_spill] sm:$0xff] %v6831_v45  ;;  %8935 = vst [vmem:[#allocation27_spill] sm:$0xff] %v6838_v28 }
  0xb1   :  { %5364 = vmatpush3.bf16.msra.mxu0 %v6697_v19  ;;  %v6784_v30 = vpack.c.bf16 %v8706_v13, %v8709_v18  ;;  %v6801_v13 = vld [vmem:[%s8663_s3 + $0x150] sm:$0xff]  ;;  %v6819_v18 = vpop.permute.xlu0 %34  ;;  %v6878_v19 = vsub.f32 %v133_v22, %v6831_v45  ;;  %v6897_v22 = vld [vmem:[%s8663_s3 + $0x178] sm:$0xff]  ;;  %v8949_v45 = vand.u32 4294901760, %v6579_v33 }
  0xb2   :  { %602 = vmatmul.mubr.f32.vlgmr.msra.gmra.mrb[2].mxu1 %v6523_v25  ;;  %5366 = vmatprep.subr.bf16.mxu0 %v6706_v6  ;;  %8931 = vst [vmem:[#allocation5_spill] sm:$0xff] %v6819_v18  ;;  %v8740_v48 = vand.u32 4294901760, %v6801_v13  ;;  %v8956_v18 = vld [vmem:[#allocation11_spill] sm:$0xff]  ;;  %v8961_v9 = vand.u32 4294901760, %v6897_v22 }
  0xb3   :  { %5264 = vmatpush3.bf16.msra.mxu1 %v8926_v31  ;;  %844 = vmatprep.mubr.f32.mxu1 %v361_v39  ;;  %8928 = vst [vmem:[#allocation3_spill] sm:$0xff] %v6784_v30  ;;  %v8719_v39 = vand.u32 4294901760, %v6754_v61  ;;  %8940 = vst [vmem:[#allocation8_spill] sm:$0xff] %v6878_v19  ;;  %v6913_v25 = vsub.f32 %v6579_v33, %v8949_v45  ;;  %v8957_v45 = vld [vmem:[#allocation12_spill] sm:$0xff] }
  0xb4   :  { %5266 = vmatprep.subr.bf16.mxu1 %v8927_v26 }
  0xb5   :  { %5368 = vmatpush3.bf16.msra.mxu0 %v6737_v56  ;;  %v6827_v47 = vpack.c.bf16 %v8718_v1, %v8719_v39  ;;  %v6845_v1 = vld [vmem:[%s8663_s3 + $0x160] sm:$0xff]  ;;  %v6850_v39 = vld [vmem:[%s8663_s3 + $0x168] sm:$0xff]  ;;  %v6875_v6 = vpop.permute.xlu0 %40  ;;  %v6892_v56 = vld [vmem:[%s8663_s3 + $0x170] sm:$0xff] }
  0xb6   :  { %5370 = vmatprep.subr.bf16.mxu0 %v6747_v38  ;;  %v8944_v38 = vld [vmem:[#allocation9_spill] sm:$0xff] }
  0xb7   :  { %5268 = vmatpush3.bf16.msra.mxu1 %v8930_v10  ;;  %8933 = vst [vmem:[#allocation6_spill] sm:$0xff] %v6827_v47 }
  0xb8   :  { %5270 = vmatprep.subr.bf16.mxu1 %v8932_v2 }
  0xb9   :  { %5372 = vmatpush3.bf16.msra.mxu0 %v6784_v30  ;;  %v6931_v33 = vpop.permute.xlu0 %71 }
  0xba   :  { %5374 = vmatprep.subr.bf16.mxu0 %v6794_v53  ;;  %v8938_v53 = vand.u32 4294901760, %v6806_v58 }
  0xbb   :  { %5272 = vmatpush3.bf16.msra.mxu1 %v8936_v23 }
  0xbc   :  { %5274 = vmatprep.subr.bf16.mxu1 %v8937_v59  ;;  %v6871_v30 = vpack.c.bf16 %v8938_v53, %v8740_v48  ;;  %v6928_v53 = vpop.permute.xlu1 %69 }
  0xbd   :  { %5376 = vmatpush3.bf16.msra.mxu0 %v6827_v47  ;;  %v8942_v47 = vand.u32 4294901760, %v6817_v0  ;;  %8955 = vst [vmem:[#allocation30_spill] sm:$0xff] %v6928_v53 }
  0xbe   :  { %8939 = vst [vmem:[#allocation7_spill] sm:$0xff] %v6871_v30  ;;  %5378 = vmatprep.subr.bf16.mxu0 %v6838_v28  ;;  %v8945_v28 = vld [vmem:[#allocation10_spill] sm:$0xff] }
  0xbf   :  { %v6885_v63 = vpack.c.bf16 %v8942_v47, %v8941_v11  ;;  %5276 = vmatpush3.bf16.msra.mxu1 %v8944_v38  ;;  %v8946_v47 = vand.u32 4294901760, %v6845_v1  ;;  %v8947_v11 = vand.u32 4294901760, %v6850_v39  ;;  %8951 = vst [vmem:[#allocation10_spill] sm:$0xff] %v6918_v15 }
  0xc0   :  { %5278 = vmatprep.subr.bf16.mxu1 %v8945_v28 }
  0xc1   :  { %8943 = vst [vmem:[#allocation28_spill] sm:$0xff] %v6885_v63  ;;  %5380 = vmatpush3.bf16.msra.mxu0 %v6871_v30  ;;  %v6906_v48 = vpack.c.bf16 %v8947_v11, %v8946_v47  ;;  %v8952_v30 = vand.u32 4294901760, %v6856_v55  ;;  %v8953_v47 = vand.u32 4294901760, %v6861_v12 }
  0xc2   :  { %5382 = vmatprep.subr.bf16.mxu0 %v6885_v63  ;;  %v8959_v63 = vand.u32 4294901760, %v6599_v52 }
  0xc3   :  { %8948 = vst [vmem:[#allocation9_spill] sm:$0xff] %v6906_v48  ;;  %v6925_v11 = vpack.c.bf16 %v8953_v47, %v8952_v30  ;;  %5280 = vmatpush3.bf16.msra.mxu1 %v8956_v18  ;;  %v8960_v47 = vand.u32 4294901760, %v6892_v56 }
  0xc4   :  { %5282 = vmatprep.subr.bf16.mxu1 %v8957_v45  ;;  %v6942_v30 = vsub.f32 %v6599_v52, %v8959_v63  ;;  %v8963_v45 = vand.u32 4294901760, %v6606_v60  ;;  %v8965_v52 = vand.u32 4294901760, %v6878_v19 }
  0xc5   :  { %8954 = vst [vmem:[#allocation29_spill] sm:$0xff] %v6925_v11  ;;  %5384 = vmatpush3.bf16.msra.mxu0 %v6906_v48  ;;  %v6949_v53 = vpack.c.bf16 %v8961_v9, %v8960_v47  ;;  %v5421_v9 = vpack.c.bf16 %v6918_v15, %v6913_v25  ;;  %v8966_v47 = vld [vmem:[#allocation13_spill] sm:$0xff]  ;;  %v8967_v48 = vld [vmem:[#allocation14_spill] sm:$0xff] }
  0xc6   :  { %v6954_v18 = vsub.f32 %v6606_v60, %v8963_v45  ;;  %5386 = vmatprep.subr.bf16.mxu0 %v6925_v11  ;;  %v1230_v63 = vsub.f32 %v6878_v19, %v8965_v52  ;;  %v6969_v60 = vpop.permute.xlu1 %75  ;;  %v8969_v45 = vand.u32 4294901760, %v6629_v41  ;;  %v6979_v11 = vsub.f32 %v6634_v57, %v8970_v51  ;;  %v6984_v19 = vpop.permute.xlu0 %102  ;;  %v8974_v51 = vld [vmem:[#allocation15_spill] sm:$0xff] }
  0xc7   :  { %8962 = vst [vmem:[#allocation31_spill] sm:$0xff] %v6949_v53  ;;  %5284 = vmatpush3.bf16.msra.mxu1 %v8966_v47  ;;  %8968 = vst [vmem:[#allocation32_spill] sm:$0xff] %v6969_v60  ;;  %v5423_v52 = vpack.c.bf16 %v6942_v30, %v6937_v35 }
  0xc8   :  { %5286 = vmatprep.subr.bf16.mxu1 %v8967_v48  ;;  %v6974_v5 = vsub.f32 %v6629_v41, %v8969_v45  ;;  %8971 = vst [vmem:[#allocation33_spill] sm:$0xff] %v6984_v19  ;;  %v8972_v48 = vand.u32 4294901760, %v6643_v62  ;;  %v8973_v41 = vand.u32 4294901760, %v6648_v42  ;;  %v1231_v15 = vand.u32 4294901760, %v1230_v63 }
  0xc9   :  { %5388 = vmatpush3.bf16.msra.mxu0 %v6949_v53  ;;  %v5425_v57 = vpack.c.bf16 %v6959_v24, %v6954_v18  ;;  %v8975_v53 = vand.u32 4294901760, %v6672_v16 }
  0xca   :  { %v6989_v47 = vsub.f32 %v6643_v62, %v8972_v48  ;;  %v6994_v45 = vsub.f32 %v6648_v42, %v8973_v41  ;;  %5422 = vmatprep.subr.bf16.mxu0 %v5421_v9  ;;  %v8976_v62 = vand.u32 4294901760, %v6677_v17  ;;  %v5427_v63 = vpack.c.bf16 %v6979_v11, %v6974_v5 }
  0xcb   :  { %5288 = vmatpush3.bf16.msra.mxu1 %v8974_v51  ;;  %v7003_v48 = vsub.f32 %v6672_v16, %v8975_v53  ;;  %v8978_v41 = vand.u32 4294901760, %v6688_v36  ;;  %v7025_v53 = vpop.permute.xlu1 %104 }
  0xcc   :  { %1232 = vmatmul.mubr.f32.vlgmr.msra.gmra.mrb[4].mxu0 %v1231_v15  ;;  %5290 = vmatprep.subr.bf16.mxu1 %v6325_v7  ;;  %v7008_v42 = vsub.f32 %v6677_v17, %v8976_v62  ;;  %v8977_v15 = vand.u32 4294901760, %v6683_v14  ;;  %v5429_v17 = vpack.c.bf16 %v6994_v45, %v6989_v47 }
  0xcd   :  { %5424 = vmatpush3.bf16.msra.mxu0 %v5423_v52  ;;  %1599 = vmatprep.mubr.f32.mxu0 %v6573_v29  ;;  %v7021_v16 = vsub.f32 %v6688_v36, %v8978_v41  ;;  %v7028_v52 = vpop.permute.xlu0 %108  ;;  %v8981_v36 = vand.u32 4294901760, %v6718_v50  ;;  %v8982_v41 = vand.u32 4294901760, %v6724_v54 }
  0xce   :  { %v7016_v9 = vsub.f32 %v6683_v14, %v8977_v15  ;;  %5426 = vmatprep.subr.bf16.mxu0 %v5425_v57  ;;  %8979 = vst [vmem:[#allocation15_spill] sm:$0xff] %v7028_v52  ;;  %v8980_v14 = vand.u32 4294901760, %v6713_v21  ;;  %v5431_v15 = vpack.c.bf16 %v7008_v42, %v7003_v48 }
  0xcf   :  { %5292 = vmatpush3.bf16.msra.mxu1 %v6327_v8  ;;  %v7039_v57 = vsub.f32 %v6718_v50, %v8981_v36  ;;  %v7046_v29 = vsub.f32 %v6724_v54, %v8982_v41  ;;  %v8985_v36 = vand.u32 4294901760, %v6754_v61 }
  0xd0   :  { %5326 = vmatprep.subr.bf16.mxu1 %v8923_v46  ;;  %v7034_v62 = vsub.f32 %v6713_v21, %v8980_v14  ;;  %v8983_v46 = vand.u32 4294901760, %v6729_v34  ;;  %v8984_v21 = vand.u32 4294901760, %v6532_v27  ;;  %v5433_v50 = vpack.c.bf16 %v7021_v16, %v7016_v9 }
  0xd1   :  { %5428 = vmatpush3.bf16.msra.mxu0 %v5427_v63  ;;  %v39_v63 = vpop.permute.xlu1 %38  ;;  %v74_v14 = vpop.permute.xlu0 %73  ;;  %v7077_v41 = vsub.f32 %v6754_v61, %v8985_v36 }
  0xd2   :  { %v7051_v19 = vsub.f32 %v6729_v34, %v8983_v46  ;;  %848 = vmatmul.mubr.f32.vlgmr.msra.gmra.mrb[4].mxu1 %v8984_v21  ;;  %5430 = vmatprep.subr.bf16.mxu0 %v5429_v17  ;;  %v45_v54 = vsel %vm44_vm0, %v39_v63, %v6875_v6  ;;  %v46_v34 = vsel %vm44_vm0, %v6864_v49, %v39_v63  ;;  %v8986_v46 = vand.u32 4294901760, %v6759_v37 }
  0xd3   :  { %5328 = vmatpush3.bf16.msra.mxu1 %v8926_v31  ;;  %1118 = vmatprep.mubr.f32.mxu1 %v6513_v3  ;;  %v51_v27 = vmax.f32 %v6485_v32, %v46_v34  ;;  %v52_v17 = vmax.f32 %v6355_v20, %v45_v54  ;;  %v78_v31 = vsel %vm77_vm1, %v74_v14, %v6969_v60  ;;  %v8987_v20 = vand.u32 4294901760, %v6767_v43 }
  0xd4   :  { %5330 = vmatprep.subr.bf16.mxu1 %v8927_v26  ;;  %v79_v3 = vsel %vm77_vm1, %v6931_v33, %v74_v14  ;;  %v7082_v26 = vsub.f32 %v6759_v37, %v8986_v46  ;;  %v5435_v21 = vpack.c.bf16 %v7039_v57, %v7034_v62  ;;  %v8988_v63 = vand.u32 4294901760, %v6772_v4 }
  0xd5   :  { %v7087_v32 = vsub.f32 %v6767_v43, %v8987_v20  ;;  %5432 = vmatpush3.bf16.msra.mxu0 %v5431_v15  ;;  %v5437_v61 = vpack.c.bf16 %v7051_v19, %v7046_v29  ;;  %v84_v37 = vmax.f32 %v51_v27, %v79_v3  ;;  %v85_v34 = vmax.f32 %v52_v17, %v78_v31  ;;  %v107_v14 = vpop.permute.xlu1 %106 }
  0xd6   :  { %v7094_v54 = vsub.f32 %v6772_v4, %v8988_v63  ;;  %5434 = vmatprep.subr.bf16.mxu0 %v5433_v50  ;;  %v111_v43 = vsel %vm110_vm2, %v107_v14, %v7028_v52  ;;  %v112_v15 = vsel %vm110_vm2, %v7025_v53, %v107_v14  ;;  %v8991_v27 = vand.u32 4294901760, %v6801_v13 }
  0xd7   :  { %5332 = vmatpush3.bf16.msra.mxu1 %v8930_v10  ;;  %v7106_v4 = vmax.f32 %v84_v37, %v112_v15  ;;  %v7108_v50 = vmax.f32 %v85_v34, %v111_v43  ;;  %v8992_v10 = vand.u32 4294901760, %v6806_v58  ;;  %v5439_v3 = vpack.c.bf16 %v7082_v26, %v7077_v41  ;;  %v9001_v43 = vld [vmem:[#allocation10_spill] sm:$0xff] }
  0xd8   :  { %5334 = vmatprep.subr.bf16.mxu1 %v8932_v2  ;;  %v7113_v17 = vsub.f32 %v6801_v13, %v8991_v27  ;;  %v8993_v2 = vand.u32 4294901760, %v6812_v44  ;;  %v8994_v46 = vand.u32 4294901760, %v6817_v0  ;;  %v5441_v13 = vpack.c.bf16 %v7094_v54, %v7087_v32 }
  0xd9   :  { %8989 = vst [vmem:[#allocation34_spill] sm:$0xff] %v7106_v4  ;;  %8990 = vst [vmem:[#allocation35_spill] sm:$0xff] %v7108_v50  ;;  %v7118_v31 = vsub.f32 %v6806_v58, %v8992_v10  ;;  %5436 = vmatpush3.bf16.msra.mxu0 %v5435_v21  ;;  %v8995_v58 = vand.u32 4294901760, %v6845_v1  ;;  %v8998_v37 = vand.u32 4294901760, %v6861_v12  ;;  %v1359_v15 = vand.u32 4294901760, %v9001_v43 }
  0xda   :  { %v7125_v36 = vsub.f32 %v6812_v44, %v8993_v2  ;;  %v7130_v20 = vsub.f32 %v6817_v0, %v8994_v46  ;;  %5438 = vmatprep.subr.bf16.mxu0 %v5437_v61  ;;  %v8996_v44 = vand.u32 4294901760, %v6850_v39  ;;  %v8997_v0 = vand.u32 4294901760, %v6856_v55  ;;  %v9002_v46 = vld [vmem:[#allocation11_spill] sm:$0xff] }
  0xdb   :  { %5336 = vmatpush3.bf16.msra.mxu1 %v8936_v23  ;;  %v7138_v21 = vsub.f32 %v6845_v1, %v8995_v58  ;;  %v7154_v23 = vsub.f32 %v6861_v12, %v8998_v37  ;;  %v5443_v1 = vpack.c.bf16 %v7118_v31, %v7113_v17  ;;  %v1352_v12 = vand.u32 4294901760, %v6913_v25 }
  0xdc   :  { %5338 = vmatprep.subr.bf16.mxu1 %v8937_v59  ;;  %v7144_v63 = vsub.f32 %v6850_v39, %v8996_v44  ;;  %v7149_v61 = vsub.f32 %v6856_v55, %v8997_v0  ;;  %v5445_v59 = vpack.c.bf16 %v7130_v20, %v7125_v36  ;;  %v8999_v39 = vand.u32 4294901760, %v6892_v56  ;;  %v9003_v44 = vld [vmem:[#allocation12_spill] sm:$0xff] }
  0xdd   :  { %5440 = vmatpush3.bf16.msra.mxu0 %v5439_v3  ;;  %v9000_v55 = vand.u32 4294901760, %v6897_v22  ;;  %v1240_v27 = vand.u32 4294901760, %v6937_v35  ;;  %v1247_v10 = vand.u32 4294901760, %v6942_v30  ;;  %v1373_v58 = vand.u32 4294901760, %v6959_v24 }
  0xde   :  { %5442 = vmatprep.subr.bf16.mxu0 %v5441_v13  ;;  %v7163_v34 = vsub.f32 %v6892_v56, %v8999_v39  ;;  %v5447_v56 = vpack.c.bf16 %v7144_v63, %v7138_v21  ;;  %v1366_v13 = vand.u32 4294901760, %v6954_v18  ;;  %v5485_v37 = vpack.c.bf16 %v1359_v15, %v1352_v12 }
  0xdf   :  { %v7168_v14 = vsub.f32 %v6897_v22, %v9000_v55  ;;  %5340 = vmatpush3.bf16.msra.mxu1 %v8944_v38  ;;  %v5449_v22 = vpack.c.bf16 %v7154_v23, %v7149_v61  ;;  %v1353_v38 = vsub.f32 %v6913_v25, %v1352_v12  ;;  %v1241_v3 = vsub.f32 %v6937_v35, %v1240_v27 }
  0xe0   :  { %5342 = vmatprep.subr.bf16.mxu1 %v8945_v28  ;;  %v1360_v28 = vsub.f32 %v9001_v43, %v1359_v15  ;;  %v1248_v2 = vsub.f32 %v6942_v30, %v1247_v10  ;;  %v1254_v25 = vand.u32 4294901760, %v6974_v5  ;;  %v1367_v35 = vsub.f32 %v6954_v18, %v1366_v13  ;;  %v9005_v15 = vld [vmem:[#allocation14_spill] sm:$0xff] }
  0xe1   :  { %5444 = vmatpush3.bf16.msra.mxu0 %v5443_v1  ;;  %v5451_v0 = vpack.c.bf16 %v7168_v14, %v7163_v34  ;;  %v1261_v1 = vand.u32 4294901760, %v6979_v11  ;;  %v1374_v30 = vsub.f32 %v6959_v24, %v1373_v58  ;;  %v1242_v55 = vand.u32 4294901760, %v1241_v3 }
  0xe2   :  { %5446 = vmatprep.subr.bf16.mxu0 %v5445_v59  ;;  %v1354_v59 = vand.u32 4294901760, %v1353_v38  ;;  %v1361_v39 = vand.u32 4294901760, %v1360_v28  ;;  %v1249_v43 = vand.u32 4294901760, %v1248_v2  ;;  %v1387_v4 = vand.u32 4294901760, %v6994_v45 }
  0xe3   :  { %5344 = vmatpush3.bf16.msra.mxu1 %v9002_v46  ;;  %v9004_v46 = vld [vmem:[#allocation13_spill] sm:$0xff]  ;;  %v1262_v12 = vsub.f32 %v6979_v11, %v1261_v1  ;;  %v1268_v18 = vand.u32 4294901760, %v7003_v48  ;;  %v1275_v24 = vand.u32 4294901760, %v7008_v42  ;;  %v5489_v38 = vpack.c.bf16 %v1373_v58, %v1366_v13 }
  0xe4   :  { %5346 = vmatprep.subr.bf16.mxu1 %v9003_v44  ;;  %v1255_v44 = vsub.f32 %v6974_v5, %v1254_v25  ;;  %v1368_v28 = vand.u32 4294901760, %v1367_v35  ;;  %v1375_v3 = vand.u32 4294901760, %v1374_v30  ;;  %v5491_v2 = vpack.c.bf16 %v1261_v1, %v1254_v25  ;;  %v9006_v11 = vld [vmem:[#allocation5_spill] sm:$0xff]  ;;  %v9009_v1 = vld [vmem:[#allocation16_spill] sm:$0xff] }
  0xe5   :  { %5448 = vmatpush3.bf16.msra.mxu0 %v5447_v56  ;;  %v1380_v56 = vand.u32 4294901760, %v6989_v47  ;;  %v5389_v5 = vpack.c.bf16 %v1361_v39, %v1354_v59  ;;  %v1263_v52 = vand.u32 4294901760, %v1262_v12  ;;  %v5495_v58 = vpack.c.bf16 %v1275_v24, %v1268_v18 }
  0xe6   :  { %5450 = vmatprep.subr.bf16.mxu0 %v5449_v22  ;;  %v5487_v22 = vpack.c.bf16 %v1247_v10, %v1240_v27  ;;  %v1256_v50 = vand.u32 4294901760, %v1255_v44  ;;  %v1388_v27 = vsub.f32 %v6994_v45, %v1387_v4  ;;  %v9007_v10 = vld [vmem:[#allocation8_spill] sm:$0xff]  ;;  %v1269_v25 = vsub.f32 %v7003_v48, %v1268_v18 }
  0xe7   :  { %5348 = vmatpush3.bf16.msra.mxu1 %v9004_v46  ;;  %v5391_v46 = vpack.c.bf16 %v1249_v43, %v1242_v55  ;;  %v1381_v60 = vsub.f32 %v6989_v47, %v1380_v56  ;;  %v5493_v13 = vpack.c.bf16 %v1387_v4, %v1380_v56  ;;  %v1282_v45 = vand.u32 4294901760, %v7034_v62  ;;  %v9010_v4 = vld [vmem:[#allocation30_spill] sm:$0xff] }
  0xe8   :  { %5350 = vmatprep.subr.bf16.mxu1 %v9005_v15  ;;  %v47_v15 = vsel %vm44_vm0, %v9006_v11, %v6864_v49  ;;  %v9008_v49 = vld [vmem:[#allocation17_spill] sm:$0xff]  ;;  %v1289_v35 = vand.u32 4294901760, %v7039_v57  ;;  %v80_v30 = vsel %vm77_vm1, %v9010_v4, %v6931_v33  ;;  %v5395_v59 = vpack.c.bf16 %v1263_v52, %v1256_v50  ;;  %v9011_v52 = vld [vmem:[#allocation19_spill] sm:$0xff] }
  0xe9   :  { %5452 = vmatpush3.bf16.msra.mxu0 %v5451_v0  ;;  %v1394_v0 = vand.u32 4294901760, %v7016_v9  ;;  %v50_v47 = vmax.f32 %v9009_v1, %v47_v15  ;;  %v1382_v39 = vand.u32 4294901760, %v1381_v60  ;;  %v1389_v55 = vand.u32 4294901760, %v1388_v27 }
  0xea   :  { %5486 = vmatprep.subr.bf16.mxu0 %v5485_v37  ;;  %v1401_v37 = vand.u32 4294901760, %v7021_v16  ;;  %v1408_v44 = vand.u32 4294901760, %v7046_v29  ;;  %v1415_v12 = vand.u32 4294901760, %v7051_v19  ;;  %v1270_v56 = vand.u32 4294901760, %v1269_v25 }
  0xeb   :  { %5352 = vmatpush3.bf16.msra.mxu1 %v8974_v51  ;;  %v5393_v51 = vpack.c.bf16 %v1375_v3, %v1368_v28  ;;  %v1395_v48 = vsub.f32 %v7016_v9, %v1394_v0  ;;  %v1283_v18 = vsub.f32 %v7034_v62, %v1282_v45  ;;  %v1290_v33 = vsub.f32 %v7039_v57, %v1289_v35 }
  0xec   :  { %1602 = vmatmul.mubr.f32.vlgmr.msra.gmra.mrb[6].mxu0 %v9007_v10  ;;  %5354 = vmatprep.subr.bf16.mxu1 %v6325_v7  ;;  %v1276_v7 = vsub.f32 %v7008_v42, %v1275_v24  ;;  %v5497_v43 = vpack.c.bf16 %v1401_v37, %v1394_v0  ;;  %v1402_v42 = vsub.f32 %v7021_v16, %v1401_v37  ;;  %v1296_v9 = vand.u32 4294901760, %v7077_v41  ;;  %v9012_v24 = vld [vmem:[#allocation33_spill] sm:$0xff] }
  0xed   :  { %5488 = vmatpush3.bf16.msra.mxu0 %v5487_v22  ;;  %1876 = vmatprep.mubr.f32.mxu0 %v9008_v49  ;;  %v1303_v50 = vand.u32 4294901760, %v7082_v26  ;;  %v113_v16 = vsel %vm110_vm2, %v9012_v24, %v7025_v53  ;;  %v5499_v62 = vpack.c.bf16 %v1289_v35, %v1282_v45  ;;  %v5397_v22 = vpack.c.bf16 %v1389_v55, %v1382_v39 }
  0xee   :  { %5490 = vmatprep.subr.bf16.mxu0 %v5489_v38  ;;  %v1277_v60 = vand.u32 4294901760, %v1276_v7  ;;  %v1396_v57 = vand.u32 4294901760, %v1395_v48  ;;  %v1422_v38 = vand.u32 4294901760, %v7087_v32  ;;  %v1403_v28 = vand.u32 4294901760, %v1402_v42 }
  0xef   :  { %5356 = vmatpush3.bf16.msra.mxu1 %v6327_v8  ;;  %v83_v8 = vmax.f32 %v50_v47, %v80_v30  ;;  %v1429_v3 = vand.u32 4294901760, %v7094_v54  ;;  %v5501_v15 = vpack.c.bf16 %v1415_v12, %v1408_v44  ;;  %v1284_v27 = vand.u32 4294901760, %v1283_v18 }
  0xf0   :  { %5390 = vmatprep.subr.bf16.mxu1 %v5389_v5  ;;  %v1416_v5 = vsub.f32 %v7051_v19, %v1415_v12  ;;  %v1291_v53 = vand.u32 4294901760, %v1290_v33  ;;  %v5503_v0 = vpack.c.bf16 %v1303_v50, %v1296_v9  ;;  %v1297_v37 = vsub.f32 %v7077_v41, %v1296_v9 }
  0xf1   :  { %5492 = vmatpush3.bf16.msra.mxu0 %v5491_v2  ;;  %v1409_v2 = vsub.f32 %v7046_v29, %v1408_v44  ;;  %v1304_v25 = vsub.f32 %v7082_v26, %v1303_v50  ;;  %v1317_v1 = vand.u32 4294901760, %v7118_v31  ;;  %v1423_v29 = vsub.f32 %v7087_v32, %v1422_v38 }
  0xf2   :  { %1120 = vmatmul.mubr.f32.vlgmr.msra.gmra.mrb[6].mxu1 %v9011_v52  ;;  %5494 = vmatprep.subr.bf16.mxu0 %v5493_v13  ;;  %v5399_v13 = vpack.c.bf16 %v1277_v60, %v1270_v56  ;;  %v1430_v19 = vsub.f32 %v7094_v54, %v1429_v3  ;;  %v5505_v47 = vpack.c.bf16 %v1429_v3, %v1422_v38  ;;  %v1417_v35 = vand.u32 4294901760, %v1416_v5 }
  0xf3   :  { %5392 = vmatpush3.bf16.msra.mxu1 %v5391_v46  ;;  %1462 = vmatprep.mubr.f32.mxu1 %v9008_v49  ;;  %v116_v46 = vmax.f32 %v83_v8, %v113_v16  ;;  %v1410_v45 = vand.u32 4294901760, %v1409_v2  ;;  %v5403_v7 = vpack.c.bf16 %v1291_v53, %v1284_v27  ;;  %v1318_v26 = vsub.f32 %v7118_v31, %v1317_v1 }
  0xf4   :  { %5394 = vmatprep.subr.bf16.mxu1 %v5393_v51  ;;  %v1310_v51 = vand.u32 4294901760, %v7113_v17  ;;  %v1305_v39 = vand.u32 4294901760, %v1304_v25  ;;  %v1436_v32 = vand.u32 4294901760, %v7125_v36  ;;  %v1443_v54 = vand.u32 4294901760, %v7130_v20 }
  0xf5   :  { %5496 = vmatpush3.bf16.msra.mxu0 %v5495_v58  ;;  %v5401_v58 = vpack.c.bf16 %v1403_v28, %v1396_v57  ;;  %v7250_v30 = vand.u32 4294901760, %v116_v46  ;;  %v1324_v55 = vand.u32 4294901760, %v7138_v21  ;;  %v1331_v48 = vand.u32 4294901760, %v7144_v63 }
  0xf6   :  { %5498 = vmatprep.subr.bf16.mxu0 %v5497_v43  ;;  %v1311_v41 = vsub.f32 %v7113_v17, %v1310_v51  ;;  %v1424_v43 = vand.u32 4294901760, %v1423_v29  ;;  %v1431_v44 = vand.u32 4294901760, %v1430_v19  ;;  %v5405_v17 = vpack.c.bf16 %v1417_v35, %v1410_v45 }
  0xf7   :  { %5396 = vmatpush3.bf16.msra.mxu1 %v5395_v59  ;;  %v1298_v59 = vand.u32 4294901760, %v1297_v37  ;;  %v1437_v31 = vsub.f32 %v7125_v36, %v1436_v32  ;;  %v1444_v12 = vsub.f32 %v7130_v20, %v1443_v54  ;;  %v5507_v42 = vpack.c.bf16 %v1317_v1, %v1310_v51  ;;  %v7298_v51 = vld [vmem:[%s8665_s2 + $0x90] sm:$0xff]  ;;  %v7303_v1 = vld [vmem:[%s8665_s2 + $0x98] sm:$0xff] }
  0xf8   :  { %5398 = vmatprep.subr.bf16.mxu1 %v5397_v22  ;;  %v1312_v56 = vand.u32 4294901760, %v1311_v41  ;;  %v1319_v18 = vand.u32 4294901760, %v1318_v26  ;;  %v7259_v33 = vsub.f32 %v116_v46, %v7250_v30  ;;  %v5509_v8 = vpack.c.bf16 %v1443_v54, %v1436_v32  ;;  %v7273_v22 = vld [vmem:[%s8665_s2 + $0x88] sm:$0xff]  ;;  %v7320_v41 = vld [vmem:[%s8665_s2 + $0x10] sm:$0xff]  ;;  %v7325_v26 = vld [vmem:[%s8665_s2 + $0x18] sm:$0xff] }
  0xf9   :  { %5500 = vmatpush3.bf16.msra.mxu0 %v5499_v62  ;;  %v1450_v52 = vand.u32 4294901760, %v7149_v61  ;;  %v1457_v60 = vand.u32 4294901760, %v7154_v23  ;;  %v1325_v9 = vsub.f32 %v7138_v21, %v1324_v55  ;;  %v5407_v50 = vpack.c.bf16 %v1305_v39, %v1298_v59  ;;  %v7268_v62 = vld [vmem:[%s8665_s2 + $0x80] sm:$0xff] }
  0xfa   :  { %5502 = vmatprep.subr.bf16.mxu0 %v5501_v15  ;;  %9013 = vst [vmem:[#allocation10_spill] sm:$0xff] %v7259_v33  ;;  %v5511_v36 = vpack.c.bf16 %v1331_v48, %v1324_v55  ;;  %v5409_v16 = vpack.c.bf16 %v1431_v44, %v1424_v43  ;;  %v1332_v20 = vsub.f32 %v7144_v63, %v1331_v48  ;;  %v1438_v57 = vand.u32 4294901760, %v1437_v31  ;;  %v7278_v21 = vld [vmem:[%s8665_s2] sm:$0xff]  ;;  %v7287_v15 = vld [vmem:[%s8665_s2 + $0x8] sm:$0xff] }
  0xfb   :  { %5400 = vmatpush3.bf16.msra.mxu1 %v5399_v13  ;;  %v1445_v38 = vand.u32 4294901760, %v1444_v12  ;;  %v1451_v63 = vsub.f32 %v7149_v61, %v1450_v52  ;;  %v1458_v28 = vsub.f32 %v7154_v23, %v1457_v60  ;;  %v5411_v3 = vpack.c.bf16 %v1319_v18, %v1312_v56  ;;  %v7330_v54 = vld [vmem:[%s8665_s2 + $0xa0] sm:$0xff]  ;;  %v7335_v55 = vld [vmem:[%s8665_s2 + $0xa8] sm:$0xff] }
  0xfc   :  { %5402 = vmatprep.subr.bf16.mxu1 %v5401_v58  ;;  %v1338_v2 = vand.u32 4294901760, %v7163_v34  ;;  %v1345_v5 = vand.u32 4294901760, %v7168_v14  ;;  %v8773_v27 = vand.u32 4294901760, %v7259_v33  ;;  %v5513_v53 = vpack.c.bf16 %v1457_v60, %v1450_v52  ;;  %v7371_v52 = vld [vmem:[%s8665_s2 + $0xb0] sm:$0xff]  ;;  %v7376_v60 = vld [vmem:[%s8665_s2 + $0xb8] sm:$0xff] }
  0xfd   :  { %5504 = vmatpush3.bf16.msra.mxu0 %v5503_v0  ;;  %v1326_v46 = vand.u32 4294901760, %v1325_v9  ;;  %v8795_v61 = vand.u32 4294901760, %v7268_v62  ;;  %v8794_v23 = vand.u32 4294901760, %v7273_v22  ;;  %v1333_v13 = vand.u32 4294901760, %v1332_v20  ;;  %v9017_v9 = vld [vmem:[#allocation26_spill] sm:$0xff] }
  0xfe   :  { %5506 = vmatprep.subr.bf16.mxu0 %v5505_v47  ;;  %v8793_v0 = vand.u32 4294901760, %v7278_v21  ;;  %v1339_v37 = vsub.f32 %v7163_v34, %v1338_v2  ;;  %v1346_v25 = vsub.f32 %v7168_v14, %v1345_v5  ;;  %v5413_v29 = vpack.c.bf16 %v1445_v38, %v1438_v57  ;;  %v9019_v38 = vld [vmem:[#allocation32_spill] sm:$0xff] }
  0xff   :  { %5404 = vmatpush3.bf16.msra.mxu1 %v5403_v7  ;;  %v8792_v19 = vand.u32 4294901760, %v7287_v15  ;;  %v1452_v58 = vand.u32 4294901760, %v1451_v63  ;;  %v1459_v47 = vand.u32 4294901760, %v1458_v28  ;;  %v5515_v34 = vpack.c.bf16 %v1345_v5, %v1338_v2  ;;  %v7407_v5 = vld [vmem:[%s8665_s2 + $0x30] sm:$0xff] }
 0x100   :  { %5406 = vmatprep.subr.bf16.mxu1 %v5405_v17  ;;  %v2086_v14 = vsub.f32 %v7259_v33, %v8773_v27  ;;  %v7313_v45 = vpack.c.bf16 %v8794_v23, %v8795_v61  ;;  %v8791_v35 = vand.u32 4294901760, %v7298_v51  ;;  %v8790_v7 = vand.u32 4294901760, %v7303_v1  ;;  %v7498_v27 = vld [vmem:[%s8665_s2 + $0x58] sm:$0xff]  ;;  %v9040_v23 = vld [vmem:[#allocation3_spill] sm:$0xff] }
 0x101   :  { %5508 = vmatpush3.bf16.msra.mxu0 %v5507_v42  ;;  %v5415_v59 = vpack.c.bf16 %v1333_v13, %v1326_v46  ;;  %v1340_v39 = vand.u32 4294901760, %v1339_v37  ;;  %v1347_v32 = vand.u32 4294901760, %v1346_v25  ;;  %v7341_v48 = vpack.c.bf16 %v8792_v19, %v8793_v0  ;;  %v7422_v46 = vld [vmem:[%s8665_s2 + $0xc8] sm:$0xff]  ;;  %v9021_v13 = vld [vmem:[#allocation20_spill] sm:$0xff] }
 0x102   :  { %5510 = vmatprep.subr.bf16.mxu0 %v5509_v8  ;;  %9014 = vst [vmem:[#allocation11_spill] sm:$0xff] %v7313_v45  ;;  %v5417_v43 = vpack.c.bf16 %v1459_v47, %v1452_v58  ;;  %v8787_v44 = vand.u32 4294901760, %v7320_v41  ;;  %v8784_v17 = vand.u32 4294901760, %v7325_v26  ;;  %v48_v31 = vsel %vm44_vm0, %v6875_v6, %v9006_v11  ;;  %v7361_v8 = vld [vmem:[%s8665_s2 + $0x20] sm:$0xff]  ;;  %v7366_v6 = vld [vmem:[%s8665_s2 + $0x28] sm:$0xff] }
 0x103   :  { %5408 = vmatpush3.bf16.msra.mxu1 %v5407_v50  ;;  %9015 = vst [vmem:[#allocation12_spill] sm:$0xff] %v7341_v48  ;;  %v2087_v12 = vand.u32 4294901760, %v2086_v14  ;;  %v7354_v42 = vpack.c.bf16 %v8790_v7, %v8791_v35  ;;  %v8783_v56 = vand.u32 4294901760, %v7330_v54  ;;  %v8782_v18 = vand.u32 4294901760, %v7335_v55  ;;  %v5986_v50 = vld [vmem:[%s8664_s0] sm:$0xff]  ;;  %v9023_v47 = vld [vmem:[#allocation15_spill] sm:$0xff] }
 0x104   :  { %5410 = vmatprep.subr.bf16.mxu1 %v5409_v16  ;;  %v5419_v11 = vpack.c.bf16 %v1347_v32, %v1340_v39  ;;  %v7387_v16 = vpack.c.bf16 %v8784_v17, %v8787_v44  ;;  %v8781_v20 = vand.u32 4294901760, %v7361_v8  ;;  %v8780_v57 = vand.u32 4294901760, %v7366_v6  ;;  %v7451_v32 = vld [vmem:[%s8665_s2 + $0x40] sm:$0xff]  ;;  %v9037_v7 = vld [vmem:[#allocation25_spill] sm:$0xff] }
 0x105   :  { %5512 = vmatpush3.bf16.msra.mxu0 %v5511_v36  ;;  %9016 = vst [vmem:[#allocation13_spill] sm:$0xff] %v7354_v42  ;;  %v49_v36 = vmax.f32 %v5986_v50, %v48_v31  ;;  %v81_v63 = vsel %vm77_vm1, %v9019_v38, %v9010_v4  ;;  %v7400_v28 = vpack.c.bf16 %v8782_v18, %v8783_v56  ;;  %v8778_v2 = vand.u32 4294901760, %v7376_v60  ;;  %v7412_v4 = vld [vmem:[%s8665_s2 + $0x38] sm:$0xff]  ;;  %v9028_v50 = vld [vmem:[#allocation22_spill] sm:$0xff] }
 0x106   :  { %5514 = vmatprep.subr.bf16.mxu0 %v5513_v53  ;;  %9018 = vst [vmem:[#allocation14_spill] sm:$0xff] %v7387_v16  ;;  %v7417_v53 = vld [vmem:[%s8665_s2 + $0xc0] sm:$0xff]  ;;  %v7430_v25 = vpack.c.bf16 %v8780_v57, %v8781_v20  ;;  %v8774_v58 = vand.u32 4294901760, %v7412_v4  ;;  %v8775_v39 = vand.u32 4294901760, %v7422_v46  ;;  %v8798_v20 = vand.u32 4294901760, %v7498_v27 }
 0x107   :  { %5412 = vmatpush3.bf16.msra.mxu1 %v5411_v3  ;;  %9020 = vst [vmem:[#allocation5_spill] sm:$0xff] %v7400_v28  ;;  %v8779_v3 = vand.u32 4294901760, %v7371_v52  ;;  %v82_v37 = vmax.f32 %v49_v36, %v81_v63  ;;  %v8786_v63 = vand.u32 4294901760, %v7451_v32  ;;  %v9036_v44 = vld [vmem:[#allocation2_spill] sm:$0xff]  ;;  %v9046_v0 = vand.u32 4294901760, %v7273_v22 }
 0x108   :  { %5414 = vmatprep.subr.bf16.mxu1 %v5413_v29  ;;  %9022 = vst [vmem:[#allocation8_spill] sm:$0xff] %v7430_v25  ;;  %v8777_v29 = vand.u32 4294901760, %v7407_v5 }
 0x109   :  { %5516 = vmatpush3.bf16.msra.mxu0 %v5515_v34  ;;  %v114_v34 = vsel %vm110_vm2, %v9023_v47, %v9012_v24  ;;  %v7444_v14 = vpack.c.bf16 %v8778_v2, %v8779_v3  ;;  %v9025_v24 = vld [vmem:[#allocation21_spill] sm:$0xff]  ;;  %v8785_v47 = vand.u32 4294901760, %v7456_v40 }
 0x10a   :  { %5550 = vmatprep.subr.bf16.mxu0 %v7313_v45  ;;  %v115_v36 = vmax.f32 %v82_v37, %v114_v34  ;;  %v7477_v38 = vpack.c.bf16 %v8774_v58, %v8777_v29  ;;  %v9031_v58 = vld [vmem:[#allocation23_spill] sm:$0xff]  ;;  %v9032_v29 = vld [vmem:[#allocation24_spill] sm:$0xff] }
 0x10b   :  { %5416 = vmatpush3.bf16.msra.mxu1 %v5415_v59  ;;  %9024 = vst [vmem:[#allocation17_spill] sm:$0xff] %v7444_v14  ;;  %v8776_v59 = vand.u32 4294901760, %v7417_v53  ;;  %v7519_v3 = vpack.c.bf16 %v8785_v47, %v8786_v63  ;;  %v7535_v47 = vld [vmem:[%s8665_s2 + $0x60] sm:$0xff]  ;;  %v7540_v63 = vld [vmem:[%s8665_s2 + $0x68] sm:$0xff] }
 0x10c   :  { %1878 = vmatmul.mubr.f32.vlgmr.msra.gmra.mrb[8].mxu0 %v9017_v9  ;;  %5418 = vmatprep.subr.bf16.mxu1 %v5417_v43  ;;  %v9026_v43 = vld [vmem:[#allocation18_spill] sm:$0xff]  ;;  %9029 = vst [vmem:[#allocation16_spill] sm:$0xff] %v7477_v38  ;;  %v7512_v2 = vand.u32 4294901760, %v115_v36 }
 0x10d   :  { %5552 = vmatpush3.bf16.msra.mxu0 %v7341_v48  ;;  %2088 = vmatprep.mubr.f32.mxu0 %v2087_v12  ;;  %v9027_v31 = vand.u32 4294901760, %v9026_v43  ;;  %v7464_v12 = vld [vmem:[%s8665_s2 + $0xd0] sm:$0xff]  ;;  %v7486_v43 = vpack.c.bf16 %v8775_v39, %v8776_v59  ;;  %v7504_v39 = vld [vmem:[%s8665_s2 + $0xe0] sm:$0xff]  ;;  %v7509_v59 = vld [vmem:[%s8665_s2 + $0xe8] sm:$0xff]  ;;  %9034 = vst [vmem:[#allocation33_spill] sm:$0xff] %v7519_v3 }
 0x10e   :  { %5554 = vmatprep.subr.bf16.mxu0 %v7354_v42  ;;  %v8789_v37 = vand.u32 4294901760, %v7464_v12  ;;  %9033 = vst [vmem:[#allocation19_spill] sm:$0xff] %v7512_v2  ;;  %v8801_v56 = vand.u32 4294901760, %v7504_v39  ;;  %v8800_v17 = vand.u32 4294901760, %v7509_v59  ;;  %v7555_v35 = vsub.f32 %v115_v36, %v7512_v2 }
 0x10f   :  { %5420 = vmatpush3.bf16.msra.mxu1 %v5419_v11  ;;  %v7469_v11 = vld [vmem:[%s8665_s2 + $0xd8] sm:$0xff]  ;;  %9030 = vst [vmem:[#allocation30_spill] sm:$0xff] %v7486_v43 }
 0x110   :  { %5454 = vmatprep.subr.bf16.mxu1 %v9021_v13  ;;  %v8788_v34 = vand.u32 4294901760, %v7469_v11  ;;  %v7571_v36 = vpack.c.bf16 %v8800_v17, %v8801_v56  ;;  %v9041_v17 = vld [vmem:[#allocation4_spill] sm:$0xff]  ;;  %v9042_v56 = vand.u32 4294901760, %v7535_v47 }
 0x111   :  { %5556 = vmatpush3.bf16.msra.mxu0 %v7387_v16 }
 0x112   :  { %1464 = vmatmul.mubr.f32.vlgmr.msra.gmra.mrb[8].mxu1 %v9017_v9  ;;  %5558 = vmatprep.subr.bf16.mxu0 %v7400_v28  ;;  %v7528_v18 = vpack.c.bf16 %v8788_v34, %v8789_v37  ;;  %v7546_v34 = vld [vmem:[%s8665_s2 + $0xf0] sm:$0xff]  ;;  %v7551_v37 = vld [vmem:[%s8665_s2 + $0xf8] sm:$0xff]  ;;  %9039 = vst [vmem:[#allocation20_spill] sm:$0xff] %v7571_v36  ;;  %v9053_v28 = vand.u32 4294901760, %v7278_v21 }
 0x113   :  { %5456 = vmatpush3.bf16.msra.mxu1 %v9025_v24  ;;  %1706 = vmatprep.mubr.f32.mxu1 %v9027_v31  ;;  %v7493_v31 = vld [vmem:[%s8665_s2 + $0x50] sm:$0xff] }
 0x114   :  { %5458 = vmatprep.subr.bf16.mxu1 %v9028_v50  ;;  %v8799_v57 = vand.u32 4294901760, %v7493_v31  ;;  %9035 = vst [vmem:[#allocation26_spill] sm:$0xff] %v7528_v18 }
 0x115   :  { %5560 = vmatpush3.bf16.msra.mxu0 %v7430_v25  ;;  %v7605_v25 = vsub.f32 %v7273_v22, %v9046_v0  ;;  %v7622_v22 = vsub.f32 %v7278_v21, %v9053_v28  ;;  %v9054_v0 = vand.u32 4294901760, %v7287_v15  ;;  %v9059_v21 = vand.u32 4294901760, %v7303_v1 }
 0x116   :  { %5562 = vmatprep.subr.bf16.mxu0 %v7444_v14  ;;  %v7562_v19 = vpack.c.bf16 %v8798_v20, %v8799_v57  ;;  %v7578_v20 = vld [vmem:[%s8665_s2 + $0x70] sm:$0xff]  ;;  %v7583_v57 = vld [vmem:[%s8665_s2 + $0x78] sm:$0xff] }
 0x117   :  { %5460 = vmatpush3.bf16.msra.mxu1 %v9031_v58  ;;  %v7644_v28 = vsub.f32 %v7303_v1, %v9059_v21 }
 0x118   :  { %5462 = vmatprep.subr.bf16.mxu1 %v9032_v29  ;;  %9038 = vst [vmem:[#allocation32_spill] sm:$0xff] %v7562_v19 }
 0x119   :  { %5564 = vmatpush3.bf16.msra.mxu0 %v7477_v38  ;;  %v9045_v38 = vand.u32 4294901760, %v7268_v62 }
 0x11a   :  { %5566 = vmatprep.subr.bf16.mxu0 %v7486_v43  ;;  %v9051_v43 = vld [vmem:[#allocation27_spill] sm:$0xff] }
 0x11b   :  { %5464 = vmatpush3.bf16.msra.mxu1 %v9036_v44  ;;  %v7600_v14 = vsub.f32 %v7268_v62, %v9045_v38  ;;  %v9052_v62 = vand.u32 4294901760, %v7555_v35 }
 0x11c   :  { %5466 = vmatprep.subr.bf16.mxu1 %v9037_v7 }
 0x11d   :  { %5568 = vmatpush3.bf16.msra.mxu0 %v7519_v3  ;;  %v9043_v3 = vand.u32 4294901760, %v7540_v63  ;;  %v2092_v38 = vsub.f32 %v7555_v35, %v9052_v62  ;;  %v9058_v62 = vand.u32 4294901760, %v7298_v51 }
 0x11e   :  { %5570 = vmatprep.subr.bf16.mxu0 %v7528_v18  ;;  %v9050_v18 = vld [vmem:[#allocation6_spill] sm:$0xff] }
 0x11f   :  { %5468 = vmatpush3.bf16.msra.mxu1 %v9040_v23  ;;  %v7593_v61 = vpack.c.bf16 %v9043_v3, %v9042_v56  ;;  %v9048_v56 = vand.u32 4294901760, %v7551_v37  ;;  %v7639_v42 = vsub.f32 %v7298_v51, %v9058_v62  ;;  %v9063_v62 = vand.u32 4294901760, %v7325_v26 }
 0x120   :  { %5470 = vmatprep.subr.bf16.mxu1 %v9041_v17 }
 0x121   :  { %5572 = vmatpush3.bf16.msra.mxu0 %v7562_v19  ;;  %9044 = vst [vmem:[#allocation15_spill] sm:$0xff] %v7593_v61  ;;  %v9047_v19 = vand.u32 4294901760, %v7546_v34  ;;  %v7659_v1 = vsub.f32 %v7325_v26, %v9063_v62  ;;  %v5617_v26 = vpack.c.bf16 %v7644_v28, %v7639_v42  ;;  %v9067_v62 = vld [vmem:[#allocation29_spill] sm:$0xff] }
 0x122   :  { %5574 = vmatprep.subr.bf16.mxu0 %v7571_v36  ;;  %v7627_v36 = vsub.f32 %v7287_v15, %v9054_v0  ;;  %v5613_v15 = vpack.c.bf16 %v7605_v25, %v7600_v14  ;;  %v9060_v0 = vld [vmem:[#allocation7_spill] sm:$0xff] }
 0x123   :  { %v7612_v3 = vpack.c.bf16 %v9048_v56, %v9047_v19  ;;  %5472 = vmatpush3.bf16.msra.mxu1 %v9050_v18  ;;  %v9055_v19 = vand.u32 4294901760, %v7578_v20  ;;  %v9056_v56 = vand.u32 4294901760, %v7583_v57 }
 0x124   :  { %5474 = vmatprep.subr.bf16.mxu1 %v9051_v43  ;;  %v5615_v21 = vpack.c.bf16 %v7627_v36, %v7622_v22 }
 0x125   :  { %9049 = vst [vmem:[#allocation21_spill] sm:$0xff] %v7612_v3  ;;  %5576 = vmatpush3.bf16.msra.mxu0 %v7593_v61  ;;  %v7634_v16 = vpack.c.bf16 %v9056_v56, %v9055_v19  ;;  %v9061_v61 = vld [vmem:[#allocation28_spill] sm:$0xff]  ;;  %v2093_v19 = vand.u32 4294901760, %v2092_v38  ;;  %v9062_v56 = vand.u32 4294901760, %v7320_v41  ;;  %v9065_v38 = vand.u32 4294901760, %v7335_v55 }
 0x126   :  { %5578 = vmatprep.subr.bf16.mxu0 %v7612_v3  ;;  %v9064_v3 = vand.u32 4294901760, %v7330_v54 }
 0x127   :  { %9057 = vst [vmem:[#allocation18_spill] sm:$0xff] %v7634_v16  ;;  %5476 = vmatpush3.bf16.msra.mxu1 %v9060_v0  ;;  %v7654_v51 = vsub.f32 %v7320_v41, %v9062_v56  ;;  %v7672_v41 = vsub.f32 %v7335_v55, %v9065_v38  ;;  %v9066_v56 = vld [vmem:[#allocation9_spill] sm:$0xff]  ;;  %v9071_v38 = vand.u32 4294901760, %v7376_v60 }
 0x128   :  { %5478 = vmatprep.subr.bf16.mxu1 %v9061_v61  ;;  %v7667_v48 = vsub.f32 %v7330_v54, %v9064_v3  ;;  %v9069_v54 = vand.u32 4294901760, %v7366_v6 }
 0x129   :  { %5580 = vmatpush3.bf16.msra.mxu0 %v7634_v16  ;;  %v9068_v16 = vand.u32 4294901760, %v7361_v8  ;;  %v5619_v55 = vpack.c.bf16 %v7659_v1, %v7654_v51 }
 0x12a   :  { %5614 = vmatprep.subr.bf16.mxu0 %v5613_v15  ;;  %v7686_v3 = vsub.f32 %v7366_v6, %v9069_v54  ;;  %v9070_v15 = vand.u32 4294901760, %v7371_v52  ;;  %v5621_v6 = vpack.c.bf16 %v7672_v41, %v7667_v48 }
 0x12b   :  { %5480 = vmatpush3.bf16.msra.mxu1 %v9066_v56  ;;  %v7681_v45 = vsub.f32 %v7361_v8, %v9068_v16  ;;  %v7699_v8 = vsub.f32 %v7376_v60, %v9071_v38  ;;  %v9072_v16 = vld [vmem:[#allocation31_spill] sm:$0xff] }
 0x12c   :  { %2094 = vmatmul.mubr.f32.vlgmr.msra.gmra.mrb[10].mxu0 %v2093_v19  ;;  %5482 = vmatprep.subr.bf16.mxu1 %v9067_v62  ;;  %v7694_v19 = vsub.f32 %v7371_v52, %v9070_v15  ;;  %v9074_v52 = vand.u32 4294901760, %v7412_v4 }
 0x12d   :  { %5616 = vmatpush3.bf16.msra.mxu0 %v5615_v21  ;;  %2461 = vmatprep.mubr.f32.mxu0 %v7259_v33  ;;  %v9073_v21 = vand.u32 4294901760, %v7407_v5  ;;  %v5623_v60 = vpack.c.bf16 %v7686_v3, %v7681_v45 }
 0x12e   :  { %5618 = vmatprep.subr.bf16.mxu0 %v5617_v26  ;;  %v7713_v15 = vsub.f32 %v7412_v4, %v9074_v52  ;;  %v9075_v26 = vand.u32 4294901760, %v7417_v53  ;;  %v5625_v4 = vpack.c.bf16 %v7699_v8, %v7694_v19 }
 0x12f   :  { %5484 = vmatpush3.bf16.msra.mxu1 %v9072_v16  ;;  %v7708_v54 = vsub.f32 %v7407_v5, %v9073_v21  ;;  %v9077_v5 = vand.u32 4294901760, %v9007_v10 }
 0x130   :  { %5518 = vmatprep.subr.bf16.mxu1 %v9021_v13  ;;  %v7720_v38 = vsub.f32 %v7417_v53, %v9075_v26  ;;  %v9076_v13 = vand.u32 4294901760, %v7422_v46  ;;  %v9078_v53 = vand.u32 4294901760, %v7451_v32  ;;  %v9084_v26 = vand.u32 4294901760, %v7504_v39 }
 0x131   :  { %5620 = vmatpush3.bf16.msra.mxu0 %v5619_v55 }
 0x132   :  { %v7725_v33 = vsub.f32 %v7422_v46, %v9076_v13  ;;  %1710 = vmatmul.mubr.f32.vlgmr.msra.gmra.mrb[10].mxu1 %v9077_v5  ;;  %5622 = vmatprep.subr.bf16.mxu0 %v5621_v6  ;;  %v7737_v55 = vsub.f32 %v7451_v32, %v9078_v53  ;;  %v9079_v46 = vand.u32 4294901760, %v7456_v40  ;;  %v5627_v6 = vpack.c.bf16 %v7713_v15, %v7708_v54 }
 0x133   :  { %5520 = vmatpush3.bf16.msra.mxu1 %v9025_v24  ;;  %1980 = vmatprep.mubr.f32.mxu1 %v9008_v49  ;;  %v9080_v24 = vand.u32 4294901760, %v7464_v12  ;;  %v9088_v53 = vand.u32 4294901760, %v7546_v34 }
 0x134   :  { %5522 = vmatprep.subr.bf16.mxu1 %v9028_v50  ;;  %v7742_v10 = vsub.f32 %v7456_v40, %v9079_v46  ;;  %v9081_v50 = vand.u32 4294901760, %v7469_v11  ;;  %v5629_v32 = vpack.c.bf16 %v7725_v33, %v7720_v38  ;;  %v9082_v40 = vand.u32 4294901760, %v7493_v31 }
 0x135   :  { %5624 = vmatpush3.bf16.msra.mxu0 %v5623_v60  ;;  %v7749_v49 = vsub.f32 %v7464_v12, %v9080_v24  ;;  %v9083_v12 = vand.u32 4294901760, %v7498_v27  ;;  %v9091_v24 = vand.u32 4294901760, %v7583_v57 }
 0x136   :  { %v7754_v21 = vsub.f32 %v7469_v11, %v9081_v50  ;;  %5626 = vmatprep.subr.bf16.mxu0 %v5625_v4  ;;  %v7763_v52 = vsub.f32 %v7493_v31, %v9082_v40  ;;  %v5631_v11 = vpack.c.bf16 %v7742_v10, %v7737_v55  ;;  %v2221_v50 = vand.u32 4294901760, %v7605_v25 }
 0x137   :  { %5524 = vmatpush3.bf16.msra.mxu1 %v9031_v58  ;;  %v7768_v60 = vsub.f32 %v7498_v27, %v9083_v12  ;;  %v7775_v58 = vsub.f32 %v7504_v39, %v9084_v26  ;;  %v9086_v27 = vand.u32 4294901760, %v7535_v47  ;;  %v9087_v39 = vand.u32 4294901760, %v7540_v63 }
 0x138   :  { %5526 = vmatprep.subr.bf16.mxu1 %v9032_v29  ;;  %v9085_v29 = vand.u32 4294901760, %v7509_v59  ;;  %v5633_v31 = vpack.c.bf16 %v7754_v21, %v7749_v49  ;;  %v2222_v40 = vsub.f32 %v7605_v25, %v2221_v50  ;;  %v2102_v12 = vand.u32 4294901760, %v7622_v22 }
 0x139   :  { %5628 = vmatpush3.bf16.msra.mxu0 %v5627_v6  ;;  %v7789_v5 = vsub.f32 %v7535_v47, %v9086_v27  ;;  %v7794_v4 = vsub.f32 %v7540_v63, %v9087_v39  ;;  %v9090_v63 = vand.u32 4294901760, %v7578_v20  ;;  %v2228_v26 = vand.u32 4294901760, %v7639_v42 }
 0x13a   :  { %v7780_v13 = vsub.f32 %v7509_v59, %v9085_v29  ;;  %5630 = vmatprep.subr.bf16.mxu0 %v5629_v32  ;;  %v5635_v59 = vpack.c.bf16 %v7768_v60, %v7763_v52  ;;  %v2235_v29 = vand.u32 4294901760, %v7644_v28  ;;  %v2123_v25 = vand.u32 4294901760, %v7659_v1 }
 0x13b   :  { %5528 = vmatpush3.bf16.msra.mxu1 %v9036_v44  ;;  %v7801_v44 = vsub.f32 %v7546_v34, %v9088_v53  ;;  %v7814_v6 = vsub.f32 %v7578_v20, %v9090_v63  ;;  %v7819_v34 = vsub.f32 %v7583_v57, %v9091_v24  ;;  %v2229_v39 = vsub.f32 %v7639_v42, %v2228_v26 }
 0x13c   :  { %5530 = vmatprep.subr.bf16.mxu1 %v9037_v7  ;;  %v9089_v7 = vand.u32 4294901760, %v7551_v37  ;;  %v5637_v47 = vpack.c.bf16 %v7780_v13, %v7775_v58  ;;  %v5681_v63 = vpack.c.bf16 %v2235_v29, %v2228_v26  ;;  %v2242_v24 = vand.u32 4294901760, %v7667_v48 }
 0x13d   :  { %5632 = vmatpush3.bf16.msra.mxu0 %v5631_v11  ;;  %v2109_v11 = vand.u32 4294901760, %v7627_v36  ;;  %v2130_v42 = vand.u32 4294901760, %v7681_v45 }
 0x13e   :  { %v7806_v46 = vsub.f32 %v7551_v37, %v9089_v7  ;;  %5634 = vmatprep.subr.bf16.mxu0 %v5633_v31  ;;  %v2214_v37 = vand.u32 4294901760, %v7600_v14  ;;  %v2103_v31 = vsub.f32 %v7622_v22, %v2102_v12  ;;  %v2124_v7 = vsub.f32 %v7659_v1, %v2123_v25 }
 0x13f   :  { %5532 = vmatpush3.bf16.msra.mxu1 %v9040_v23  ;;  %v5639_v23 = vpack.c.bf16 %v7794_v4, %v7789_v5  ;;  %v2110_v27 = vsub.f32 %v7627_v36, %v2109_v11  ;;  %v2249_v22 = vand.u32 4294901760, %v7672_v41 }
 0x140   :  { %5534 = vmatprep.subr.bf16.mxu1 %v9041_v17  ;;  %v5641_v20 = vpack.c.bf16 %v7806_v46, %v7801_v44  ;;  %v2215_v32 = vsub.f32 %v7600_v14, %v2214_v37  ;;  %v5643_v17 = vpack.c.bf16 %v7819_v34, %v7814_v6  ;;  %v5677_v57 = vpack.c.bf16 %v2221_v50, %v2214_v37 }
 0x141   :  { %5636 = vmatpush3.bf16.msra.mxu0 %v5635_v59  ;;  %v2116_v14 = vand.u32 4294901760, %v7654_v51  ;;  %v2236_v59 = vsub.f32 %v7644_v28, %v2235_v29  ;;  %v2104_v37 = vand.u32 4294901760, %v2103_v31  ;;  %v2137_v28 = vand.u32 4294901760, %v7686_v3 }
 0x142   :  { %5638 = vmatprep.subr.bf16.mxu0 %v5637_v47  ;;  %v5679_v47 = vpack.c.bf16 %v2109_v11, %v2102_v12  ;;  %v2250_v1 = vsub.f32 %v7672_v41, %v2249_v22  ;;  %v2230_v50 = vand.u32 4294901760, %v2229_v39  ;;  %v2131_v41 = vsub.f32 %v7681_v45, %v2130_v42 }
 0x143   :  { %5536 = vmatpush3.bf16.msra.mxu1 %v9050_v18  ;;  %v2216_v18 = vand.u32 4294901760, %v2215_v32  ;;  %v2117_v53 = vsub.f32 %v7654_v51, %v2116_v14  ;;  %v5683_v36 = vpack.c.bf16 %v2123_v25, %v2116_v14  ;;  %v2243_v51 = vsub.f32 %v7667_v48, %v2242_v24 }
 0x144   :  { %5538 = vmatprep.subr.bf16.mxu1 %v9051_v43  ;;  %v2223_v43 = vand.u32 4294901760, %v2222_v40  ;;  %v2125_v32 = vand.u32 4294901760, %v2124_v7  ;;  %v2256_v40 = vand.u32 4294901760, %v7694_v19  ;;  %v5685_v48 = vpack.c.bf16 %v2249_v22, %v2242_v24 }
 0x145   :  { %5640 = vmatpush3.bf16.msra.mxu0 %v5639_v23  ;;  %v2237_v23 = vand.u32 4294901760, %v2236_v59  ;;  %v2244_v11 = vand.u32 4294901760, %v2243_v51  ;;  %v2251_v26 = vand.u32 4294901760, %v2250_v1  ;;  %v5687_v14 = vpack.c.bf16 %v2137_v28, %v2130_v42 }
 0x146   :  { %5642 = vmatprep.subr.bf16.mxu0 %v5641_v20  ;;  %v2118_v20 = vand.u32 4294901760, %v2117_v53  ;;  %v2257_v29 = vsub.f32 %v7694_v19, %v2256_v40  ;;  %v2270_v19 = vand.u32 4294901760, %v7720_v38  ;;  %v2277_v59 = vand.u32 4294901760, %v7725_v33 }
 0x147   :  { %5540 = vmatpush3.bf16.msra.mxu1 %v9060_v0  ;;  %v5581_v0 = vpack.c.bf16 %v2223_v43, %v2216_v18  ;;  %v5585_v25 = vpack.c.bf16 %v2237_v23, %v2230_v50  ;;  %v5589_v53 = vpack.c.bf16 %v2251_v26, %v2244_v11  ;;  %v2165_v7 = vand.u32 4294901760, %v7742_v10 }
 0x148   :  { %5542 = vmatprep.subr.bf16.mxu1 %v9061_v61  ;;  %v2111_v61 = vand.u32 4294901760, %v2110_v27  ;;  %v5587_v18 = vpack.c.bf16 %v2125_v32, %v2118_v20 }
 0x149   :  { %5644 = vmatpush3.bf16.msra.mxu0 %v5643_v17  ;;  %v2144_v17 = vand.u32 4294901760, %v7708_v54  ;;  %v2166_v51 = vsub.f32 %v7742_v10, %v2165_v7  ;;  %v2298_v10 = vand.u32 4294901760, %v7775_v58 }
 0x14a   :  { %5678 = vmatprep.subr.bf16.mxu0 %v5677_v57  ;;  %v2151_v57 = vand.u32 4294901760, %v7713_v15  ;;  %v5583_v12 = vpack.c.bf16 %v2111_v61, %v2104_v37  ;;  %v9092_v37 = vld [vmem:[#allocation35_spill] sm:$0xff] }
 0x14b   :  { %5544 = vmatpush3.bf16.msra.mxu1 %v9066_v56  ;;  %v2263_v56 = vand.u32 4294901760, %v7699_v8  ;;  %v2145_v45 = vsub.f32 %v7708_v54, %v2144_v17  ;;  %v2258_v54 = vand.u32 4294901760, %v2257_v29  ;;  %v7881_v61 = vand.u32 4294901760, %v9092_v37 }
 0x14c   :  { %2464 = vmatmul.mubr.f32.vlgmr.msra.gmra.mrb[12].mxu0 %v7555_v35  ;;  %5546 = vmatprep.subr.bf16.mxu1 %v9067_v62  ;;  %v2138_v62 = vsub.f32 %v7686_v3, %v2137_v28  ;;  %v5691_v27 = vpack.c.bf16 %v2151_v57, %v2144_v17  ;;  %v2152_v3 = vsub.f32 %v7713_v15, %v2151_v57  ;;  %v2167_v57 = vand.u32 4294901760, %v2166_v51  ;;  %v7938_v51 = vld [vmem:[%s8665_s2 + $0x190] sm:$0xff] }
 0x14d   :  { %5680 = vmatpush3.bf16.msra.mxu0 %v5679_v47  ;;  %2738 = vmatprep.mubr.f32.mxu0 %v7250_v30  ;;  %v2264_v43 = vsub.f32 %v7699_v8, %v2263_v56  ;;  %v5689_v31 = vpack.c.bf16 %v2263_v56, %v2256_v40  ;;  %v2158_v8 = vand.u32 4294901760, %v7737_v55  ;;  %v2271_v47 = vsub.f32 %v7720_v38, %v2270_v19 }
 0x14e   :  { %5682 = vmatprep.subr.bf16.mxu0 %v5681_v63  ;;  %v2139_v39 = vand.u32 4294901760, %v2138_v62  ;;  %v2278_v63 = vsub.f32 %v7725_v33, %v2277_v59  ;;  %v2146_v24 = vand.u32 4294901760, %v2145_v45  ;;  %v2153_v22 = vand.u32 4294901760, %v2152_v3  ;;  %9093 = vst [vmem:[#allocation22_spill] sm:$0xff] %v7881_v61 }
 0x14f   :  { %5548 = vmatpush3.bf16.msra.mxu1 %v9072_v16  ;;  %v2132_v16 = vand.u32 4294901760, %v2131_v41  ;;  %v2265_v15 = vand.u32 4294901760, %v2264_v43  ;;  %v5693_v28 = vpack.c.bf16 %v2277_v59, %v2270_v19  ;;  %v5695_v1 = vpack.c.bf16 %v2165_v7, %v2158_v8  ;;  %v7907_v19 = vld [vmem:[%s8665_s2 + $0x180] sm:$0xff]  ;;  %v7912_v59 = vld [vmem:[%s8665_s2 + $0x188] sm:$0xff] }
 0x150   :  { %5582 = vmatprep.subr.bf16.mxu1 %v5581_v0  ;;  %v2159_v0 = vsub.f32 %v7737_v55, %v2158_v8  ;;  %v2172_v38 = vand.u32 4294901760, %v7763_v52  ;;  %v2179_v55 = vand.u32 4294901760, %v7768_v60  ;;  %v2272_v20 = vand.u32 4294901760, %v2271_v47 }
 0x151   :  { %5684 = vmatpush3.bf16.msra.mxu0 %v5683_v36  ;;  %v2291_v36 = vand.u32 4294901760, %v7754_v21  ;;  %v5591_v42 = vpack.c.bf16 %v2139_v39, %v2132_v16  ;;  %v5593_v23 = vpack.c.bf16 %v2265_v15, %v2258_v54  ;;  %v2279_v32 = vand.u32 4294901760, %v2278_v63 }
 0x152   :  { %1982 = vmatmul.mubr.f32.vlgmr.msra.gmra.mrb[12].mxu1 %v9017_v9  ;;  %5686 = vmatprep.subr.bf16.mxu0 %v5685_v48  ;;  %v2284_v9 = vand.u32 4294901760, %v7749_v49  ;;  %v5595_v40 = vpack.c.bf16 %v2153_v22, %v2146_v24  ;;  %v2160_v17 = vand.u32 4294901760, %v2159_v0  ;;  %v2305_v48 = vand.u32 4294901760, %v7780_v13 }
 0x153   :  { %5584 = vmatpush3.bf16.msra.mxu1 %v5583_v12  ;;  %2324 = vmatprep.mubr.f32.mxu1 %v7250_v30  ;;  %v2292_v50 = vsub.f32 %v7754_v21, %v2291_v36  ;;  %v2193_v21 = vand.u32 4294901760, %v7794_v4  ;;  %v2173_v12 = vsub.f32 %v7763_v52, %v2172_v38  ;;  %v2180_v11 = vsub.f32 %v7768_v60, %v2179_v55 }
 0x154   :  { %5586 = vmatprep.subr.bf16.mxu1 %v5585_v25  ;;  %v2285_v33 = vsub.f32 %v7749_v49, %v2284_v9  ;;  %v5697_v56 = vpack.c.bf16 %v2291_v36, %v2284_v9  ;;  %v2186_v49 = vand.u32 4294901760, %v7789_v5  ;;  %v5597_v26 = vpack.c.bf16 %v2279_v32, %v2272_v20 }
 0x155   :  { %5688 = vmatpush3.bf16.msra.mxu0 %v5687_v14  ;;  %v2293_v62 = vand.u32 4294901760, %v2292_v50  ;;  %v2299_v29 = vsub.f32 %v7775_v58, %v2298_v10  ;;  %v2306_v14 = vsub.f32 %v7780_v13, %v2305_v48  ;;  %v7898_v25 = vsub.f32 %v9092_v37, %v7881_v61 }
 0x156   :  { %5690 = vmatprep.subr.bf16.mxu0 %v5689_v31  ;;  %v2286_v41 = vand.u32 4294901760, %v2285_v33  ;;  %v2312_v43 = vand.u32 4294901760, %v7801_v44  ;;  %v2319_v31 = vand.u32 4294901760, %v7806_v46  ;;  %v5599_v52 = vpack.c.bf16 %v2167_v57, %v2160_v17  ;;  %v7963_v57 = vld [vmem:[%s8665_s2 + $0x118] sm:$0xff] }
 0x157   :  { %5588 = vmatpush3.bf16.msra.mxu1 %v5587_v18  ;;  %v5699_v18 = vpack.c.bf16 %v2179_v55, %v2172_v38  ;;  %v2187_v60 = vsub.f32 %v7789_v5, %v2186_v49  ;;  %v2194_v45 = vsub.f32 %v7794_v4, %v2193_v21  ;;  %v5703_v13 = vpack.c.bf16 %v2193_v21, %v2186_v49 }
 0x158   :  { %5590 = vmatprep.subr.bf16.mxu1 %v5589_v53  ;;  %v5601_v3 = vpack.c.bf16 %v2293_v62, %v2286_v41  ;;  %v2174_v16 = vand.u32 4294901760, %v2173_v12  ;;  %v2181_v39 = vand.u32 4294901760, %v2180_v11  ;;  %v2300_v5 = vand.u32 4294901760, %v2299_v29  ;;  %v7973_v62 = vld [vmem:[%s8665_s2 + $0x1a0] sm:$0xff]  ;;  %v7978_v12 = vld [vmem:[%s8665_s2 + $0x1a8] sm:$0xff] }
 0x159   :  { %5692 = vmatpush3.bf16.msra.mxu0 %v5691_v27  ;;  %v5701_v27 = vpack.c.bf16 %v2305_v48, %v2298_v10  ;;  %v2307_v4 = vand.u32 4294901760, %v2306_v14  ;;  %v2313_v8 = vsub.f32 %v7801_v44, %v2312_v43  ;;  %v2320_v7 = vsub.f32 %v7806_v46, %v2319_v31  ;;  %v7925_v44 = vld [vmem:[%s8665_s2 + $0x100] sm:$0xff]  ;;  %v7930_v46 = vld [vmem:[%s8665_s2 + $0x108] sm:$0xff]  ;;  %v7958_v10 = vld [vmem:[%s8665_s2 + $0x110] sm:$0xff] }
 0x15a   :  { %5694 = vmatprep.subr.bf16.mxu0 %v5693_v28  ;;  %v5705_v15 = vpack.c.bf16 %v2319_v31, %v2312_v43  ;;  %v2200_v9 = vand.u32 4294901760, %v7814_v6  ;;  %v2207_v47 = vand.u32 4294901760, %v7819_v34  ;;  %v2188_v63 = vand.u32 4294901760, %v2187_v60 }
 0x15b   :  { %5592 = vmatpush3.bf16.msra.mxu1 %v5591_v42  ;;  %v2195_v24 = vand.u32 4294901760, %v2194_v45  ;;  %v8855_v22 = vand.u32 4294901760, %v7907_v19  ;;  %v8854_v36 = vand.u32 4294901760, %v7912_v59  ;;  %v5603_v0 = vpack.c.bf16 %v2181_v39, %v2174_v16 }
 0x15c   :  { %5594 = vmatprep.subr.bf16.mxu1 %v5593_v23  ;;  %v8833_v37 = vand.u32 4294901760, %v7898_v25  ;;  %v2201_v42 = vsub.f32 %v7814_v6, %v2200_v9  ;;  %v2208_v28 = vsub.f32 %v7819_v34, %v2207_v47  ;;  %v5605_v38 = vpack.c.bf16 %v2307_v4, %v2300_v5 }
 0x15d   :  { %5696 = vmatpush3.bf16.msra.mxu0 %v5695_v1  ;;  %v7943_v1 = vld [vmem:[%s8665_s2 + $0x198] sm:$0xff]  ;;  %v2314_v33 = vand.u32 4294901760, %v2313_v8  ;;  %v2321_v50 = vand.u32 4294901760, %v2320_v7  ;;  %v5707_v55 = vpack.c.bf16 %v2207_v47, %v2200_v9  ;;  %v8853_v6 = vand.u32 4294901760, %v7925_v44  ;;  %v8039_v8 = vld [vmem:[%s8665_s2 + $0x130] sm:$0xff]  ;;  %v8054_v9 = vld [vmem:[%s8665_s2 + $0x1c8] sm:$0xff] }
 0x15e   :  { %5698 = vmatprep.subr.bf16.mxu0 %v5697_v56  ;;  %v8852_v34 = vand.u32 4294901760, %v7930_v46  ;;  %v5607_v32 = vpack.c.bf16 %v2195_v24, %v2188_v63  ;;  %v8849_v56 = vand.u32 4294901760, %v7938_v51  ;;  %v8848_v17 = vand.u32 4294901760, %v7943_v1  ;;  %v8044_v7 = vld [vmem:[%s8665_s2 + $0x138] sm:$0xff]  ;;  %v9099_v47 = vld [vmem:[#allocation11_spill] sm:$0xff] }
 0x15f   :  { %5596 = vmatpush3.bf16.msra.mxu1 %v5595_v40  ;;  %v4331_v58 = vpop.f32.mrb[0].mxu0  ;;  %v7951_v40 = vpack.c.bf16 %v8854_v36, %v8855_v22  ;;  %v2948_v49 = vsub.f32 %v7898_v25, %v8833_v37  ;;  %v2202_v21 = vand.u32 4294901760, %v2201_v42  ;;  %v2209_v41 = vand.u32 4294901760, %v2208_v28  ;;  %v8121_v37 = vld [vmem:[%s8665_s2 + $0x150] sm:$0xff] }
 0x160   :  { %v4332_v53 = vpop.f32.mrb[1].mxu0  ;;  %5598 = vmatprep.subr.bf16.mxu1 %v5597_v26  ;;  %v5609_v11 = vpack.c.bf16 %v2321_v50, %v2314_v33  ;;  %v7984_v26 = vpack.c.bf16 %v8852_v34, %v8853_v6  ;;  %v8845_v29 = vand.u32 4294901760, %v7958_v10  ;;  %v8844_v14 = vand.u32 4294901760, %v7963_v57  ;;  %v8079_v33 = vld [vmem:[%s8665_s2 + $0x140] sm:$0xff]  ;;  %v8084_v50 = vld [vmem:[%s8665_s2 + $0x148] sm:$0xff]  ;;  %v9115_v34 = vld [vmem:[#allocation17_spill] sm:$0xff] }
 0x161   :  { %v7916_v54 = vadd.f32 %v4332_v53, %v4331_v58  ;;  %5700 = vmatpush3.bf16.msra.mxu0 %v5699_v18  ;;  %9094 = vst [vmem:[#allocation23_spill] sm:$0xff] %v7951_v40  ;;  %v7993_v18 = vpack.c.bf16 %v8848_v17, %v8849_v56  ;;  %v8843_v43 = vand.u32 4294901760, %v7973_v62  ;;  %v8842_v31 = vand.u32 4294901760, %v7978_v12  ;;  %v8010_v58 = vld [vmem:[%s8665_s2 + $0x1b0] sm:$0xff]  ;;  %v8169_v17 = vld [vmem:[%s8665_s2 + $0x168] sm:$0xff] }
 0x162   :  { %5702 = vmatprep.subr.bf16.mxu0 %v5701_v27  ;;  %9095 = vst [vmem:[#allocation24_spill] sm:$0xff] %v7984_v26  ;;  %v8005_v27 = vld [vmem:[%s8665_s2 + $0x128] sm:$0xff]  ;;  %v2949_v60 = vand.u32 4294901760, %v2948_v49  ;;  %v5611_v45 = vpack.c.bf16 %v2209_v41, %v2202_v21  ;;  %v8839_v5 = vand.u32 4294901760, %v8010_v58  ;;  %v8835_v24 = vand.u32 4294901760, %v8039_v8  ;;  %v8097_v49 = vld [vmem:[%s8665_s2 + $0x1d8] sm:$0xff] }
 0x163   :  { %5600 = vmatpush3.bf16.msra.mxu1 %v5599_v52  ;;  %9096 = vst [vmem:[#allocation2_spill] sm:$0xff] %v7993_v18  ;;  %v8000_v52 = vld [vmem:[%s8665_s2 + $0x120] sm:$0xff]  ;;  %v8840_v39 = vand.u32 4294901760, %v8005_v27  ;;  %v8032_v53 = vpack.c.bf16 %v8842_v31, %v8843_v43  ;;  %v9105_v21 = vld [vmem:[#allocation13_spill] sm:$0xff]  ;;  %v9114_v56 = vld [vmem:[#allocation8_spill] sm:$0xff] }
 0x164   :  { %5602 = vmatprep.subr.bf16.mxu1 %v5601_v3  ;;  %v8023_v3 = vpack.c.bf16 %v8844_v14, %v8845_v29  ;;  %v8841_v16 = vand.u32 4294901760, %v8000_v52  ;;  %v9111_v31 = vld [vmem:[#allocation34_spill] sm:$0xff]  ;;  %v9120_v36 = vld [vmem:[#allocation16_spill] sm:$0xff] }
 0x165   :  { %5704 = vmatpush3.bf16.msra.mxu0 %v5703_v13  ;;  %v4261_v23 = vpop.f32.mrb[0].mxu1  ;;  %v8015_v13 = vld [vmem:[%s8665_s2 + $0x1b8] sm:$0xff]  ;;  %9098 = vst [vmem:[#allocation3_spill] sm:$0xff] %v8032_v53  ;;  %v8150_v43 = vand.u32 4294901760, %v9111_v31 }
 0x166   :  { %v4262_v20 = vpop.f32.mrb[1].mxu1  ;;  %5706 = vmatprep.subr.bf16.mxu0 %v5705_v15  ;;  %9097 = vst [vmem:[#allocation25_spill] sm:$0xff] %v8023_v3  ;;  %v8838_v4 = vand.u32 4294901760, %v8015_v13  ;;  %v8049_v15 = vld [vmem:[%s8665_s2 + $0x1c0] sm:$0xff]  ;;  %v8062_v63 = vpack.c.bf16 %v8840_v39, %v8841_v16  ;;  %v8863_v39 = vand.u32 4294901760, %v8121_v37 }
 0x167   :  { %v7965_v48 = vadd.f32 %v4262_v20, %v4261_v23  ;;  %5604 = vmatpush3.bf16.msra.mxu1 %v5603_v0  ;;  %v8834_v0 = vand.u32 4294901760, %v8044_v7  ;;  %v8837_v28 = vand.u32 4294901760, %v8049_v15  ;;  %v9102_v23 = vld [vmem:[#allocation12_spill] sm:$0xff]  ;;  %9112 = vst [vmem:[#allocation9_spill] sm:$0xff] %v8150_v43 }
 0x168   :  { %5606 = vmatprep.subr.bf16.mxu1 %v5605_v38  ;;  %9100 = vst [vmem:[#allocation4_spill] sm:$0xff] %v8062_v63  ;;  %v8072_v42 = vpack.c.bf16 %v8838_v4, %v8839_v5  ;;  %v8836_v38 = vand.u32 4294901760, %v8054_v9  ;;  %v9109_v4 = vld [vmem:[#allocation5_spill] sm:$0xff] }
 0x169   :  { %5708 = vmatpush3.bf16.msra.mxu0 %v5707_v55  ;;  %v9103_v55 = vld [vmem:[#allocation10_spill] sm:$0xff]  ;;  %v8105_v41 = vpack.c.bf16 %v8834_v0, %v8835_v24  ;;  %v8126_v0 = vld [vmem:[%s8665_s2 + $0x158] sm:$0xff] }
 0x16a   :  { %5742 = vmatprep.subr.bf16.mxu0 %v7951_v40  ;;  %9101 = vst [vmem:[#allocation6_spill] sm:$0xff] %v8072_v42  ;;  %v9104_v20 = vand.u32 4294901760, %v9103_v55  ;;  %v9108_v24 = vld [vmem:[#allocation14_spill] sm:$0xff]  ;;  %v8862_v16 = vand.u32 4294901760, %v8126_v0  ;;  %v9136_v40 = vand.u32 4294901760, %v7938_v51 }
 0x16b   :  { %5608 = vmatpush3.bf16.msra.mxu1 %v5607_v32  ;;  %v8092_v32 = vld [vmem:[%s8665_s2 + $0x1d0] sm:$0xff]  ;;  %9106 = vst [vmem:[#allocation27_spill] sm:$0xff] %v8105_v41 }
 0x16c   :  { %2740 = vmatmul.mubr.f32.vlgmr.msra.gmra.mrb[14].mxu0 %v7512_v2  ;;  %5610 = vmatprep.subr.bf16.mxu1 %v5609_v11  ;;  %v8847_v11 = vand.u32 4294901760, %v8079_v33  ;;  %v8851_v55 = vand.u32 4294901760, %v8092_v32  ;;  %v8188_v6 = vpack.c.bf16 %v8862_v16, %v8863_v39  ;;  %v8208_v39 = vld [vmem:[%s8665_s2 + $0x170] sm:$0xff] }
 0x16d   :  { %5744 = vmatpush3.bf16.msra.mxu0 %v7984_v26  ;;  %2950 = vmatprep.mubr.f32.mxu0 %v2949_v60  ;;  %v8846_v60 = vand.u32 4294901760, %v8084_v50 }
 0x16e   :  { %5746 = vmatprep.subr.bf16.mxu0 %v7993_v18  ;;  %9116 = vst [vmem:[#allocation31_spill] sm:$0xff] %v8188_v6  ;;  %v9125_v18 = vand.u32 4294901760, %v7907_v19 }
 0x16f   :  { %5612 = vmatpush3.bf16.msra.mxu1 %v5611_v45  ;;  %v8114_v45 = vpack.c.bf16 %v8836_v38, %v8837_v28  ;;  %v8132_v38 = vld [vmem:[%s8665_s2 + $0x1e0] sm:$0xff]  ;;  %v8137_v28 = vld [vmem:[%s8665_s2 + $0x1e8] sm:$0xff]  ;;  %v8145_v5 = vpack.c.bf16 %v8846_v60, %v8847_v11  ;;  %v8194_v60 = vsub.f32 %v9111_v31, %v8150_v43  ;;  %v8213_v31 = vld [vmem:[%s8665_s2 + $0x178] sm:$0xff]  ;;  %v8268_v43 = vsub.f32 %v7938_v51, %v9136_v40 }
 0x170   :  { %5646 = vmatprep.subr.bf16.mxu1 %v9099_v47  ;;  %v8866_v29 = vand.u32 4294901760, %v8132_v38  ;;  %v8164_v11 = vld [vmem:[%s8665_s2 + $0x160] sm:$0xff]  ;;  %v8232_v26 = vsub.f32 %v7907_v19, %v9125_v18  ;;  %v9132_v19 = vand.u32 4294901760, %v7925_v44  ;;  %v9140_v51 = vld [vmem:[#allocation20_spill] sm:$0xff]  ;;  %v9141_v40 = vand.u32 4294901760, %v7958_v10 }
 0x171   :  { %5748 = vmatpush3.bf16.msra.mxu0 %v8023_v3  ;;  %9107 = vst [vmem:[#allocation7_spill] sm:$0xff] %v8114_v45  ;;  %9110 = vst [vmem:[#allocation28_spill] sm:$0xff] %v8145_v5  ;;  %v9122_v16 = vand.u32 4294901760, %v8164_v11  ;;  %v9131_v3 = vld [vmem:[#allocation26_spill] sm:$0xff] }
 0x172   :  { %2326 = vmatmul.mubr.f32.vlgmr.msra.gmra.mrb[14].mxu1 %v7512_v2  ;;  %5750 = vmatprep.subr.bf16.mxu0 %v8032_v53  ;;  %9117 = vst [vmem:[#allocation35_spill] sm:$0xff] %v8194_v60  ;;  %v9130_v53 = vld [vmem:[#allocation33_spill] sm:$0xff]  ;;  %v8251_v18 = vsub.f32 %v7925_v44, %v9132_v19  ;;  %v9137_v44 = vand.u32 4294901760, %v7943_v1  ;;  %v9139_v2 = vld [vmem:[#allocation32_spill] sm:$0xff] }
 0x173   :  { %5648 = vmatpush3.bf16.msra.mxu1 %v9102_v23  ;;  %2568 = vmatprep.mubr.f32.mxu1 %v9104_v20  ;;  %v8850_v20 = vand.u32 4294901760, %v8097_v49 }
 0x174   :  { %5650 = vmatprep.subr.bf16.mxu1 %v9105_v21  ;;  %v8273_v19 = vsub.f32 %v7943_v1, %v9137_v44  ;;  %v8286_v1 = vsub.f32 %v7958_v10, %v9141_v40  ;;  %v9142_v44 = vand.u32 4294901760, %v7963_v57  ;;  %v9144_v10 = vand.u32 4294901760, %v7978_v12 }
 0x175   :  { %5752 = vmatpush3.bf16.msra.mxu0 %v8062_v63  ;;  %v8157_v14 = vpack.c.bf16 %v8850_v20, %v8851_v55  ;;  %v8175_v20 = vld [vmem:[%s8665_s2 + $0x1f0] sm:$0xff]  ;;  %v8180_v55 = vld [vmem:[%s8665_s2 + $0x1f8] sm:$0xff] }
 0x176   :  { %5754 = vmatprep.subr.bf16.mxu0 %v8072_v42  ;;  %v8305_v40 = vsub.f32 %v7978_v12, %v9144_v10  ;;  %v9148_v12 = vand.u32 4294901760, %v8005_v27  ;;  %v9152_v10 = vand.u32 4294901760, %v8039_v8 }
 0x177   :  { %5652 = vmatpush3.bf16.msra.mxu1 %v9108_v24  ;;  %9113 = vst [vmem:[#allocation29_spill] sm:$0xff] %v8157_v14 }
 0x178   :  { %5654 = vmatprep.subr.bf16.mxu1 %v9109_v4 }
 0x179   :  { %5756 = vmatpush3.bf16.msra.mxu0 %v8105_v41  ;;  %v9123_v41 = vand.u32 4294901760, %v8169_v17 }
 0x17a   :  { %5758 = vmatprep.subr.bf16.mxu0 %v8114_v45 }
 0x17b   :  { %5656 = vmatpush3.bf16.msra.mxu1 %v9114_v56  ;;  %v8224_v42 = vpack.c.bf16 %v9123_v41, %v9122_v16  ;;  %v9127_v16 = vand.u32 4294901760, %v8175_v20  ;;  %v9128_v41 = vand.u32 4294901760, %v8180_v55 }
 0x17c   :  { %5658 = vmatprep.subr.bf16.mxu1 %v9115_v34 }
 0x17d   :  { %5760 = vmatpush3.bf16.msra.mxu0 %v8145_v5  ;;  %v9118_v5 = vand.u32 4294901760, %v8137_v28  ;;  %9124 = vst [vmem:[#allocation12_spill] sm:$0xff] %v8224_v42  ;;  %v8244_v63 = vpack.c.bf16 %v9128_v41, %v9127_v16  ;;  %v9134_v16 = vand.u32 4294901760, %v8208_v39  ;;  %v9135_v41 = vand.u32 4294901760, %v8213_v31 }
 0x17e   :  { %5762 = vmatprep.subr.bf16.mxu0 %v8157_v14 }
 0x17f   :  { %v8201_v45 = vpack.c.bf16 %v9118_v5, %v8866_v29  ;;  %v4401_v22 = vpop.f32.mrb[2].mxu0  ;;  %5660 = vmatpush3.bf16.msra.mxu1 %v9120_v36  ;;  %v9121_v5 = vld [vmem:[#allocation30_spill] sm:$0xff]  ;;  %9129 = vst [vmem:[#allocation10_spill] sm:$0xff] %v8244_v63 }
 0x180   :  { %v4402_v14 = vpop.f32.mrb[3].mxu0  ;;  %5662 = vmatprep.subr.bf16.mxu1 %v9121_v5 }
 0x181   :  { %9119 = vst [vmem:[#allocation11_spill] sm:$0xff] %v8201_v45  ;;  %v8217_v29 = vadd.f32 %v4402_v14, %v4401_v22  ;;  %5764 = vmatpush3.bf16.msra.mxu0 %v8188_v6  ;;  %v9126_v22 = vand.u32 4294901760, %v7912_v59  ;;  %v8263_v6 = vpack.c.bf16 %v9135_v41, %v9134_v16 }
 0x182   :  { %5766 = vmatprep.subr.bf16.mxu0 %v8201_v45 }
 0x183   :  { %v8237_v14 = vsub.f32 %v7912_v59, %v9126_v22  ;;  %5664 = vmatpush3.bf16.msra.mxu1 %v9130_v53  ;;  %v9133_v59 = vand.u32 4294901760, %v7930_v46 }
 0x184   :  { %5666 = vmatprep.subr.bf16.mxu1 %v9131_v3 }
 0x185   :  { %v8256_v22 = vsub.f32 %v7930_v46, %v9133_v59  ;;  %v4296_v45 = vpop.f32.mrb[2].mxu1  ;;  %5768 = vmatpush3.bf16.msra.mxu0 %v8224_v42  ;;  %v9138_v59 = vand.u32 4294901760, %v8194_v60  ;;  %v5805_v16 = vpack.c.bf16 %v8237_v14, %v8232_v26 }
 0x186   :  { %v4297_v46 = vpop.f32.mrb[3].mxu1  ;;  %5770 = vmatprep.subr.bf16.mxu0 %v8244_v63  ;;  %v8291_v63 = vsub.f32 %v7963_v57, %v9142_v44  ;;  %v5809_v57 = vpack.c.bf16 %v8273_v19, %v8268_v43  ;;  %v9146_v44 = vld [vmem:[#allocation21_spill] sm:$0xff] }
 0x187   :  { %v2954_v42 = vsub.f32 %v8194_v60, %v9138_v59  ;;  %v4298_v41 = vadd.f32 %v4297_v46, %v4296_v45  ;;  %5668 = vmatpush3.bf16.msra.mxu1 %v9139_v2  ;;  %v5807_v45 = vpack.c.bf16 %v8256_v22, %v8251_v18  ;;  %v9143_v46 = vand.u32 4294901760, %v7973_v62 }
 0x188   :  { %5670 = vmatprep.subr.bf16.mxu1 %v9140_v51 }
 0x189   :  { %v604_v59 = vadd.f32 %v4298_v41, %v7965_v48  ;;  %5772 = vmatpush3.bf16.msra.mxu0 %v8263_v6  ;;  %v8300_v61 = vsub.f32 %v7973_v62, %v9143_v46  ;;  %v2955_v60 = vand.u32 4294901760, %v2954_v42  ;;  %v9145_v48 = vld [vmem:[#allocation15_spill] sm:$0xff]  ;;  %v9147_v62 = vand.u32 4294901760, %v8000_v52 }
 0x18a   :  { %5806 = vmatprep.subr.bf16.mxu0 %v5805_v16  ;;  %v8322_v42 = vsub.f32 %v8005_v27, %v9148_v12 }
 0x18b   :  { %5672 = vmatpush3.bf16.msra.mxu1 %v9145_v48  ;;  %v8311_v41 = vadd.f32 %v7916_v54, %v604_v59  ;;  %v8317_v46 = vsub.f32 %v8000_v52, %v9147_v62  ;;  %v5811_v54 = vpack.c.bf16 %v8291_v63, %v8286_v1  ;;  %v9150_v59 = vand.u32 4294901760, %v8015_v13 }
 0x18c   :  { %2956 = vmatmul.mubr.f32.vlgmr.msra.gmra.mrb[16].mxu0 %v2955_v60  ;;  %5674 = vmatprep.subr.bf16.mxu1 %v9146_v44  ;;  %v9149_v60 = vand.u32 4294901760, %v8010_v58  ;;  %v5813_v27 = vpack.c.bf16 %v8305_v40, %v8300_v61  ;;  %v8344_v62 = vsub.f32 %v8039_v8, %v9152_v10  ;;  %v9156_v8 = vand.u32 4294901760, %v7555_v35 }
 0x18d   :  { %5808 = vmatpush3.bf16.msra.mxu0 %v5807_v45  ;;  %3323 = vmatprep.mubr.f32.mxu0 %v7898_v25  ;;  %v8335_v52 = vsub.f32 %v8015_v13, %v9150_v59  ;;  %v9151_v45 = vld [vmem:[#allocation18_spill] sm:$0xff]  ;;  %v5815_v13 = vpack.c.bf16 %v8322_v42, %v8317_v46 }
 0x18e   :  { %v8330_v16 = vsub.f32 %v8010_v58, %v9149_v60  ;;  %5810 = vmatprep.subr.bf16.mxu0 %v5809_v57  ;;  %v9153_v58 = vand.u32 4294901760, %v8044_v7  ;;  %v9154_v57 = vand.u32 4294901760, %v8049_v15 }
 0x18f   :  { %5676 = vmatpush3.bf16.msra.mxu1 %v9151_v45 }
 0x190   :  { %5710 = vmatprep.subr.bf16.mxu1 %v9099_v47  ;;  %v8349_v12 = vsub.f32 %v8044_v7, %v9153_v58  ;;  %v8356_v60 = vsub.f32 %v8049_v15, %v9154_v57  ;;  %v9155_v47 = vand.u32 4294901760, %v8054_v9  ;;  %v5817_v7 = vpack.c.bf16 %v8335_v52, %v8330_v16 }
 0x191   :  { %5812 = vmatpush3.bf16.msra.mxu0 %v5811_v54  ;;  %v9157_v15 = vand.u32 4294901760, %v8079_v33  ;;  %v9163_v57 = vand.u32 4294901760, %v8132_v38 }
 0x192   :  { %v8361_v59 = vsub.f32 %v8054_v9, %v9155_v47  ;;  %2572 = vmatmul.mubr.f32.vlgmr.msra.gmra.mrb[16].mxu1 %v9156_v8  ;;  %5814 = vmatprep.subr.bf16.mxu0 %v5813_v27  ;;  %v9158_v9 = vand.u32 4294901760, %v8084_v50  ;;  %v5819_v27 = vpack.c.bf16 %v8349_v12, %v8344_v62 }
 0x193   :  { %5712 = vmatpush3.bf16.msra.mxu1 %v9102_v23  ;;  %2842 = vmatprep.mubr.f32.mxu1 %v7250_v30  ;;  %v8373_v54 = vsub.f32 %v8079_v33, %v9157_v15  ;;  %v9159_v23 = vand.u32 4294901760, %v8092_v32  ;;  %v9167_v15 = vand.u32 4294901760, %v8175_v20 }
 0x194   :  { %5714 = vmatprep.subr.bf16.mxu1 %v9105_v21  ;;  %v8378_v35 = vsub.f32 %v8084_v50, %v9158_v9  ;;  %v9160_v21 = vand.u32 4294901760, %v8097_v49  ;;  %v5821_v33 = vpack.c.bf16 %v8361_v59, %v8356_v60  ;;  %v9161_v50 = vand.u32 4294901760, %v8121_v37 }
 0x195   :  { %5816 = vmatpush3.bf16.msra.mxu0 %v5815_v13  ;;  %v8385_v30 = vsub.f32 %v8092_v32, %v9159_v23  ;;  %v9162_v32 = vand.u32 4294901760, %v8126_v0 }
 0x196   :  { %v8390_v10 = vsub.f32 %v8097_v49, %v9160_v21  ;;  %5818 = vmatprep.subr.bf16.mxu0 %v5817_v7  ;;  %v8399_v58 = vsub.f32 %v8121_v37, %v9161_v50  ;;  %v5823_v49 = vpack.c.bf16 %v8378_v35, %v8373_v54 }
 0x197   :  { %5716 = vmatpush3.bf16.msra.mxu1 %v9108_v24  ;;  %v8404_v13 = vsub.f32 %v8126_v0, %v9162_v32  ;;  %v8411_v24 = vsub.f32 %v8132_v38, %v9163_v57  ;;  %v9165_v0 = vand.u32 4294901760, %v8164_v11  ;;  %v9166_v38 = vand.u32 4294901760, %v8169_v17 }
 0x198   :  { %5718 = vmatprep.subr.bf16.mxu1 %v9109_v4  ;;  %v9164_v4 = vand.u32 4294901760, %v8137_v28  ;;  %v5825_v37 = vpack.c.bf16 %v8390_v10, %v8385_v30  ;;  %v3083_v32 = vand.u32 4294901760, %v8237_v14 }
 0x199   :  { %5820 = vmatpush3.bf16.msra.mxu0 %v5819_v27  ;;  %v8425_v8 = vsub.f32 %v8164_v11, %v9165_v0  ;;  %v8430_v7 = vsub.f32 %v8169_v17, %v9166_v38  ;;  %v9169_v27 = vand.u32 4294901760, %v8208_v39 }
 0x19a   :  { %v8416_v47 = vsub.f32 %v8137_v28, %v9164_v4  ;;  %5822 = vmatprep.subr.bf16.mxu0 %v5821_v33  ;;  %v5827_v28 = vpack.c.bf16 %v8404_v13, %v8399_v58  ;;  %v3084_v57 = vsub.f32 %v8237_v14, %v3083_v32  ;;  %v2978_v14 = vand.u32 4294901760, %v8286_v1 }
 0x19b   :  { %5720 = vmatpush3.bf16.msra.mxu1 %v9114_v56  ;;  %v8437_v56 = vsub.f32 %v8175_v20, %v9167_v15  ;;  %v8450_v23 = vsub.f32 %v8208_v39, %v9169_v27  ;;  %v9170_v20 = vand.u32 4294901760, %v8213_v31  ;;  %v5831_v50 = vpack.c.bf16 %v8430_v7, %v8425_v8 }
 0x19c   :  { %5722 = vmatprep.subr.bf16.mxu1 %v9115_v34  ;;  %v9168_v34 = vand.u32 4294901760, %v8180_v55  ;;  %v5829_v11 = vpack.c.bf16 %v8416_v47, %v8411_v24 }
 0x19d   :  { %5824 = vmatpush3.bf16.msra.mxu0 %v5823_v49  ;;  %v8455_v21 = vsub.f32 %v8213_v31, %v9170_v20  ;;  %v2964_v31 = vand.u32 4294901760, %v8251_v18 }
 0x19e   :  { %v8442_v9 = vsub.f32 %v8180_v55, %v9168_v34  ;;  %5826 = vmatprep.subr.bf16.mxu0 %v5825_v37 }
 0x19f   :  { %v4471_v17 = vpop.f32.mrb[4].mxu0  ;;  %5724 = vmatpush3.bf16.msra.mxu1 %v9120_v36  ;;  %v3076_v36 = vand.u32 4294901760, %v8232_v26  ;;  %v2965_v4 = vsub.f32 %v8251_v18, %v2964_v31  ;;  %v5835_v0 = vpack.c.bf16 %v8455_v21, %v8450_v23 }
 0x1a0   :  { %v4472_v33 = vpop.f32.mrb[5].mxu0  ;;  %5726 = vmatprep.subr.bf16.mxu1 %v9121_v5  ;;  %v5833_v39 = vpack.c.bf16 %v8442_v9, %v8437_v56  ;;  %v2971_v5 = vand.u32 4294901760, %v8256_v22 }
 0x1a1   :  { %v8458_v55 = vadd.f32 %v4472_v33, %v4471_v17  ;;  %5828 = vmatpush3.bf16.msra.mxu0 %v5827_v28  ;;  %v3077_v49 = vsub.f32 %v8232_v26, %v3076_v36  ;;  %v5869_v38 = vpack.c.bf16 %v3083_v32, %v3076_v36  ;;  %v3097_v26 = vand.u32 4294901760, %v8273_v19 }
 0x1a2   :  { %5830 = vmatprep.subr.bf16.mxu0 %v5829_v11  ;;  %v2972_v28 = vsub.f32 %v8256_v22, %v2971_v5  ;;  %v3085_v11 = vand.u32 4294901760, %v3084_v57  ;;  %v5871_v17 = vpack.c.bf16 %v2971_v5, %v2964_v31  ;;  %v2966_v27 = vand.u32 4294901760, %v2965_v4  ;;  %v9171_v5 = vld [vmem:[#allocation35_spill] sm:$0xff] }
 0x1a3   :  { %5728 = vmatpush3.bf16.msra.mxu1 %v9130_v53  ;;  %v3090_v53 = vand.u32 4294901760, %v8268_v43  ;;  %v3078_v18 = vand.u32 4294901760, %v3077_v49  ;;  %v3098_v20 = vsub.f32 %v8273_v19, %v3097_v26  ;;  %v3104_v36 = vand.u32 4294901760, %v8300_v61 }
 0x1a4   :  { %5730 = vmatprep.subr.bf16.mxu1 %v9131_v3  ;;  %v2985_v3 = vand.u32 4294901760, %v8291_v63  ;;  %v3111_v32 = vand.u32 4294901760, %v8305_v40  ;;  %v2979_v49 = vsub.f32 %v8286_v1, %v2978_v14  ;;  %v2992_v57 = vand.u32 4294901760, %v8317_v46 }
 0x1a5   :  { %v4366_v37 = vpop.f32.mrb[4].mxu1  ;;  %5832 = vmatpush3.bf16.msra.mxu0 %v5831_v50  ;;  %v3091_v22 = vsub.f32 %v8268_v43, %v3090_v53  ;;  %v2973_v50 = vand.u32 4294901760, %v2972_v28  ;;  %v5773_v43 = vpack.c.bf16 %v3085_v11, %v3078_v18  ;;  %v3105_v19 = vsub.f32 %v8300_v61, %v3104_v36 }
 0x1a6   :  { %v4367_v15 = vpop.f32.mrb[5].mxu1  ;;  %5834 = vmatprep.subr.bf16.mxu0 %v5833_v39  ;;  %v5875_v39 = vpack.c.bf16 %v2985_v3, %v2978_v14  ;;  %v2999_v1 = vand.u32 4294901760, %v8322_v42  ;;  %v5877_v61 = vpack.c.bf16 %v3111_v32, %v3104_v36  ;;  %v3020_v36 = vand.u32 4294901760, %v8373_v54 }
 0x1a7   :  { %v4368_v34 = vadd.f32 %v4367_v15, %v4366_v37  ;;  %5732 = vmatpush3.bf16.msra.mxu1 %v9139_v2  ;;  %v5873_v2 = vpack.c.bf16 %v3097_v26, %v3090_v53  ;;  %v3092_v4 = vand.u32 4294901760, %v3091_v22  ;;  %v5775_v37 = vpack.c.bf16 %v2973_v50, %v2966_v27 }
 0x1a8   :  { %5734 = vmatprep.subr.bf16.mxu1 %v9140_v51  ;;  %v2986_v51 = vsub.f32 %v8291_v63, %v2985_v3  ;;  %v3099_v63 = vand.u32 4294901760, %v3098_v20  ;;  %v3000_v28 = vsub.f32 %v8322_v42, %v2999_v1  ;;  %v3006_v15 = vand.u32 4294901760, %v8344_v62 }
 0x1a9   :  { %v850_v33 = vadd.f32 %v4368_v34, %v8311_v41  ;;  %5836 = vmatpush3.bf16.msra.mxu0 %v5835_v0  ;;  %v3112_v41 = vsub.f32 %v8305_v40, %v3111_v32  ;;  %v3118_v40 = vand.u32 4294901760, %v8330_v16  ;;  %v2980_v0 = vand.u32 4294901760, %v2979_v49 }
 0x1aa   :  { %5870 = vmatprep.subr.bf16.mxu0 %v5869_v38  ;;  %v2987_v38 = vand.u32 4294901760, %v2986_v51  ;;  %v3013_v53 = vand.u32 4294901760, %v8349_v12  ;;  %v3106_v26 = vand.u32 4294901760, %v3105_v19  ;;  %v5777_v3 = vpack.c.bf16 %v3099_v63, %v3092_v4 }
 0x1ab   :  { %5736 = vmatpush3.bf16.msra.mxu1 %v9145_v48  ;;  %v8493_v31 = vadd.f32 %v8217_v29, %v850_v33  ;;  %v9172_v48 = vld [vmem:[#allocation22_spill] sm:$0xff]  ;;  %v3125_v29 = vand.u32 4294901760, %v8335_v52  ;;  %v3113_v14 = vand.u32 4294901760, %v3112_v41  ;;  %v3119_v34 = vsub.f32 %v8330_v16, %v3118_v40 }
 0x1ac   :  { %3326 = vmatmul.mubr.f32.vlgmr.msra.gmra.mrb[18].mxu0 %v9171_v5  ;;  %5738 = vmatprep.subr.bf16.mxu1 %v9146_v44  ;;  %v2993_v44 = vsub.f32 %v8317_v46, %v2992_v57  ;;  %v5879_v11 = vpack.c.bf16 %v2999_v1, %v2992_v57  ;;  %v3132_v46 = vand.u32 4294901760, %v8356_v60  ;;  %v3139_v42 = vand.u32 4294901760, %v8361_v59 }
 0x1ad   :  { %5872 = vmatpush3.bf16.msra.mxu0 %v5871_v17  ;;  %3600 = vmatprep.mubr.f32.mxu0 %v9172_v48  ;;  %v3126_v18 = vsub.f32 %v8335_v52, %v3125_v29  ;;  %v5881_v17 = vpack.c.bf16 %v3125_v29, %v3118_v40  ;;  %v3001_v22 = vand.u32 4294901760, %v3000_v28  ;;  %v3007_v20 = vsub.f32 %v8344_v62, %v3006_v15 }
 0x1ae   :  { %5874 = vmatprep.subr.bf16.mxu0 %v5873_v2  ;;  %v2994_v27 = vand.u32 4294901760, %v2993_v44  ;;  %v3014_v33 = vsub.f32 %v8349_v12, %v3013_v53  ;;  %v5779_v16 = vpack.c.bf16 %v2987_v38, %v2980_v0  ;;  %v5883_v52 = vpack.c.bf16 %v3013_v53, %v3006_v15 }
 0x1af   :  { %5740 = vmatpush3.bf16.msra.mxu1 %v9151_v45  ;;  %v9173_v45 = vld [vmem:[#allocation19_spill] sm:$0xff]  ;;  %v5781_v50 = vpack.c.bf16 %v3113_v14, %v3106_v26  ;;  %v3120_v32 = vand.u32 4294901760, %v3119_v34  ;;  %v3127_v2 = vand.u32 4294901760, %v3126_v18  ;;  %v3140_v49 = vsub.f32 %v8361_v59, %v3139_v42 }
 0x1b0   :  { %5774 = vmatprep.subr.bf16.mxu1 %v5773_v43  ;;  %v5885_v51 = vpack.c.bf16 %v3139_v42, %v3132_v46  ;;  %v3027_v62 = vand.u32 4294901760, %v8378_v35  ;;  %v3146_v12 = vand.u32 4294901760, %v8385_v30  ;;  %v3153_v43 = vand.u32 4294901760, %v8390_v10 }
 0x1b1   :  { %5876 = vmatpush3.bf16.msra.mxu0 %v5875_v39  ;;  %v3133_v39 = vsub.f32 %v8356_v60, %v3132_v46  ;;  %v5783_v19 = vpack.c.bf16 %v3001_v22, %v2994_v27  ;;  %v3008_v41 = vand.u32 4294901760, %v3007_v20  ;;  %v3015_v57 = vand.u32 4294901760, %v3014_v33 }
 0x1b2   :  { %2844 = vmatmul.mubr.f32.vlgmr.msra.gmra.mrb[18].mxu1 %v9173_v45  ;;  %5878 = vmatprep.subr.bf16.mxu0 %v5877_v61  ;;  %v3034_v1 = vand.u32 4294901760, %v8399_v58  ;;  %v3021_v4 = vsub.f32 %v8373_v54, %v3020_v36  ;;  %v3028_v60 = vsub.f32 %v8378_v35, %v3027_v62  ;;  %v3147_v59 = vsub.f32 %v8385_v30, %v3146_v12 }
 0x1b3   :  { %5776 = vmatpush3.bf16.msra.mxu1 %v5775_v37  ;;  %3186 = vmatprep.mubr.f32.mxu1 %v9172_v48  ;;  %v3154_v63 = vsub.f32 %v8390_v10, %v3153_v43  ;;  %v5785_v37 = vpack.c.bf16 %v3127_v2, %v3120_v32  ;;  %v3041_v61 = vand.u32 4294901760, %v8404_v13  ;;  %v3134_v40 = vand.u32 4294901760, %v3133_v39 }
 0x1b4   :  { %5778 = vmatprep.subr.bf16.mxu1 %v5777_v3  ;;  %v3141_v29 = vand.u32 4294901760, %v3140_v49  ;;  %v5887_v0 = vpack.c.bf16 %v3027_v62, %v3020_v36  ;;  %v3160_v38 = vand.u32 4294901760, %v8411_v24  ;;  %v3167_v44 = vand.u32 4294901760, %v8416_v47 }
 0x1b5   :  { %5880 = vmatpush3.bf16.msra.mxu0 %v5879_v11  ;;  %v5787_v54 = vpack.c.bf16 %v3015_v57, %v3008_v41  ;;  %v5889_v28 = vpack.c.bf16 %v3153_v43, %v3146_v12  ;;  %v3035_v35 = vsub.f32 %v8399_v58, %v3034_v1  ;;  %v3042_v30 = vsub.f32 %v8404_v13, %v3041_v61 }
 0x1b6   :  { %5882 = vmatprep.subr.bf16.mxu0 %v5881_v17  ;;  %v3022_v10 = vand.u32 4294901760, %v3021_v4  ;;  %v3029_v15 = vand.u32 4294901760, %v3028_v60  ;;  %v3148_v53 = vand.u32 4294901760, %v3147_v59  ;;  %v3155_v26 = vand.u32 4294901760, %v3154_v63 }
 0x1b7   :  { %5780 = vmatpush3.bf16.msra.mxu1 %v5779_v16  ;;  %v5789_v14 = vpack.c.bf16 %v3141_v29, %v3134_v40  ;;  %v3161_v3 = vsub.f32 %v8411_v24, %v3160_v38  ;;  %v3168_v34 = vsub.f32 %v8416_v47, %v3167_v44  ;;  %v5891_v18 = vpack.c.bf16 %v3041_v61, %v3034_v1  ;;  %v9174_v40 = vld [vmem:[#allocation9_spill] sm:$0xff]  ;;  %v9175_v29 = vld [vmem:[#allocation23_spill] sm:$0xff] }
 0x1b8   :  { %5782 = vmatprep.subr.bf16.mxu1 %v5781_v50  ;;  %v5893_v11 = vpack.c.bf16 %v3167_v44, %v3160_v38  ;;  %v3048_v17 = vand.u32 4294901760, %v8425_v8  ;;  %v3055_v58 = vand.u32 4294901760, %v8430_v7  ;;  %v3036_v13 = vand.u32 4294901760, %v3035_v35  ;;  %v9178_v44 = vld [vmem:[#allocation2_spill] sm:$0xff] }
 0x1b9   :  { %5884 = vmatpush3.bf16.msra.mxu0 %v5883_v52  ;;  %v3043_v46 = vand.u32 4294901760, %v3042_v30  ;;  %v3174_v42 = vand.u32 4294901760, %v8437_v56  ;;  %v3181_v45 = vand.u32 4294901760, %v8442_v9  ;;  %v5791_v22 = vpack.c.bf16 %v3029_v15, %v3022_v10  ;;  %v9183_v30 = vld [vmem:[#allocation27_spill] sm:$0xff] }
 0x1ba   :  { %5886 = vmatprep.subr.bf16.mxu0 %v5885_v51  ;;  %v5793_v24 = vpack.c.bf16 %v3155_v26, %v3148_v53  ;;  %v3049_v47 = vsub.f32 %v8425_v8, %v3048_v17  ;;  %v3056_v20 = vsub.f32 %v8430_v7, %v3055_v58  ;;  %v3162_v16 = vand.u32 4294901760, %v3161_v3  ;;  %v9184_v15 = vld [vmem:[#allocation7_spill] sm:$0xff]  ;;  %v9185_v26 = vld [vmem:[#allocation28_spill] sm:$0xff] }
 0x1bb   :  { %5784 = vmatpush3.bf16.msra.mxu1 %v5783_v19  ;;  %v3169_v52 = vand.u32 4294901760, %v3168_v34  ;;  %v3175_v50 = vsub.f32 %v8437_v56, %v3174_v42  ;;  %v3182_v36 = vsub.f32 %v8442_v9, %v3181_v45  ;;  %v5895_v2 = vpack.c.bf16 %v3055_v58, %v3048_v17  ;;  %v9189_v58 = vld [vmem:[#allocation12_spill] sm:$0xff] }
 0x1bc   :  { %5786 = vmatprep.subr.bf16.mxu1 %v5785_v37  ;;  %v3062_v39 = vand.u32 4294901760, %v8450_v23  ;;  %v3069_v49 = vand.u32 4294901760, %v8455_v21  ;;  %v5795_v51 = vpack.c.bf16 %v3043_v46, %v3036_v13  ;;  %v5897_v8 = vpack.c.bf16 %v3181_v45, %v3174_v42  ;;  %v9190_v46 = vld [vmem:[#allocation10_spill] sm:$0xff] }
 0x1bd   :  { %5888 = vmatpush3.bf16.msra.mxu0 %v5887_v0  ;;  %v3050_v7 = vand.u32 4294901760, %v3049_v47  ;;  %v3057_v62 = vand.u32 4294901760, %v3056_v20  ;;  %v5797_v56 = vpack.c.bf16 %v3169_v52, %v3162_v16  ;;  %v3176_v9 = vand.u32 4294901760, %v3175_v50  ;;  %v9176_v0 = vld [vmem:[#allocation24_spill] sm:$0xff] }
 0x1be   :  { %5890 = vmatprep.subr.bf16.mxu0 %v5889_v28  ;;  %v3063_v12 = vsub.f32 %v8450_v23, %v3062_v39  ;;  %v3070_v43 = vsub.f32 %v8455_v21, %v3069_v49  ;;  %v3183_v19 = vand.u32 4294901760, %v3182_v36  ;;  %v5899_v57 = vpack.c.bf16 %v3069_v49, %v3062_v39  ;;  %v9182_v28 = vld [vmem:[#allocation6_spill] sm:$0xff] }
 0x1bf   :  { %v4541_v27 = vpop.f32.mrb[6].mxu0  ;;  %5788 = vmatpush3.bf16.msra.mxu1 %v5787_v54  ;;  %v5799_v60 = vpack.c.bf16 %v3057_v62, %v3050_v7  ;;  %v9177_v38 = vand.u32 4294901760, %v7898_v25  ;;  %v9180_v54 = vld [vmem:[#allocation3_spill] sm:$0xff]  ;;  %v9186_v25 = vld [vmem:[#allocation29_spill] sm:$0xff]  ;;  %v9191_v42 = vand.u32 4294901760, %v9171_v5 }
 0x1c0   :  { %v4542_v33 = vpop.f32.mrb[7].mxu0  ;;  %5790 = vmatprep.subr.bf16.mxu1 %v5789_v14  ;;  %v3064_v59 = vand.u32 4294901760, %v3063_v12  ;;  %v3071_v63 = vand.u32 4294901760, %v3070_v43  ;;  %v5801_v37 = vpack.c.bf16 %v3183_v19, %v3176_v9 }
 0x1c1   :  { %v4543_v32 = vadd.f32 %v4542_v33, %v4541_v27  ;;  %5892 = vmatpush3.bf16.msra.mxu0 %v5891_v18  ;;  %v9187_v18 = vld [vmem:[#allocation31_spill] sm:$0xff] }
 0x1c2   :  { %5894 = vmatprep.subr.bf16.mxu0 %v5893_v11  ;;  %v5803_v21 = vpack.c.bf16 %v3071_v63, %v3064_v59  ;;  %v9188_v11 = vld [vmem:[#allocation11_spill] sm:$0xff]  ;;  %v3720_v59 = vld [vmem:[%s8666_s5] sm:$0xff] }
 0x1c3   :  { %5792 = vmatpush3.bf16.msra.mxu1 %v5791_v22  ;;  %v3721_v63 = vld [vmem:[%s8666_s5 + $0x8] sm:$0xff] }
 0x1c4   :  { %5794 = vmatprep.subr.bf16.mxu1 %v5793_v24 }
 0x1c5   :  { %v4436_v41 = vpop.f32.mrb[6].mxu1  ;;  %5896 = vmatpush3.bf16.msra.mxu0 %v5895_v2 }
 0x1c6   :  { %v4437_v1 = vpop.f32.mrb[7].mxu1  ;;  %5898 = vmatprep.subr.bf16.mxu0 %v5897_v8 }
 0x1c7   :  { %v4438_v4 = vadd.f32 %v4437_v1, %v4436_v41  ;;  %5796 = vmatpush3.bf16.msra.mxu1 %v5795_v51 }
 0x1c8   :  { %5798 = vmatprep.subr.bf16.mxu1 %v5797_v56 }
 0x1c9   :  { %v1122_v23 = vadd.f32 %v4438_v4, %v8493_v31  ;;  %5900 = vmatpush3.bf16.msra.mxu0 %v5899_v57  ;;  %v9179_v31 = vld [vmem:[#allocation25_spill] sm:$0xff] }
 0x1cb   :  { %5800 = vmatpush3.bf16.msra.mxu1 %v5799_v60  ;;  %v1234_v61 = vadd.f32 %v8458_v55, %v1122_v23  ;;  %v9181_v55 = vld [vmem:[#allocation4_spill] sm:$0xff]  ;;  %v3739_v23 = vand.u32 4294901760, %v3721_v63 }
 0x1cc   :  { %3602 = vmatmul.mubr.f32.vlgmr.msra.gmra.mrb[20].mxu0 %v9174_v40  ;;  %5802 = vmatprep.subr.bf16.mxu1 %v5801_v37  ;;  %v3736_v37 = vand.u32 4294901760, %v3720_v59 }
 0x1cf   :  { %5804 = vmatpush3.bf16.msra.mxu1 %v5803_v21  ;;  %v8593_v21 = vpack.c.bf16 %v3739_v23, %v3736_v37 }
 0x1d0   :  { %5838 = vmatprep.subr.bf16.mxu1 %v9175_v29 }
 0x1d2   :  { %3188 = vmatmul.mubr.f32.vlgmr.msra.gmra.mrb[20].mxu1 %v9174_v40 }
 0x1d3   :  { %5840 = vmatpush3.bf16.msra.mxu1 %v9176_v0  ;;  %3430 = vmatprep.mubr.f32.mxu1 %v9177_v38  ;;  %v3723_v38 = vld [vmem:[%s8666_s5 + $0x18] sm:$0xff] }
 0x1d4   :  { %5842 = vmatprep.subr.bf16.mxu1 %v9178_v44 }
 0x1d7   :  { %5844 = vmatpush3.bf16.msra.mxu1 %v9179_v31 }
 0x1d8   :  { %5846 = vmatprep.subr.bf16.mxu1 %v9180_v54 }
 0x1db   :  { %5848 = vmatpush3.bf16.msra.mxu1 %v9181_v55 }
 0x1dc   :  { %5850 = vmatprep.subr.bf16.mxu1 %v9182_v28 }
 0x1df   :  { %v4611_v35 = vpop.f32.mrb[8].mxu0  ;;  %5852 = vmatpush3.bf16.msra.mxu1 %v9183_v30 }
 0x1e0   :  { %v4612_v10 = vpop.f32.mrb[9].mxu0  ;;  %5854 = vmatprep.subr.bf16.mxu1 %v9184_v15 }
 0x1e1   :  { %v4613_v53 = vadd.f32 %v4612_v10, %v4611_v35 }
 0x1e3   :  { %5856 = vmatpush3.bf16.msra.mxu1 %v9185_v26 }
 0x1e4   :  { %5858 = vmatprep.subr.bf16.mxu1 %v9186_v25 }
 0x1e5   :  { %v4506_v14 = vpop.f32.mrb[8].mxu1 }
 0x1e6   :  { %v4507_v3 = vpop.f32.mrb[9].mxu1 }
 0x1e7   :  { %v4508_v34 = vadd.f32 %v4507_v3, %v4506_v14  ;;  %5860 = vmatpush3.bf16.msra.mxu1 %v9187_v18 }
 0x1e8   :  { %5862 = vmatprep.subr.bf16.mxu1 %v9188_v11 }
 0x1e9   :  { %v1466_v17 = vadd.f32 %v4508_v34, %v1234_v61  ;;  %v8595_v61 = vsub.f32 %v3720_v59, %v3736_v37 }
 0x1eb   :  { %5864 = vmatpush3.bf16.msra.mxu1 %v9189_v58  ;;  %v1604_v13 = vadd.f32 %v4543_v32, %v1466_v17 }
 0x1ec   :  { %5866 = vmatprep.subr.bf16.mxu1 %v9190_v46 }
 0x1ef   :  { %5868 = vmatpush3.bf16.msra.mxu1 %v8263_v6 }
 0x1f0   :  { %5902 = vmatprep.subr.bf16.mxu1 %v9175_v29  ;;  %v5990_v29 = vmov 0.0|0.0  }
 0x1f1   :  { %5933 = vmatprep.subr.bf16.mxu0 %v5990_v29 }
 0x1f2   :  { %3434 = vmatmul.mubr.f32.vlgmr.msra.gmra.mrb[22].mxu1 %v9191_v42  ;;  %5935 = vmatpush3.bf16.msra.mxu0 %v8593_v21 }
 0x1f3   :  { %5904 = vmatpush3.bf16.msra.mxu1 %v9176_v0  ;;  %3704 = vmatprep.mubr.f32.mxu1 %v9172_v48  ;;  %v3722_v0 = vld [vmem:[%s8666_s5 + $0x10] sm:$0xff] }
 0x1f4   :  { %5906 = vmatprep.subr.bf16.mxu1 %v9178_v44  ;;  %v3742_v44 = vand.u32 4294901760, %v3722_v0  ;;  %5936 = vmatprep.subr.bf16.mxu0 %v5990_v29 }
 0x1f7   :  { %5908 = vmatpush3.bf16.msra.mxu1 %v9179_v31  ;;  %v3745_v31 = vand.u32 4294901760, %v3723_v38 }
 0x1f8   :  { %5910 = vmatprep.subr.bf16.mxu1 %v9180_v54  ;;  %v5992_v54 = vmov 0.0  }
 0x1f9   :  { %5107 = vmatprep.mubr.msk.f32.mxu0 %vm5991_vm3, %v5992_v54  ;;  %v8612_v35 = vpack.c.bf16 %v3745_v31, %v3742_v44  ;;  %v8616_v10 = vsub.f32 %v3723_v38, %v3745_v31 }
 0x1fb   :  { %5912 = vmatpush3.bf16.msra.mxu1 %v9181_v55  ;;  %v3817_v55 = vand.u32 4294901760, %v8595_v61  ;;  %5938 = vmatpush3.bf16.msra.mxu0 %v8612_v35  ;;  %v3838_v14 = vand.u32 4294901760, %v8616_v10 }
 0x1fc   :  { %5914 = vmatprep.subr.bf16.mxu1 %v9182_v28  ;;  %5939 = vmatprep.subr.bf16.mxu0 %v5990_v29 }
 0x1ff   :  { %5916 = vmatpush3.bf16.msra.mxu1 %v9183_v30  ;;  %v4681_v45 = vpop.f32.mrb[10].mxu0  ;;  %v8614_v30 = vsub.f32 %v3722_v0, %v3742_v44 }
 0x200   :  { %5918 = vmatprep.subr.bf16.mxu1 %v9184_v15  ;;  %v4682_v5 = vpop.f32.mrb[11].mxu0  ;;  %v3818_v15 = vsub.f32 %v8595_v61, %v3817_v55 }
 0x201   :  { %v4683_v27 = vadd.f32 %v4682_v5, %v4681_v45 }
 0x203   :  { %5920 = vmatpush3.bf16.msra.mxu1 %v9185_v26  ;;  %v3819_v26 = vand.u32 4294901760, %v3818_v15 }
 0x204   :  { %5922 = vmatprep.subr.bf16.mxu1 %v9186_v25  ;;  %v3831_v25 = vand.u32 4294901760, %v8614_v30 }
 0x205   :  { %v4576_v48 = vpop.f32.mrb[10].mxu1 }
 0x206   :  { %v4577_v22 = vpop.f32.mrb[11].mxu1  ;;  %v3832_v34 = vsub.f32 %v8614_v30, %v3831_v25 }
 0x207   :  { %v4578_v24 = vadd.f32 %v4577_v22, %v4576_v48  ;;  %5924 = vmatpush3.bf16.msra.mxu1 %v9187_v18  ;;  %v3839_v18 = vsub.f32 %v8616_v10, %v3838_v14 }
 0x208   :  { %5926 = vmatprep.subr.bf16.mxu1 %v9188_v11  ;;  %v3833_v17 = vand.u32 4294901760, %v3832_v34 }
 0x209   :  { %v1712_v47 = vadd.f32 %v4578_v24, %v1604_v13 }
 0x20b   :  { %5928 = vmatpush3.bf16.msra.mxu1 %v9189_v58  ;;  %v1880_v20 = vadd.f32 %v4613_v53, %v1712_v47  ;;  %v3840_v58 = vand.u32 4294901760, %v3839_v18 }
 0x20c   :  { %5930 = vmatprep.subr.bf16.mxu1 %v9190_v46 }
 0x20d   :  { %v5943_v13 = vpack.c.bf16 %v3840_v58, %v3833_v17 }
 0x20f   :  { %5932 = vmatpush3.bf16.msra.mxu1 %v8263_v6 }
 0x212   :  { %3706 = vmatmul.mubr.f32.vlgmr.msra.gmra.mrb[24].mxu1 %v9174_v40  ;;  %v8597_v40 = vsub.f32 %v3721_v63, %v3739_v23 }
 0x214   :  { %v3824_v28 = vand.u32 4294901760, %v8597_v40  ;;  %v5946_v5 = vpack.c.bf16 %v8597_v40, %v8595_v61  ;;  %v4228_v61 = vld [vmem:[%s8668_s6] ss:$0 sm:$0xff] }
 0x216   :  { %v3825_v53 = vsub.f32 %v8597_v40, %v3824_v28 }
 0x218   :  { %v3826_v3 = vand.u32 4294901760, %v3825_v53 }
 0x21a   :  { %v5940_v11 = vpack.c.bf16 %v3826_v3, %v3819_v26 }
 0x21f   :  { %v4751_v33 = vpop.f32.mrb[12].mxu0 }
 0x220   :  { %v4752_v16 = vpop.f32.mrb[13].mxu0 }
 0x221   :  { %v4753_v52 = vadd.f32 %v4752_v16, %v4751_v33  ;;  %v5958_v33 = vpack.c.bf16 %v3824_v28, %v3817_v55  ;;  %v5961_v16 = vpack.c.bf16 %v3838_v14, %v3831_v25 }
 0x225   :  { %v4646_v50 = vpop.f32.mrb[12].mxu1 }
 0x226   :  { %v4647_v36 = vpop.f32.mrb[13].mxu1 }
 0x227   :  { %v4648_v32 = vadd.f32 %v4647_v36, %v4646_v50 }
 0x229   :  { %v1984_v2 = vadd.f32 %v4648_v32, %v1880_v20 }
 0x22b   :  { %v2096_v39 = vadd.f32 %v4683_v27, %v1984_v2  ;;  %v5949_v27 = vpack.c.bf16 %v8616_v10, %v8614_v30 }
 0x23f   :  { %v4821_v49 = vpop.f32.mrb[14].mxu0 }
 0x240   :  { %v4822_v51 = vpop.f32.mrb[15].mxu0 }
 0x241   :  { %v4823_v8 = vadd.f32 %v4822_v51, %v4821_v49 }
 0x245   :  { %v4716_v7 = vpop.f32.mrb[14].mxu1 }
 0x246   :  { %v4717_v62 = vpop.f32.mrb[15].mxu1 }
 0x247   :  { %v4718_v12 = vadd.f32 %v4717_v62, %v4716_v7 }
 0x249   :  { %v2328_v43 = vadd.f32 %v4718_v12, %v2096_v39 }
 0x24b   :  { %v2466_v56 = vadd.f32 %v4753_v52, %v2328_v43 }
 0x25f   :  { %v4891_v9 = vpop.f32.mrb[16].mxu0 }
 0x260   :  { %v4892_v6 = vpop.f32.mrb[17].mxu0 }
 0x261   :  { %v4893_v19 = vadd.f32 %v4892_v6, %v4891_v9 }
 0x265   :  { %v4786_v41 = vpop.f32.mrb[16].mxu1 }
 0x266   :  { %v4787_v57 = vpop.f32.mrb[17].mxu1 }
 0x267   :  { %v4788_v1 = vadd.f32 %v4787_v57, %v4786_v41 }
 0x269   :  { %v2574_v4 = vadd.f32 %v4788_v1, %v2466_v56 }
 0x26b   :  { %v2742_v60 = vadd.f32 %v4823_v8, %v2574_v4 }
 0x27f   :  { %v4961_v46 = vpop.f32.mrb[18].mxu0 }
 0x280   :  { %v4962_v42 = vpop.f32.mrb[19].mxu0 }
 0x281   :  { %v4963_v45 = vadd.f32 %v4962_v42, %v4961_v46 }
 0x285   :  { %v4856_v48 = vpop.f32.mrb[18].mxu1 }
 0x286   :  { %v4857_v22 = vpop.f32.mrb[19].mxu1 }
 0x287   :  { %v4858_v24 = vadd.f32 %v4857_v22, %v4856_v48 }
 0x289   :  { %v2846_v47 = vadd.f32 %v4858_v24, %v2742_v60 }
 0x28b   :  { %v2958_v20 = vadd.f32 %v4893_v19, %v2846_v47  ;;  %v4227_v19 = vld [vmem:[%s8667_s4] ss:$0 sm:$0xff] }
 0x29f   :  { %v5031_v52 = vpop.f32.mrb[20].mxu0 }
 0x2a0   :  { %v5032_v50 = vpop.f32.mrb[21].mxu0 }
 0x2a1   :  { %v5033_v36 = vadd.f32 %v5032_v50, %v5031_v52 }
 0x2a5   :  { %v4926_v32 = vpop.f32.mrb[20].mxu1 }
 0x2a6   :  { %v4927_v2 = vpop.f32.mrb[21].mxu1 }
 0x2a7   :  { %v4928_v39 = vadd.f32 %v4927_v2, %v4926_v32 }
 0x2a9   :  { %v3190_v49 = vadd.f32 %v4928_v39, %v2958_v20 }
 0x2ab   :  { %v3328_v51 = vadd.f32 %v4963_v45, %v3190_v49 }
 0x2c5   :  { %v4996_v8 = vpop.f32.mrb[22].mxu1 }
 0x2c6   :  { %v4997_v7 = vpop.f32.mrb[23].mxu1 }
 0x2c7   :  { %v4998_v62 = vadd.f32 %v4997_v7, %v4996_v8 }
 0x2c9   :  { %v3436_v12 = vadd.f32 %v4998_v62, %v3328_v51 }
 0x2cb   :  { %v3604_v43 = vadd.f32 %v5033_v36, %v3436_v12 }
 0x2e5   :  { %v5066_v56 = vpop.f32.mrb[24].mxu1 }
 0x2e6   :  { %v5067_v9 = vpop.f32.mrb[25].mxu1 }
 0x2e7   :  { %v5068_v6 = vadd.f32 %v5067_v9, %v5066_v56 }
 0x2e9   :  { %v3708_v41 = vadd.f32 %v5068_v6, %v3604_v43 }
 0x2eb   :  { %v3718_v57 = vadd.f32 %v4227_v19, %v3708_v41 }
 0x2ed   :  { %v3719_v1 = vmax.f32 %v3718_v57, 0.0 }
 0x2ef   :  { %v3733_v4 = vsel %vm3731_vm4, %v3719_v1, 0 }
 0x2f0   :  { %v3804_v60 = vand.u32 4294901760, %v3733_v4 }
 0x2f2   :  { %v3805_v59 = vsub.f32 %v3733_v4, %v3804_v60 }
 0x2f4   :  { %v3806_v63 = vand.u32 4294901760, %v3805_v59 }
 0x2f6   :  { %v3807_v37 = vsub.f32 %v3805_v59, %v3806_v63 }
 0x2f8   :  { %v3808_v23 = vand.u32 4294901760, %v3807_v37 }
 0x2fa   :  { %5108 = vmatmul.mubr.f32.vlgmr.msra.gmra.mrb[22].mxu0 %v3808_v23 }
 0x2fb   :  { %5941 = vmatpush3.bf16.msra.mxu0 %v5940_v11  ;;  %5118 = vmatprep.mubr.msk.f32.mxu0 %vm5991_vm3, %v5992_v54 }
 0x2fc   :  { %5942 = vmatprep.subr.bf16.mxu0 %v5990_v29 }
 0x2ff   :  { %5944 = vmatpush3.bf16.msra.mxu0 %v5943_v13 }
 0x300   :  { %5945 = vmatprep.subr.bf16.mxu0 %v5990_v29 }
 0x302   :  { %5119 = vmatmul.mubr.f32.vlgmr.msra.gmra.mrb[22].mxu0 %v3804_v60 }
 0x303   :  { %5947 = vmatpush3.bf16.msra.mxu0 %v5946_v5  ;;  %5129 = vmatprep.mubr.msk.f32.mxu0 %vm5991_vm3, %v5992_v54 }
 0x304   :  { %5948 = vmatprep.subr.bf16.mxu0 %v5990_v29 }
 0x307   :  { %5950 = vmatpush3.bf16.msra.mxu0 %v5949_v27 }
 0x308   :  { %5951 = vmatprep.subr.bf16.mxu0 %v5990_v29 }
 0x30a   :  { %5130 = vmatmul.mubr.f32.vlgmr.msra.gmra.mrb[22].mxu0 %v3805_v59 }
 0x30b   :  { %5953 = vmatpush3.bf16.msra.mxu0 %v8593_v21  ;;  %5140 = vmatprep.mubr.msk.f32.mxu0 %vm5991_vm3, %v5992_v54 }
 0x30c   :  { %5954 = vmatprep.subr.bf16.mxu0 %v5990_v29 }
 0x30f   :  { %5956 = vmatpush3.bf16.msra.mxu0 %v8612_v35 }
 0x310   :  { %5957 = vmatprep.subr.bf16.mxu0 %v5990_v29 }
 0x312   :  { %5141 = vmatmul.mubr.f32.vlgmr.msra.gmra.mrb[22].mxu0 %v3806_v63 }
 0x313   :  { %5959 = vmatpush3.bf16.msra.mxu0 %v5958_v33  ;;  %5151 = vmatprep.mubr.msk.f32.mxu0 %vm5991_vm3, %v5992_v54 }
 0x314   :  { %5960 = vmatprep.subr.bf16.mxu0 %v5990_v29 }
 0x317   :  { %5962 = vmatpush3.bf16.msra.mxu0 %v5961_v16 }
 0x318   :  { %5963 = vmatprep.subr.bf16.mxu0 %v5990_v29 }
 0x31a   :  { %5152 = vmatmul.mubr.f32.vlgmr.msra.gmra.mrb[22].mxu0 %v3804_v60 }
 0x31b   :  { %5965 = vmatpush3.bf16.msra.mxu0 %v8593_v21  ;;  %5162 = vmatprep.mubr.msk.f32.mxu0 %vm5991_vm3, %v5992_v54 }
 0x31c   :  { %5966 = vmatprep.subr.bf16.mxu0 %v5990_v29 }
 0x31f   :  { %5968 = vmatpush3.bf16.msra.mxu0 %v8612_v35 }
 0x322   :  { %5163 = vmatmul.mubr.f32.vlgmr.msra.gmra.mrb[22].mxu0 %v3804_v60 }
 0x3f5   :  { %v4216_v40 = vpop.f32.mrb[22].mxu0 }
 0x3f6   :  { %v5969_v0 = vadd.f32 %v4228_v61, %v4216_v40  ;;  %v5164_v38 = vpop.f32.mrb[23].mxu0 }
 0x3f8   :  { %v4220_v44 = vmax.f32 %v5969_v0, 0.0 }
 0x3fa   :  { %4222 = vst.msk [vmem:[%s8669_s7] sm:$0xff] %vm4221_vm5, %v4220_v44 }

</bundles_post_ra>
